<compile_context>
chip_gen: v5e
topology: v5e:2x2
jax: 0.10.0
libtpu: 0.0.40
codegen_flags: <defaults>
</compile_context>

<pallas_src>
import math
from functools import partial

import numpy as np
import jax
import jax.numpy as jnp
from jax.experimental import pallas as pl
from jax.experimental.pallas import tpu as pltpu

# ----------------------------- small synthetic config -----------------------
# (real DeTok uses ViT-S/ViT-B; shrunk so the demo runs fast on any TPU)
SIZE_DICT = {
    "small": dict(layers=2, heads=4, width=64),    # encoder
    "base":  dict(layers=2, heads=4, width=128),   # decoder
}
IMG = 64
PATCH = 16
GRID = IMG // PATCH          # 4
SEQ = GRID * GRID            # 16
TOKEN_CH = 16                # decoder latent channels; encoder emits 2*TOKEN_CH moments
MASK_RATIO_MAX = 0.75
GAMMA = 3.0


# ----------------------------- in-kernel helpers -----------------------------
def _rms(x):
    ms = jnp.mean(x * x, axis=-1, keepdims=True)
    return x * jax.lax.rsqrt(ms + 1e-6)


def _apply_rope(x, cos, sin_a, sin_b):
    """x*cos + rotate_half(x)*sin with the parity sign folded into sin_a/sin_b.

    sin_a pairs with roll(x, C-1) (== x[j+1]) and is (-sin) on even lanes only;
    sin_b pairs with roll(x, 1)   (== x[j-1]) and is (+sin) on odd  lanes only,
    so wrap-around and head-boundary terms are multiplied by exactly 0.
    """
    c = x.shape[-1]
    return (x * cos
            + pltpu.roll(x, shift=c - 1, axis=1) * sin_a
            + pltpu.roll(x, shift=1, axis=1) * sin_b)


def _block_body(x, cos, sin_a, sin_b, n1, qkv_w, qkv_b, proj_w, proj_b,
                n2, w12, b12, w3, b3, *, heads, head_dim, hidden_pad):
    """One pre-norm transformer block on an (N, C) tile resident in VMEM."""
    n, c = x.shape

    # ---- attention branch ---------------------------------------------------
    h = _rms(x) * n1
    qkv = jnp.dot(h.astype(jnp.bfloat16), qkv_w,
                  preferred_element_type=jnp.float32) + qkv_b
    q = _apply_rope(qkv[:, :c], cos, sin_a, sin_b)
    k = _apply_rope(qkv[:, c:2 * c], cos, sin_a, sin_b)
    v = qkv[:, 2 * c:]

    scale = 1.0 / math.sqrt(head_dim)
    attn = jnp.zeros((n, c), jnp.float32)
    for hi in range(heads):                        # static unrolled (heads = 4)
        lo = hi * head_dim
        qh = q[:, lo:lo + head_dim].astype(jnp.bfloat16)
        kh = k[:, lo:lo + head_dim].astype(jnp.bfloat16)
        vh = v[:, lo:lo + head_dim].astype(jnp.bfloat16)
        s = jax.lax.dot_general(qh, kh, (((1,), (1,)), ((), ())),
                                preferred_element_type=jnp.float32) * scale
        s = s - jnp.max(s, axis=-1, keepdims=True)
        p = jnp.exp(s)                             # softmax math in f32
        p = p * pl.reciprocal(jnp.sum(p, axis=-1, keepdims=True), approx=True)
        oh = jnp.dot(p.astype(jnp.bfloat16), vh, preferred_element_type=jnp.float32)
        # fold the head-concat into the output projection: no lane concatenate
        attn = attn + jnp.dot(oh.astype(jnp.bfloat16),
                              proj_w[lo:lo + head_dim, :],
                              preferred_element_type=jnp.float32)
    x = x + attn + proj_b

    # ---- SwiGLU FFN branch (hidden zero-padded to a 128 multiple) -----------
    h = _rms(x) * n2
    h12 = jnp.dot(h.astype(jnp.bfloat16), w12,
                  preferred_element_type=jnp.float32) + b12
    h1 = h12[:, :hidden_pad]
    h2 = h12[:, hidden_pad:]
    g = (h1 * jax.nn.sigmoid(h1)) * h2             # SiLU gate in f32
    ff = jnp.dot(g.astype(jnp.bfloat16), w3,
                 preferred_element_type=jnp.float32) + b3
    return x + ff


# ----------------------------- Pallas kernels --------------------------------
def _encoder_stack_kernel(patches_ref, pos_ref, cos_ref, sina_ref, sinb_ref,
                          patchw_ref, patchb_ref, lnpre_ref,
                          n1_ref, qkvw_ref, qkvb_ref, projw_ref, projb_ref,
                          n2_ref, w12_ref, b12_ref, w3_ref, b3_ref,
                          lnpost_ref, latw_ref, latb_ref, out_ref,
                          *, layers, heads, head_dim, hidden_pad):
    """Fused encoder (patch embed -> ln_pre -> blocks -> ln_post -> latent head)."""
    x = (jnp.dot(patches_ref[...].astype(jnp.bfloat16), patchw_ref[...],
                 preferred_element_type=jnp.float32)
         + patchb_ref[...] + pos_ref[...])
    x = _rms(x) * lnpre_ref[...]                   # ln_pre (replaces x)
    cos = cos_ref[...]
    sin_a = sina_ref[...]
    sin_b = sinb_ref[...]
    for l in range(layers):                        # layer loop stays in VMEM
        x = _block_body(x, cos, sin_a, sin_b,
                        n1_ref[l], qkvw_ref[l], qkvb_ref[l],
                        projw_ref[l], projb_ref[l],
                        n2_ref[l], w12_ref[l], b12_ref[l], w3_ref[l], b3_ref[l],
                        heads=heads, head_dim=head_dim, hidden_pad=hidden_pad)
    h = _rms(x) * lnpost_ref[...]                  # ln_post fused with latent head
    out_ref[...] = (jnp.dot(h.astype(jnp.bfloat16), latw_ref[...],
                            preferred_element_type=jnp.float32) + latb_ref[...])


def _decoder_stack_kernel(zlat_ref, ismask_ref, pos_ref, cos_ref, sina_ref, sinb_ref,
                          embw_ref, embb_ref, mtok_ref, lnpre_ref,
                          n1_ref, qkvw_ref, qkvb_ref, projw_ref, projb_ref,
                          n2_ref, w12_ref, b12_ref, w3_ref, b3_ref,
                          lnpost_ref, ffnw_ref, ffnb_ref, out_ref,
                          *, layers, heads, head_dim, hidden_pad):
    """Fused decoder (embed + mask-token + pos -> ln_pre -> blocks -> ffn head)."""
    z = (jnp.dot(zlat_ref[...].astype(jnp.bfloat16), embw_ref[...],
                 preferred_element_type=jnp.float32) + embb_ref[...])
    m = ismask_ref[...]                            # (SEQ, 1) in {0, 1}
    z = m * mtok_ref[...] + (1.0 - m) * z          # mask tokens bypass the embed
    z = z + pos_ref[...]
    z = _rms(z) * lnpre_ref[...]
    cos = cos_ref[...]
    sin_a = sina_ref[...]
    sin_b = sinb_ref[...]
    for l in range(layers):
        z = _block_body(z, cos, sin_a, sin_b,
                        n1_ref[l], qkvw_ref[l], qkvb_ref[l],
                        projw_ref[l], projb_ref[l],
                        n2_ref[l], w12_ref[l], b12_ref[l], w3_ref[l], b3_ref[l],
                        heads=heads, head_dim=head_dim, hidden_pad=hidden_pad)
    h = _rms(z) * lnpost_ref[...]
    # ln_post fused with the 1x1-conv "ffn" head; lane-dense (SEQ, 768) output.
    out_ref[...] = (jnp.dot(h.astype(jnp.bfloat16), ffnw_ref[...],
                            preferred_element_type=jnp.float32) + ffnb_ref[...])


def _conv3x3_kernel(taps_ref, w_ref, b_ref, o_ref):
    """One output channel per grid step.

    taps_ref: (3_cin, 9_taps, IMG, B*IMG) f32 — taps pre-shifted in glue, so the
              kernel is pure full-vreg scalar*tile FMAs (lane width 128).
    w_ref:    (81,) f32 SMEM, flattened (cout, cin, ky, kx)
    b_ref:    (3,)  f32 SMEM
    o_ref:    (IMG, B*IMG) f32 (the cout block for this grid step)
    """
    co = pl.program_id(0)
    rows, lanes = o_ref.shape
    acc = jnp.zeros((rows, lanes), jnp.float32)
    for ci in range(3):
        for t in range(9):
            acc = acc + w_ref[(co * 3 + ci) * 9 + t] * taps_ref[ci, t]
    o_ref[...] = acc + b_ref[co]


# ----------------------------- BlockSpec helpers -----------------------------
def _rep_spec(shape):
    """Full-array block, grid-invariant (weights, rope/pos tables)."""
    n = len(shape)
    return pl.BlockSpec(tuple(shape), lambda i, _n=n: (0,) * _n)


def _batch_spec(shape):
    """Block over (and squeeze) the leading dim of a full-size array."""
    n = len(shape)
    return pl.BlockSpec((None,) + tuple(shape[1:]),
                        lambda i, _n=n: (i,) + (0,) * (_n - 1))


# ----------------------------- Pallas wrappers -------------------------------
def pallas_encoder(p, patches_vis, pos_vis, cos_vis, sina_vis, sinb_vis):
    """One fused pallas_call for the whole encoder, gridded over batch."""
    B, n_vis, _ = patches_vis.shape
    W = p["patch_w"].shape[1]
    st = p["layers"]
    L = st["qkv_w"].shape[0]
    Hp = st["w3"].shape[1]
    kern = partial(_encoder_stack_kernel, layers=L, heads=p["heads"],
                   head_dim=W // p["heads"], hidden_pad=Hp)
    args = (patches_vis, pos_vis, cos_vis, sina_vis, sinb_vis,
            p["patch_w"], p["patch_b"], p["ln_pre"],
            st["norm1"], st["qkv_w"], st["qkv_b"], st["proj_w"], st["proj_b"],
            st["norm2"], st["w12"], st["b12"], st["w3"], st["b3"],
            p["ln_post"], p["latent_w"], p["latent_b"])
    in_specs = ([_batch_spec(a.shape) for a in args[:5]]
                + [_rep_spec(a.shape) for a in args[5:]])
    # TODO(synk): at real ViT-S/B sizes, single-buffer the grid-invariant weight
    # specs (pipeline_mode=pl.Buffered(1)) and set vmem_limit_bytes explicitly.
    return pl.pallas_call(
        kern,
        grid=(B,),
        in_specs=in_specs,
        out_specs=_batch_spec((B, n_vis, 2 * TOKEN_CH)),
        out_shape=jax.ShapeDtypeStruct((B, n_vis, 2 * TOKEN_CH), jnp.float32),
        compiler_params=pltpu.CompilerParams(dimension_semantics=("parallel",)),
    )(*args)


def pallas_decoder(p, z_lat_full, is_mask):
    """One fused pallas_call for the whole decoder, gridded over batch."""
    B, seq, _ = z_lat_full.shape
    W = p["embed_w"].shape[1]
    st = p["layers"]
    L = st["qkv_w"].shape[0]
    Hp = st["w3"].shape[1]
    out_dim = p["ffn_w"].shape[1]
    kern = partial(_decoder_stack_kernel, layers=L, heads=p["heads"],
                   head_dim=W // p["heads"], hidden_pad=Hp)
    args = (z_lat_full, is_mask,
            p["pos"], p["rope_cos"], p["rope_sina"], p["rope_sinb"],
            p["embed_w"], p["embed_b"], p["mask_token"], p["ln_pre"],
            st["norm1"], st["qkv_w"], st["qkv_b"], st["proj_w"], st["proj_b"],
            st["norm2"], st["w12"], st["b12"], st["w3"], st["b3"],
            p["ln_post"], p["ffn_w"], p["ffn_b"])
    in_specs = ([_batch_spec(a.shape) for a in args[:2]]
                + [_rep_spec(a.shape) for a in args[2:]])
    return pl.pallas_call(
        kern,
        grid=(B,),
        in_specs=in_specs,
        out_specs=_batch_spec((B, seq, out_dim)),
        out_shape=jax.ShapeDtypeStruct((B, seq, out_dim), jnp.float32),
        compiler_params=pltpu.CompilerParams(dimension_semantics=("parallel",)),
    )(*args)


def pallas_conv3x3(y_img, w_flat, b):
    """Conv2d(3, 3, 3, padding=1) with batch folded into a 128-wide lane axis."""
    B = y_img.shape[0]
    xpad = jnp.pad(y_img, ((0, 0), (0, 0), (1, 1), (1, 1)))     # (B,3,IMG+2,IMG+2)
    taps = []
    for ky in range(3):
        for kx in range(3):
            s = xpad[:, :, ky:ky + IMG, kx:kx + IMG]            # (B,3,IMG,IMG)
            taps.append(jnp.transpose(s, (1, 2, 0, 3)).reshape(3, IMG, B * IMG))
    taps = jnp.stack(taps, axis=1)                              # (3, 9, IMG, B*IMG)
    out = pl.pallas_call(
        _conv3x3_kernel,
        grid=(3,),                                              # one cout per step
        in_specs=[_rep_spec(taps.shape),
                  pl.BlockSpec(memory_space=pltpu.MemorySpace.SMEM),
                  pl.BlockSpec(memory_space=pltpu.MemorySpace.SMEM)],
        out_specs=_batch_spec((3, IMG, B * IMG)),
        out_shape=jax.ShapeDtypeStruct((3, IMG, B * IMG), jnp.float32),
        compiler_params=pltpu.CompilerParams(dimension_semantics=("parallel",)),
    )(taps, w_flat, b)
    return out.reshape(3, IMG, B, IMG).transpose(2, 0, 1, 3)    # (B,3,IMG,IMG)


# ----------------------------- RoPE tables (glue) ----------------------------
def get_rope_tensor(dim, seq_h, seq_w, max_freq=7.0, min_freq=0.0007):
    freqs_1d = max_freq * (max_freq / min_freq) ** np.linspace(0.0, -1.0, dim // 4)
    freqs_1d = np.concatenate([freqs_1d, freqs_1d])
    freqs_2d = np.zeros((2, dim))
    freqs_2d[0, : dim // 2] = freqs_1d
    freqs_2d[1, -(dim // 2):] = freqs_1d
    freqs_2d = freqs_2d * 2.0 * np.pi
    coord_x = np.linspace(0.0, 1.0, seq_h)
    coord_y = np.linspace(0.0, 1.0, seq_w)
    xx, yy = np.meshgrid(coord_x, coord_y, indexing="ij")       # cartesian_prod order
    coords = np.stack([xx.ravel(), yy.ravel()], axis=-1)        # (seq, 2)
    angle = coords @ freqs_2d                                   # (seq, dim)
    return np.concatenate([np.cos(angle), np.sin(angle)], axis=-1)  # (seq, 2*dim)


def _rope_tables(width, heads):
    """cos plus SIGNED sin tables, pre-tiled across heads to (SEQ, width).

    sin_a multiplies roll(x, C-1) (x[j+1]) and is (-sin) on even lanes;
    sin_b multiplies roll(x, 1)   (x[j-1]) and is (+sin) on odd  lanes.
    Together they realise interleaved-pair rotate_half with no in-kernel iota.
    """
    d = width // heads
    rope = get_rope_tensor(d, GRID, GRID)                       # (SEQ, 2d)
    cos = np.tile(rope[:, :d], (1, heads))
    sin = np.tile(rope[:, d:], (1, heads))
    lane = np.arange(width)[None, :]
    sin_a = np.where(lane % 2 == 0, -sin, 0.0)
    sin_b = np.where(lane % 2 == 1, sin, 0.0)
    return (jnp.asarray(cos, jnp.float32),
            jnp.asarray(sin_a, jnp.float32),
            jnp.asarray(sin_b, jnp.float32))


# ----------------------------- parameters ------------------------------------
def _pad_to(v, m):
    return ((v + m - 1) // m) * m


def _init_block(key, dim, hidden, hidden_pad):
    ks = jax.random.split(key, 5)
    # trunc_normal_(std=0.02) with +/-2.0 absolute bounds ~= plain normal * 0.02
    w1 = 0.02 * jax.random.normal(ks[0], (dim, hidden), jnp.float32)
    w2 = 0.02 * jax.random.normal(ks[1], (dim, hidden), jnp.float32)
    w3 = 0.02 * jax.random.normal(ks[2], (hidden, dim), jnp.float32)
    # zero-pad hidden to a 128 multiple: padded columns/rows contribute exactly 0
    w12 = jnp.zeros((dim, 2 * hidden_pad), jnp.float32)
    w12 = w12.at[:, :hidden].set(w1).at[:, hidden_pad:hidden_pad + hidden].set(w2)
    w3p = jnp.zeros((hidden_pad, dim), jnp.float32).at[:hidden].set(w3)
    return {
        "norm1": jnp.ones((1, dim), jnp.float32),
        "norm2": jnp.ones((1, dim), jnp.float32),
        "qkv_w": (0.02 * jax.random.normal(ks[3], (dim, 3 * dim), jnp.float32)
                  ).astype(jnp.bfloat16),
        "qkv_b": jnp.zeros((1, 3 * dim), jnp.float32),
        "proj_w": (0.02 * jax.random.normal(ks[4], (dim, dim), jnp.float32)
                   ).astype(jnp.bfloat16),
        "proj_b": jnp.zeros((1, dim), jnp.float32),
        "w12": w12.astype(jnp.bfloat16),
        "b12": jnp.zeros((1, 2 * hidden_pad), jnp.float32),
        "w3": w3p.astype(jnp.bfloat16),
        "b3": jnp.zeros((1, dim), jnp.float32),
    }


def _stack_layers(blocks):
    """Stack per-layer weights on a leading 'layer' axis for the fused kernel."""
    return {k: jnp.stack([blk[k] for blk in blocks], axis=0) for k in blocks[0]}


def init_encoder_params(key):
    cfg = SIZE_DICT["small"]
    W, L, H = cfg["width"], cfg["layers"], cfg["heads"]
    hidden = int(2 / 3 * W * 4.0)
    hidden_pad = _pad_to(hidden, 128)
    ks = jax.random.split(key, L + 3)
    cos, sina, sinb = _rope_tables(W, H)
    blocks = [_init_block(ks[2 + i], W, hidden, hidden_pad) for i in range(L)]
    return {
        "patch_w": (0.02 * jax.random.normal(ks[0], (3 * PATCH * PATCH, W), jnp.float32)
                    ).astype(jnp.bfloat16),
        "patch_b": jnp.zeros((1, W), jnp.float32),
        "pos": (W ** -0.5) * jax.random.normal(ks[1], (SEQ, W), jnp.float32),
        "ln_pre": jnp.ones((1, W), jnp.float32),
        "ln_post": jnp.ones((1, W), jnp.float32),
        "layers": _stack_layers(blocks),
        "latent_w": (0.02 * jax.random.normal(ks[2 + L], (W, 2 * TOKEN_CH), jnp.float32)
                     ).astype(jnp.bfloat16),
        "latent_b": jnp.zeros((1, 2 * TOKEN_CH), jnp.float32),
        "rope_cos": cos, "rope_sina": sina, "rope_sinb": sinb,
        "heads": H,
    }


def init_decoder_params(key):
    cfg = SIZE_DICT["base"]
    W, L, H = cfg["width"], cfg["layers"], cfg["heads"]
    hidden = int(2 / 3 * W * 4.0)
    hidden_pad = _pad_to(hidden, 128)
    ks = jax.random.split(key, L + 6)
    cos, sina, sinb = _rope_tables(W, H)
    blocks = [_init_block(ks[3 + i], W, hidden, hidden_pad) for i in range(L)]
    conv_w = 0.02 * jax.random.normal(ks[5 + L], (3, 3, 3, 3), jnp.float32)
    return {
        "embed_w": (0.02 * jax.random.normal(ks[0], (TOKEN_CH, W), jnp.float32)
                    ).astype(jnp.bfloat16),
        "embed_b": jnp.zeros((1, W), jnp.float32),
        "pos": (W ** -0.5) * jax.random.normal(ks[1], (SEQ, W), jnp.float32),
        "mask_token": (W ** -0.5) * jax.random.normal(ks[2], (1, W), jnp.float32),
        "ln_pre": jnp.ones((1, W), jnp.float32),
        "ln_post": jnp.ones((1, W), jnp.float32),
        "layers": _stack_layers(blocks),
        "ffn_w": (0.02 * jax.random.normal(ks[3 + L], (W, PATCH * PATCH * 3), jnp.float32)
                  ).astype(jnp.bfloat16),                       # 1x1 conv as linear
        "ffn_b": jnp.zeros((1, PATCH * PATCH * 3), jnp.float32),
        "conv_w": conv_w.reshape(-1),                            # (81,) flat [co,ci,ky,kx]
        "conv_b": jnp.zeros((3,), jnp.float32),
        "rope_cos": cos, "rope_sina": sina, "rope_sinb": sinb,
        "heads": H,
    }


# ----------------------------- model forward ---------------------------------
def encoder_forward(p, x_nchw, key):
    B = x_nchw.shape[0]
    # patch embed input: Conv2d(3, W, PATCH, stride=PATCH) == matmul over patches
    patches = (x_nchw.reshape(B, 3, GRID, PATCH, GRID, PATCH)
               .transpose(0, 2, 4, 1, 3, 5)
               .reshape(B, SEQ, 3 * PATCH * PATCH))

    # MAE random masking (glue).  Patch-embed and pos-add are per-token, so the
    # visible-token gather is hoisted in front of the fused kernel (commutes).
    # TODO(synk): per-call python-random mask_ratio draw (kept static for demo).
    mask_ratio = max(0.0, float(np.random.default_rng(0).uniform(-0.1, MASK_RATIO_MAX)))
    len_keep = int(np.ceil(SEQ * (1.0 - mask_ratio)))
    noise = jax.random.uniform(key, (B, SEQ))
    ids_shuffle = jnp.argsort(noise, axis=1)
    ids_restore = jnp.argsort(ids_shuffle, axis=1)
    ids_keep = ids_shuffle[:, :len_keep]

    def gather(a):                                   # a: (B, SEQ, D)
        d = a.shape[-1]
        idx = jnp.broadcast_to(ids_keep[..., None], (B, len_keep, d))
        return jnp.take_along_axis(a, idx, axis=1)

    def tile_b(t):                                   # (SEQ, D) -> (B, SEQ, D)
        return jnp.broadcast_to(t[None], (B,) + t.shape)

    patches_vis = gather(patches)
    pos_vis = gather(tile_b(p["pos"]))
    cos_vis = gather(tile_b(p["rope_cos"]))
    sina_vis = gather(tile_b(p["rope_sina"]))
    sinb_vis = gather(tile_b(p["rope_sinb"]))

    moments = pallas_encoder(p, patches_vis, pos_vis, cos_vis, sina_vis, sinb_vis)
    return moments, ids_restore


def decoder_forward(p, z_latents, ids_restore):
    B, n_vis, _ = z_latents.shape
    if ids_restore is not None:
        seq = ids_restore.shape[1]
        # NOTE: keeps the reference's "+1" leftover-mask-token semantics — any
        # restore index >= n_vis selects the (shared) mask token parameter.
        is_mask = (ids_restore >= n_vis).astype(jnp.float32)[..., None]  # (B, SEQ, 1)
        idx = jnp.minimum(ids_restore, n_vis - 1)
        idx = jnp.broadcast_to(idx[..., None], (B, seq, z_latents.shape[-1]))
        z_full = jnp.take_along_axis(z_latents, idx, axis=1)
    else:
        seq = n_vis
        is_mask = jnp.zeros((B, seq, 1), jnp.float32)
        z_full = z_latents

    y = pallas_decoder(p, z_full, is_mask)           # (B, SEQ, PATCH*PATCH*3)

    # rearrange 'b (h w) (p1 p2 c) -> b c (h p1) (w p2)'
    y = y.reshape(B, GRID, GRID, PATCH, PATCH, 3)
    y = y.transpose(0, 5, 1, 3, 2, 4).reshape(B, 3, IMG, IMG)

    # conv_out: Conv2d(3, 3, 3, padding=1) as a lane-dense 9-tap kernel
    return pallas_conv3x3(y, p["conv_w"], p["conv_b"])          # NCHW


def detok_forward(enc_p, dec_p, x_nchw, key, training=False, noise_level=-1.0):
    """DeTok.forward: returns (decoded NCHW image, (posterior mean, logvar))."""
    k_mask, k_sample, k_t, k_noise = jax.random.split(key, 4)
    moments, ids_restore = encoder_forward(enc_p, x_nchw, k_mask)
    mean = moments[..., :TOKEN_CH]
    logvar = jnp.clip(moments[..., TOKEN_CH:], -30.0, 20.0)

    if training:
        # DiagonalGaussian sample + latent-denoising gamma noise (plain-JAX glue)
        z_lat = mean + jnp.exp(0.5 * logvar) * jax.random.normal(k_sample, mean.shape)
        B = mean.shape[0]
        if noise_level > 0.0:
            t = jnp.full((B, 1, 1), noise_level, jnp.float32)
        else:
            t = jax.random.uniform(k_t, (B, 1, 1))
        noise = jax.random.normal(k_noise, z_lat.shape) * GAMMA
        z_lat = (1.0 - t) * z_lat + t * noise        # use_additive_noise=False
    else:
        z_lat = mean                                 # posteriors.mean (eval mode)

    decoded = decoder_forward(dec_p, z_lat, ids_restore)
    return decoded, (mean, logvar)


# ----------------------------- main -------------------------------------------
if __name__ == "__main__":
    key = jax.random.PRNGKey(0)
    k_x, k_enc, k_dec, k_fwd = jax.random.split(key, 4)

    x = jax.random.normal(k_x, (2, 3, IMG, IMG), jnp.float32)   # NCHW, like torch
    enc_params = init_encoder_params(k_enc)
    dec_params = init_decoder_params(k_dec)

    decoded, (post_mean, post_logvar) = detok_forward(enc_params, dec_params, x, k_fwd,
                                                      training=False)
    jax.block_until_ready(decoded)
    assert decoded.shape == (2, 3, IMG, IMG)
    assert post_mean.shape[-1] == TOKEN_CH
    assert post_logvar.shape == post_mean.shape
    print("KERNEL_OK")
</pallas_src>

<mosaic_0001>
module attributes {stable_mosaic.version = 11 : i64} {
  func.func @_encoder_stack_kernel(%arg0: i32, %arg1: memref<1x9x768xf32, #tpu.memory_space<vmem>>, %arg2: memref<1x9x64xf32, #tpu.memory_space<vmem>>, %arg3: memref<1x9x64xf32, #tpu.memory_space<vmem>>, %arg4: memref<1x9x64xf32, #tpu.memory_space<vmem>>, %arg5: memref<1x9x64xf32, #tpu.memory_space<vmem>>, %arg6: memref<768x64xbf16, #tpu.memory_space<vmem>>, %arg7: memref<1x64xf32, #tpu.memory_space<vmem>>, %arg8: memref<1x64xf32, #tpu.memory_space<vmem>>, %arg9: memref<2x1x64xf32, #tpu.memory_space<vmem>>, %arg10: memref<2x64x192xbf16, #tpu.memory_space<vmem>>, %arg11: memref<2x1x192xf32, #tpu.memory_space<vmem>>, %arg12: memref<2x64x64xbf16, #tpu.memory_space<vmem>>, %arg13: memref<2x1x64xf32, #tpu.memory_space<vmem>>, %arg14: memref<2x1x64xf32, #tpu.memory_space<vmem>>, %arg15: memref<2x64x512xbf16, #tpu.memory_space<vmem>>, %arg16: memref<2x1x512xf32, #tpu.memory_space<vmem>>, %arg17: memref<2x256x64xbf16, #tpu.memory_space<vmem>>, %arg18: memref<2x1x64xf32, #tpu.memory_space<vmem>>, %arg19: memref<1x64xf32, #tpu.memory_space<vmem>>, %arg20: memref<64x32xbf16, #tpu.memory_space<vmem>>, %arg21: memref<1x32xf32, #tpu.memory_space<vmem>>, %arg22: memref<1x9x32xf32, #tpu.memory_space<vmem>>) attributes {dimension_semantics = [#tpu.dimension_semantics<parallel>], iteration_bounds = array<i64: 2>, scalar_prefetch = 0 : i64, scratch_operands = 0 : i64, tpu.core_type = #tpu.core_type<tc>, window_params = [{transform_indices = @transform_0, window_bounds = array<i64: 1, 9, 768>}, {transform_indices = @transform_1, window_bounds = array<i64: 1, 9, 64>}, {transform_indices = @transform_2, window_bounds = array<i64: 1, 9, 64>}, {transform_indices = @transform_3, window_bounds = array<i64: 1, 9, 64>}, {transform_indices = @transform_4, window_bounds = array<i64: 1, 9, 64>}, {pipeline_mode = #tpu.pipeline_mode<synchronous>, transform_indices = @transform_5, window_bounds = array<i64: 768, 64>}, {pipeline_mode = #tpu.pipeline_mode<synchronous>, transform_indices = @transform_6, window_bounds = array<i64: 1, 64>}, {pipeline_mode = #tpu.pipeline_mode<synchronous>, transform_indices = @transform_7, window_bounds = array<i64: 1, 64>}, {pipeline_mode = #tpu.pipeline_mode<synchronous>, transform_indices = @transform_8, window_bounds = array<i64: 2, 1, 64>}, {pipeline_mode = #tpu.pipeline_mode<synchronous>, transform_indices = @transform_9, window_bounds = array<i64: 2, 64, 192>}, {pipeline_mode = #tpu.pipeline_mode<synchronous>, transform_indices = @transform_10, window_bounds = array<i64: 2, 1, 192>}, {pipeline_mode = #tpu.pipeline_mode<synchronous>, transform_indices = @transform_11, window_bounds = array<i64: 2, 64, 64>}, {pipeline_mode = #tpu.pipeline_mode<synchronous>, transform_indices = @transform_12, window_bounds = array<i64: 2, 1, 64>}, {pipeline_mode = #tpu.pipeline_mode<synchronous>, transform_indices = @transform_13, window_bounds = array<i64: 2, 1, 64>}, {pipeline_mode = #tpu.pipeline_mode<synchronous>, transform_indices = @transform_14, window_bounds = array<i64: 2, 64, 512>}, {pipeline_mode = #tpu.pipeline_mode<synchronous>, transform_indices = @transform_15, window_bounds = array<i64: 2, 1, 512>}, {pipeline_mode = #tpu.pipeline_mode<synchronous>, transform_indices = @transform_16, window_bounds = array<i64: 2, 256, 64>}, {pipeline_mode = #tpu.pipeline_mode<synchronous>, transform_indices = @transform_17, window_bounds = array<i64: 2, 1, 64>}, {pipeline_mode = #tpu.pipeline_mode<synchronous>, transform_indices = @transform_18, window_bounds = array<i64: 1, 64>}, {pipeline_mode = #tpu.pipeline_mode<synchronous>, transform_indices = @transform_19, window_bounds = array<i64: 64, 32>}, {pipeline_mode = #tpu.pipeline_mode<synchronous>, transform_indices = @transform_20, window_bounds = array<i64: 1, 32>}, {transform_indices = @transform_21, window_bounds = array<i64: 1, 9, 32>}]} {
    %c0 = arith.constant 0 : index
    %c0_0 = arith.constant 0 : index
    %c0_1 = arith.constant 0 : index
    %0 = vector.load %arg1[%c0, %c0_0, %c0_1] : memref<1x9x768xf32, #tpu.memory_space<vmem>>, vector<1x9x768xf32>
    %1 = vector.shape_cast %0 : vector<1x9x768xf32> to vector<9x768xf32>
    %2 = arith.truncf %1 : vector<9x768xf32> to vector<9x768xbf16>
    %c0_2 = arith.constant 0 : index
    %c0_3 = arith.constant 0 : index
    %3 = vector.load %arg6[%c0_2, %c0_3] : memref<768x64xbf16, #tpu.memory_space<vmem>>, vector<768x64xbf16>
    %cst = arith.constant dense<0.000000e+00> : vector<9x64xf32>
    %4 = tpu.matmul %2, %3, %cst {dimension_numbers = #tpu.dot_dimension_numbers<[1], [0], [0], [1], [0, 0, 1, 1], [], []>} : vector<9x768xbf16>, vector<768x64xbf16>, vector<9x64xf32> -> vector<9x64xf32>
    %c0_4 = arith.constant 0 : index
    %c0_5 = arith.constant 0 : index
    %5 = vector.load %arg7[%c0_4, %c0_5] : memref<1x64xf32, #tpu.memory_space<vmem>>, vector<1x64xf32>
    %6 = vector.broadcast %5 : vector<1x64xf32> to vector<9x64xf32>
    %7 = arith.addf %4, %6 : vector<9x64xf32>
    %c0_6 = arith.constant 0 : index
    %c0_7 = arith.constant 0 : index
    %c0_8 = arith.constant 0 : index
    %8 = vector.load %arg2[%c0_6, %c0_7, %c0_8] : memref<1x9x64xf32, #tpu.memory_space<vmem>>, vector<1x9x64xf32>
    %9 = vector.shape_cast %8 : vector<1x9x64xf32> to vector<9x64xf32>
    %10 = arith.addf %7, %9 : vector<9x64xf32>
    %11 = arith.mulf %10, %10 : vector<9x64xf32>
    %cst_9 = arith.constant dense<0.000000e+00> : vector<9xf32>
    %12 = vector.multi_reduction <add>, %11, %cst_9 [1] : vector<9x64xf32> to vector<9xf32>
    %13 = vector.shape_cast %12 : vector<9xf32> to vector<9x1xf32>
    %cst_10 = arith.constant 6.400000e+01 : f32
    %14 = vector.broadcast %cst_10 : f32 to vector<9x1xf32>
    %15 = arith.divf %13, %14 : vector<9x1xf32>
    %cst_11 = arith.constant 9.99999997E-7 : f32
    %16 = vector.broadcast %cst_11 : f32 to vector<9x1xf32>
    %17 = arith.addf %15, %16 : vector<9x1xf32>
    %18 = math.rsqrt %17 : vector<9x1xf32>
    %19 = vector.broadcast %18 : vector<9x1xf32> to vector<9x64xf32>
    %20 = arith.mulf %10, %19 : vector<9x64xf32>
    %c0_12 = arith.constant 0 : index
    %c0_13 = arith.constant 0 : index
    %21 = vector.load %arg8[%c0_12, %c0_13] : memref<1x64xf32, #tpu.memory_space<vmem>>, vector<1x64xf32>
    %22 = vector.broadcast %21 : vector<1x64xf32> to vector<9x64xf32>
    %23 = arith.mulf %20, %22 : vector<9x64xf32>
    %c0_14 = arith.constant 0 : index
    %c0_15 = arith.constant 0 : index
    %c0_16 = arith.constant 0 : index
    %24 = vector.load %arg3[%c0_14, %c0_15, %c0_16] : memref<1x9x64xf32, #tpu.memory_space<vmem>>, vector<1x9x64xf32>
    %25 = vector.shape_cast %24 : vector<1x9x64xf32> to vector<9x64xf32>
    %c0_17 = arith.constant 0 : index
    %c0_18 = arith.constant 0 : index
    %c0_19 = arith.constant 0 : index
    %26 = vector.load %arg4[%c0_17, %c0_18, %c0_19] : memref<1x9x64xf32, #tpu.memory_space<vmem>>, vector<1x9x64xf32>
    %27 = vector.shape_cast %26 : vector<1x9x64xf32> to vector<9x64xf32>
    %c0_20 = arith.constant 0 : index
    %c0_21 = arith.constant 0 : index
    %c0_22 = arith.constant 0 : index
    %28 = vector.load %arg5[%c0_20, %c0_21, %c0_22] : memref<1x9x64xf32, #tpu.memory_space<vmem>>, vector<1x9x64xf32>
    %29 = vector.shape_cast %28 : vector<1x9x64xf32> to vector<9x64xf32>
    %c0_23 = arith.constant 0 : index
    %c0_24 = arith.constant 0 : index
    %c0_25 = arith.constant 0 : index
    %30 = vector.load %arg9[%c0_23, %c0_24, %c0_25] : memref<2x1x64xf32, #tpu.memory_space<vmem>>, vector<1x1x64xf32>
    %31 = vector.shape_cast %30 : vector<1x1x64xf32> to vector<1x64xf32>
    %c0_26 = arith.constant 0 : index
    %c0_27 = arith.constant 0 : index
    %c0_28 = arith.constant 0 : index
    %32 = vector.load %arg10[%c0_26, %c0_27, %c0_28] : memref<2x64x192xbf16, #tpu.memory_space<vmem>>, vector<1x64x192xbf16>
    %33 = vector.shape_cast %32 : vector<1x64x192xbf16> to vector<64x192xbf16>
    %c0_29 = arith.constant 0 : index
    %c0_30 = arith.constant 0 : index
    %c0_31 = arith.constant 0 : index
    %34 = vector.load %arg11[%c0_29, %c0_30, %c0_31] : memref<2x1x192xf32, #tpu.memory_space<vmem>>, vector<1x1x192xf32>
    %35 = vector.shape_cast %34 : vector<1x1x192xf32> to vector<1x192xf32>
    %c0_32 = arith.constant 0 : index
    %c0_33 = arith.constant 0 : index
    %c0_34 = arith.constant 0 : index
    %36 = vector.load %arg12[%c0_32, %c0_33, %c0_34] : memref<2x64x64xbf16, #tpu.memory_space<vmem>>, vector<1x64x64xbf16>
    %37 = vector.shape_cast %36 : vector<1x64x64xbf16> to vector<64x64xbf16>
    %c0_35 = arith.constant 0 : index
    %c0_36 = arith.constant 0 : index
    %c0_37 = arith.constant 0 : index
    %38 = vector.load %arg13[%c0_35, %c0_36, %c0_37] : memref<2x1x64xf32, #tpu.memory_space<vmem>>, vector<1x1x64xf32>
    %39 = vector.shape_cast %38 : vector<1x1x64xf32> to vector<1x64xf32>
    %c0_38 = arith.constant 0 : index
    %c0_39 = arith.constant 0 : index
    %c0_40 = arith.constant 0 : index
    %40 = vector.load %arg14[%c0_38, %c0_39, %c0_40] : memref<2x1x64xf32, #tpu.memory_space<vmem>>, vector<1x1x64xf32>
    %41 = vector.shape_cast %40 : vector<1x1x64xf32> to vector<1x64xf32>
    %c0_41 = arith.constant 0 : index
    %c0_42 = arith.constant 0 : index
    %c0_43 = arith.constant 0 : index
    %42 = vector.load %arg15[%c0_41, %c0_42, %c0_43] : memref<2x64x512xbf16, #tpu.memory_space<vmem>>, vector<1x64x512xbf16>
    %43 = vector.shape_cast %42 : vector<1x64x512xbf16> to vector<64x512xbf16>
    %c0_44 = arith.constant 0 : index
    %c0_45 = arith.constant 0 : index
    %c0_46 = arith.constant 0 : index
    %44 = vector.load %arg16[%c0_44, %c0_45, %c0_46] : memref<2x1x512xf32, #tpu.memory_space<vmem>>, vector<1x1x512xf32>
    %45 = vector.shape_cast %44 : vector<1x1x512xf32> to vector<1x512xf32>
    %c0_47 = arith.constant 0 : index
    %c0_48 = arith.constant 0 : index
    %c0_49 = arith.constant 0 : index
    %46 = vector.load %arg17[%c0_47, %c0_48, %c0_49] : memref<2x256x64xbf16, #tpu.memory_space<vmem>>, vector<1x256x64xbf16>
    %47 = vector.shape_cast %46 : vector<1x256x64xbf16> to vector<256x64xbf16>
    %c0_50 = arith.constant 0 : index
    %c0_51 = arith.constant 0 : index
    %c0_52 = arith.constant 0 : index
    %48 = vector.load %arg18[%c0_50, %c0_51, %c0_52] : memref<2x1x64xf32, #tpu.memory_space<vmem>>, vector<1x1x64xf32>
    %49 = vector.shape_cast %48 : vector<1x1x64xf32> to vector<1x64xf32>
    %50 = arith.mulf %23, %23 : vector<9x64xf32>
    %cst_53 = arith.constant dense<0.000000e+00> : vector<9xf32>
    %51 = vector.multi_reduction <add>, %50, %cst_53 [1] : vector<9x64xf32> to vector<9xf32>
    %52 = vector.shape_cast %51 : vector<9xf32> to vector<9x1xf32>
    %cst_54 = arith.constant 6.400000e+01 : f32
    %53 = vector.broadcast %cst_54 : f32 to vector<9x1xf32>
    %54 = arith.divf %52, %53 : vector<9x1xf32>
    %cst_55 = arith.constant 9.99999997E-7 : f32
    %55 = vector.broadcast %cst_55 : f32 to vector<9x1xf32>
    %56 = arith.addf %54, %55 : vector<9x1xf32>
    %57 = math.rsqrt %56 : vector<9x1xf32>
    %58 = vector.broadcast %57 : vector<9x1xf32> to vector<9x64xf32>
    %59 = arith.mulf %23, %58 : vector<9x64xf32>
    %60 = vector.broadcast %31 : vector<1x64xf32> to vector<9x64xf32>
    %61 = arith.mulf %59, %60 : vector<9x64xf32>
    %62 = arith.truncf %61 : vector<9x64xf32> to vector<9x64xbf16>
    %cst_56 = arith.constant dense<0.000000e+00> : vector<9x192xf32>
    %63 = tpu.matmul %62, %33, %cst_56 {dimension_numbers = #tpu.dot_dimension_numbers<[1], [0], [0], [1], [0, 0, 1, 1], [], []>} : vector<9x64xbf16>, vector<64x192xbf16>, vector<9x192xf32> -> vector<9x192xf32>
    %64 = vector.broadcast %35 : vector<1x192xf32> to vector<9x192xf32>
    %65 = arith.addf %63, %64 : vector<9x192xf32>
    %66 = vector.extract_strided_slice %65 {offsets = [0, 0], sizes = [9, 64], strides = [1, 1]} : vector<9x192xf32> to vector<9x64xf32>
    %67 = arith.mulf %66, %25 : vector<9x64xf32>
    %c63_i32 = arith.constant 63 : i32
    %68 = tpu.dynamic_rotate %66 by %c63_i32 dim 1 : vector<9x64xf32>, i32 -> vector<9x64xf32>
    %69 = arith.mulf %68, %27 : vector<9x64xf32>
    %70 = arith.addf %67, %69 : vector<9x64xf32>
    %c1_i32 = arith.constant 1 : i32
    %71 = tpu.dynamic_rotate %66 by %c1_i32 dim 1 : vector<9x64xf32>, i32 -> vector<9x64xf32>
    %72 = arith.mulf %71, %29 : vector<9x64xf32>
    %73 = arith.addf %70, %72 : vector<9x64xf32>
    %74 = vector.extract_strided_slice %65 {offsets = [0, 64], sizes = [9, 64], strides = [1, 1]} : vector<9x192xf32> to vector<9x64xf32>
    %75 = arith.mulf %74, %25 : vector<9x64xf32>
    %c63_i32_57 = arith.constant 63 : i32
    %76 = tpu.dynamic_rotate %74 by %c63_i32_57 dim 1 : vector<9x64xf32>, i32 -> vector<9x64xf32>
    %77 = arith.mulf %76, %27 : vector<9x64xf32>
    %78 = arith.addf %75, %77 : vector<9x64xf32>
    %c1_i32_58 = arith.constant 1 : i32
    %79 = tpu.dynamic_rotate %74 by %c1_i32_58 dim 1 : vector<9x64xf32>, i32 -> vector<9x64xf32>
    %80 = arith.mulf %79, %29 : vector<9x64xf32>
    %81 = arith.addf %78, %80 : vector<9x64xf32>
    %82 = vector.extract_strided_slice %65 {offsets = [0, 128], sizes = [9, 64], strides = [1, 1]} : vector<9x192xf32> to vector<9x64xf32>
    %cst_59 = arith.constant 0.000000e+00 : f32
    %83 = vector.broadcast %cst_59 : f32 to vector<9x64xf32>
    %84 = vector.extract_strided_slice %73 {offsets = [0, 0], sizes = [9, 16], strides = [1, 1]} : vector<9x64xf32> to vector<9x16xf32>
    %85 = arith.truncf %84 : vector<9x16xf32> to vector<9x16xbf16>
    %86 = vector.extract_strided_slice %81 {offsets = [0, 0], sizes = [9, 16], strides = [1, 1]} : vector<9x64xf32> to vector<9x16xf32>
    %87 = arith.truncf %86 : vector<9x16xf32> to vector<9x16xbf16>
    %88 = vector.extract_strided_slice %82 {offsets = [0, 0], sizes = [9, 16], strides = [1, 1]} : vector<9x64xf32> to vector<9x16xf32>
    %89 = arith.truncf %88 : vector<9x16xf32> to vector<9x16xbf16>
    %cst_60 = arith.constant dense<0.000000e+00> : vector<9x9xf32>
    %90 = tpu.matmul %85, %87, %cst_60 {dimension_numbers = #tpu.dot_dimension_numbers<[1], [1], [0], [0], [0, 0, 1, 0], [], []>} : vector<9x16xbf16>, vector<9x16xbf16>, vector<9x9xf32> -> vector<9x9xf32>
    %cst_61 = arith.constant 2.500000e-01 : f32
    %91 = vector.broadcast %cst_61 : f32 to vector<9x9xf32>
    %92 = arith.mulf %90, %91 : vector<9x9xf32>
    %cst_62 = arith.constant dense<0xFF800000> : vector<9xf32>
    %93 = vector.multi_reduction <maximumf>, %92, %cst_62 [1] : vector<9x9xf32> to vector<9xf32>
    %94 = vector.shape_cast %93 : vector<9xf32> to vector<9x1xf32>
    %95 = vector.broadcast %94 : vector<9x1xf32> to vector<9x9xf32>
    %96 = arith.subf %92, %95 : vector<9x9xf32>
    %97 = math.exp %96 : vector<9x9xf32>
    %cst_63 = arith.constant dense<0.000000e+00> : vector<9xf32>
    %98 = vector.multi_reduction <add>, %97, %cst_63 [1] : vector<9x9xf32> to vector<9xf32>
    %99 = vector.shape_cast %98 : vector<9xf32> to vector<9x1xf32>
    %100 = tpu.reciprocal %99 {approx = true} : vector<9x1xf32> -> vector<9x1xf32>
    %101 = vector.broadcast %100 : vector<9x1xf32> to vector<9x9xf32>
    %102 = arith.mulf %97, %101 : vector<9x9xf32>
    %103 = arith.truncf %102 : vector<9x9xf32> to vector<9x9xbf16>
    %cst_64 = arith.constant dense<0.000000e+00> : vector<9x16xf32>
    %104 = tpu.matmul %103, %89, %cst_64 {dimension_numbers = #tpu.dot_dimension_numbers<[1], [0], [0], [1], [0, 0, 1, 1], [], []>} : vector<9x9xbf16>, vector<9x16xbf16>, vector<9x16xf32> -> vector<9x16xf32>
    %105 = arith.truncf %104 : vector<9x16xf32> to vector<9x16xbf16>
    %106 = vector.extract_strided_slice %37 {offsets = [0, 0], sizes = [16, 64], strides = [1, 1]} : vector<64x64xbf16> to vector<16x64xbf16>
    %cst_65 = arith.constant dense<0.000000e+00> : vector<9x64xf32>
    %107 = tpu.matmul %105, %106, %cst_65 {dimension_numbers = #tpu.dot_dimension_numbers<[1], [0], [0], [1], [0, 0, 1, 1], [], []>} : vector<9x16xbf16>, vector<16x64xbf16>, vector<9x64xf32> -> vector<9x64xf32>
    %108 = arith.addf %83, %107 : vector<9x64xf32>
    %109 = vector.extract_strided_slice %73 {offsets = [0, 16], sizes = [9, 16], strides = [1, 1]} : vector<9x64xf32> to vector<9x16xf32>
    %110 = arith.truncf %109 : vector<9x16xf32> to vector<9x16xbf16>
    %111 = vector.extract_strided_slice %81 {offsets = [0, 16], sizes = [9, 16], strides = [1, 1]} : vector<9x64xf32> to vector<9x16xf32>
    %112 = arith.truncf %111 : vector<9x16xf32> to vector<9x16xbf16>
    %113 = vector.extract_strided_slice %82 {offsets = [0, 16], sizes = [9, 16], strides = [1, 1]} : vector<9x64xf32> to vector<9x16xf32>
    %114 = arith.truncf %113 : vector<9x16xf32> to vector<9x16xbf16>
    %cst_66 = arith.constant dense<0.000000e+00> : vector<9x9xf32>
    %115 = tpu.matmul %110, %112, %cst_66 {dimension_numbers = #tpu.dot_dimension_numbers<[1], [1], [0], [0], [0, 0, 1, 0], [], []>} : vector<9x16xbf16>, vector<9x16xbf16>, vector<9x9xf32> -> vector<9x9xf32>
    %cst_67 = arith.constant 2.500000e-01 : f32
    %116 = vector.broadcast %cst_67 : f32 to vector<9x9xf32>
    %117 = arith.mulf %115, %116 : vector<9x9xf32>
    %cst_68 = arith.constant dense<0xFF800000> : vector<9xf32>
    %118 = vector.multi_reduction <maximumf>, %117, %cst_68 [1] : vector<9x9xf32> to vector<9xf32>
    %119 = vector.shape_cast %118 : vector<9xf32> to vector<9x1xf32>
    %120 = vector.broadcast %119 : vector<9x1xf32> to vector<9x9xf32>
    %121 = arith.subf %117, %120 : vector<9x9xf32>
    %122 = math.exp %121 : vector<9x9xf32>
    %cst_69 = arith.constant dense<0.000000e+00> : vector<9xf32>
    %123 = vector.multi_reduction <add>, %122, %cst_69 [1] : vector<9x9xf32> to vector<9xf32>
    %124 = vector.shape_cast %123 : vector<9xf32> to vector<9x1xf32>
    %125 = tpu.reciprocal %124 {approx = true} : vector<9x1xf32> -> vector<9x1xf32>
    %126 = vector.broadcast %125 : vector<9x1xf32> to vector<9x9xf32>
    %127 = arith.mulf %122, %126 : vector<9x9xf32>
    %128 = arith.truncf %127 : vector<9x9xf32> to vector<9x9xbf16>
    %cst_70 = arith.constant dense<0.000000e+00> : vector<9x16xf32>
    %129 = tpu.matmul %128, %114, %cst_70 {dimension_numbers = #tpu.dot_dimension_numbers<[1], [0], [0], [1], [0, 0, 1, 1], [], []>} : vector<9x9xbf16>, vector<9x16xbf16>, vector<9x16xf32> -> vector<9x16xf32>
    %130 = arith.truncf %129 : vector<9x16xf32> to vector<9x16xbf16>
    %131 = vector.extract_strided_slice %37 {offsets = [16, 0], sizes = [16, 64], strides = [1, 1]} : vector<64x64xbf16> to vector<16x64xbf16>
    %cst_71 = arith.constant dense<0.000000e+00> : vector<9x64xf32>
    %132 = tpu.matmul %130, %131, %cst_71 {dimension_numbers = #tpu.dot_dimension_numbers<[1], [0], [0], [1], [0, 0, 1, 1], [], []>} : vector<9x16xbf16>, vector<16x64xbf16>, vector<9x64xf32> -> vector<9x64xf32>
    %133 = arith.addf %108, %132 : vector<9x64xf32>
    %134 = vector.extract_strided_slice %73 {offsets = [0, 32], sizes = [9, 16], strides = [1, 1]} : vector<9x64xf32> to vector<9x16xf32>
    %135 = arith.truncf %134 : vector<9x16xf32> to vector<9x16xbf16>
    %136 = vector.extract_strided_slice %81 {offsets = [0, 32], sizes = [9, 16], strides = [1, 1]} : vector<9x64xf32> to vector<9x16xf32>
    %137 = arith.truncf %136 : vector<9x16xf32> to vector<9x16xbf16>
    %138 = vector.extract_strided_slice %82 {offsets = [0, 32], sizes = [9, 16], strides = [1, 1]} : vector<9x64xf32> to vector<9x16xf32>
    %139 = arith.truncf %138 : vector<9x16xf32> to vector<9x16xbf16>
    %cst_72 = arith.constant dense<0.000000e+00> : vector<9x9xf32>
    %140 = tpu.matmul %135, %137, %cst_72 {dimension_numbers = #tpu.dot_dimension_numbers<[1], [1], [0], [0], [0, 0, 1, 0], [], []>} : vector<9x16xbf16>, vector<9x16xbf16>, vector<9x9xf32> -> vector<9x9xf32>
    %cst_73 = arith.constant 2.500000e-01 : f32
    %141 = vector.broadcast %cst_73 : f32 to vector<9x9xf32>
    %142 = arith.mulf %140, %141 : vector<9x9xf32>
    %cst_74 = arith.constant dense<0xFF800000> : vector<9xf32>
    %143 = vector.multi_reduction <maximumf>, %142, %cst_74 [1] : vector<9x9xf32> to vector<9xf32>
    %144 = vector.shape_cast %143 : vector<9xf32> to vector<9x1xf32>
    %145 = vector.broadcast %144 : vector<9x1xf32> to vector<9x9xf32>
    %146 = arith.subf %142, %145 : vector<9x9xf32>
    %147 = math.exp %146 : vector<9x9xf32>
    %cst_75 = arith.constant dense<0.000000e+00> : vector<9xf32>
    %148 = vector.multi_reduction <add>, %147, %cst_75 [1] : vector<9x9xf32> to vector<9xf32>
    %149 = vector.shape_cast %148 : vector<9xf32> to vector<9x1xf32>
    %150 = tpu.reciprocal %149 {approx = true} : vector<9x1xf32> -> vector<9x1xf32>
    %151 = vector.broadcast %150 : vector<9x1xf32> to vector<9x9xf32>
    %152 = arith.mulf %147, %151 : vector<9x9xf32>
    %153 = arith.truncf %152 : vector<9x9xf32> to vector<9x9xbf16>
    %cst_76 = arith.constant dense<0.000000e+00> : vector<9x16xf32>
    %154 = tpu.matmul %153, %139, %cst_76 {dimension_numbers = #tpu.dot_dimension_numbers<[1], [0], [0], [1], [0, 0, 1, 1], [], []>} : vector<9x9xbf16>, vector<9x16xbf16>, vector<9x16xf32> -> vector<9x16xf32>
    %155 = arith.truncf %154 : vector<9x16xf32> to vector<9x16xbf16>
    %156 = vector.extract_strided_slice %37 {offsets = [32, 0], sizes = [16, 64], strides = [1, 1]} : vector<64x64xbf16> to vector<16x64xbf16>
    %cst_77 = arith.constant dense<0.000000e+00> : vector<9x64xf32>
    %157 = tpu.matmul %155, %156, %cst_77 {dimension_numbers = #tpu.dot_dimension_numbers<[1], [0], [0], [1], [0, 0, 1, 1], [], []>} : vector<9x16xbf16>, vector<16x64xbf16>, vector<9x64xf32> -> vector<9x64xf32>
    %158 = arith.addf %133, %157 : vector<9x64xf32>
    %159 = vector.extract_strided_slice %73 {offsets = [0, 48], sizes = [9, 16], strides = [1, 1]} : vector<9x64xf32> to vector<9x16xf32>
    %160 = arith.truncf %159 : vector<9x16xf32> to vector<9x16xbf16>
    %161 = vector.extract_strided_slice %81 {offsets = [0, 48], sizes = [9, 16], strides = [1, 1]} : vector<9x64xf32> to vector<9x16xf32>
    %162 = arith.truncf %161 : vector<9x16xf32> to vector<9x16xbf16>
    %163 = vector.extract_strided_slice %82 {offsets = [0, 48], sizes = [9, 16], strides = [1, 1]} : vector<9x64xf32> to vector<9x16xf32>
    %164 = arith.truncf %163 : vector<9x16xf32> to vector<9x16xbf16>
    %cst_78 = arith.constant dense<0.000000e+00> : vector<9x9xf32>
    %165 = tpu.matmul %160, %162, %cst_78 {dimension_numbers = #tpu.dot_dimension_numbers<[1], [1], [0], [0], [0, 0, 1, 0], [], []>} : vector<9x16xbf16>, vector<9x16xbf16>, vector<9x9xf32> -> vector<9x9xf32>
    %cst_79 = arith.constant 2.500000e-01 : f32
    %166 = vector.broadcast %cst_79 : f32 to vector<9x9xf32>
    %167 = arith.mulf %165, %166 : vector<9x9xf32>
    %cst_80 = arith.constant dense<0xFF800000> : vector<9xf32>
    %168 = vector.multi_reduction <maximumf>, %167, %cst_80 [1] : vector<9x9xf32> to vector<9xf32>
    %169 = vector.shape_cast %168 : vector<9xf32> to vector<9x1xf32>
    %170 = vector.broadcast %169 : vector<9x1xf32> to vector<9x9xf32>
    %171 = arith.subf %167, %170 : vector<9x9xf32>
    %172 = math.exp %171 : vector<9x9xf32>
    %cst_81 = arith.constant dense<0.000000e+00> : vector<9xf32>
    %173 = vector.multi_reduction <add>, %172, %cst_81 [1] : vector<9x9xf32> to vector<9xf32>
    %174 = vector.shape_cast %173 : vector<9xf32> to vector<9x1xf32>
    %175 = tpu.reciprocal %174 {approx = true} : vector<9x1xf32> -> vector<9x1xf32>
    %176 = vector.broadcast %175 : vector<9x1xf32> to vector<9x9xf32>
    %177 = arith.mulf %172, %176 : vector<9x9xf32>
    %178 = arith.truncf %177 : vector<9x9xf32> to vector<9x9xbf16>
    %cst_82 = arith.constant dense<0.000000e+00> : vector<9x16xf32>
    %179 = tpu.matmul %178, %164, %cst_82 {dimension_numbers = #tpu.dot_dimension_numbers<[1], [0], [0], [1], [0, 0, 1, 1], [], []>} : vector<9x9xbf16>, vector<9x16xbf16>, vector<9x16xf32> -> vector<9x16xf32>
    %180 = arith.truncf %179 : vector<9x16xf32> to vector<9x16xbf16>
    %181 = vector.extract_strided_slice %37 {offsets = [48, 0], sizes = [16, 64], strides = [1, 1]} : vector<64x64xbf16> to vector<16x64xbf16>
    %cst_83 = arith.constant dense<0.000000e+00> : vector<9x64xf32>
    %182 = tpu.matmul %180, %181, %cst_83 {dimension_numbers = #tpu.dot_dimension_numbers<[1], [0], [0], [1], [0, 0, 1, 1], [], []>} : vector<9x16xbf16>, vector<16x64xbf16>, vector<9x64xf32> -> vector<9x64xf32>
    %183 = arith.addf %158, %182 : vector<9x64xf32>
    %184 = arith.addf %23, %183 : vector<9x64xf32>
    %185 = vector.broadcast %39 : vector<1x64xf32> to vector<9x64xf32>
    %186 = arith.addf %184, %185 : vector<9x64xf32>
    %187 = arith.mulf %186, %186 : vector<9x64xf32>
    %cst_84 = arith.constant dense<0.000000e+00> : vector<9xf32>
    %188 = vector.multi_reduction <add>, %187, %cst_84 [1] : vector<9x64xf32> to vector<9xf32>
    %189 = vector.shape_cast %188 : vector<9xf32> to vector<9x1xf32>
    %cst_85 = arith.constant 6.400000e+01 : f32
    %190 = vector.broadcast %cst_85 : f32 to vector<9x1xf32>
    %191 = arith.divf %189, %190 : vector<9x1xf32>
    %cst_86 = arith.constant 9.99999997E-7 : f32
    %192 = vector.broadcast %cst_86 : f32 to vector<9x1xf32>
    %193 = arith.addf %191, %192 : vector<9x1xf32>
    %194 = math.rsqrt %193 : vector<9x1xf32>
    %195 = vector.broadcast %194 : vector<9x1xf32> to vector<9x64xf32>
    %196 = arith.mulf %186, %195 : vector<9x64xf32>
    %197 = vector.broadcast %41 : vector<1x64xf32> to vector<9x64xf32>
    %198 = arith.mulf %196, %197 : vector<9x64xf32>
    %199 = arith.truncf %198 : vector<9x64xf32> to vector<9x64xbf16>
    %cst_87 = arith.constant dense<0.000000e+00> : vector<9x512xf32>
    %200 = tpu.matmul %199, %43, %cst_87 {dimension_numbers = #tpu.dot_dimension_numbers<[1], [0], [0], [1], [0, 0, 1, 1], [], []>} : vector<9x64xbf16>, vector<64x512xbf16>, vector<9x512xf32> -> vector<9x512xf32>
    %201 = vector.broadcast %45 : vector<1x512xf32> to vector<9x512xf32>
    %202 = arith.addf %200, %201 : vector<9x512xf32>
    %203 = vector.extract_strided_slice %202 {offsets = [0, 0], sizes = [9, 256], strides = [1, 1]} : vector<9x512xf32> to vector<9x256xf32>
    %204 = vector.extract_strided_slice %202 {offsets = [0, 256], sizes = [9, 256], strides = [1, 1]} : vector<9x512xf32> to vector<9x256xf32>
    %205 = arith.negf %203 : vector<9x256xf32>
    %206 = math.exp %205 : vector<9x256xf32>
    %cst_88 = arith.constant 1.000000e+00 : f32
    %207 = vector.broadcast %cst_88 : f32 to vector<9x256xf32>
    %208 = arith.addf %207, %206 : vector<9x256xf32>
    %209 = arith.divf %207, %208 : vector<9x256xf32>
    %210 = arith.mulf %203, %209 : vector<9x256xf32>
    %211 = arith.mulf %210, %204 : vector<9x256xf32>
    %212 = arith.truncf %211 : vector<9x256xf32> to vector<9x256xbf16>
    %cst_89 = arith.constant dense<0.000000e+00> : vector<9x64xf32>
    %213 = tpu.matmul %212, %47, %cst_89 {dimension_numbers = #tpu.dot_dimension_numbers<[1], [0], [0], [1], [0, 0, 1, 1], [], []>} : vector<9x256xbf16>, vector<256x64xbf16>, vector<9x64xf32> -> vector<9x64xf32>
    %214 = vector.broadcast %49 : vector<1x64xf32> to vector<9x64xf32>
    %215 = arith.addf %213, %214 : vector<9x64xf32>
    %216 = arith.addf %186, %215 : vector<9x64xf32>
    %c1 = arith.constant 1 : index
    %c0_90 = arith.constant 0 : index
    %c0_91 = arith.constant 0 : index
    %217 = vector.load %arg9[%c1, %c0_90, %c0_91] : memref<2x1x64xf32, #tpu.memory_space<vmem>>, vector<1x1x64xf32>
    %218 = vector.shape_cast %217 : vector<1x1x64xf32> to vector<1x64xf32>
    %c1_92 = arith.constant 1 : index
    %c0_93 = arith.constant 0 : index
    %c0_94 = arith.constant 0 : index
    %219 = vector.load %arg10[%c1_92, %c0_93, %c0_94] : memref<2x64x192xbf16, #tpu.memory_space<vmem>>, vector<1x64x192xbf16>
    %220 = vector.shape_cast %219 : vector<1x64x192xbf16> to vector<64x192xbf16>
    %c1_95 = arith.constant 1 : index
    %c0_96 = arith.constant 0 : index
    %c0_97 = arith.constant 0 : index
    %221 = vector.load %arg11[%c1_95, %c0_96, %c0_97] : memref<2x1x192xf32, #tpu.memory_space<vmem>>, vector<1x1x192xf32>
    %222 = vector.shape_cast %221 : vector<1x1x192xf32> to vector<1x192xf32>
    %c1_98 = arith.constant 1 : index
    %c0_99 = arith.constant 0 : index
    %c0_100 = arith.constant 0 : index
    %223 = vector.load %arg12[%c1_98, %c0_99, %c0_100] : memref<2x64x64xbf16, #tpu.memory_space<vmem>>, vector<1x64x64xbf16>
    %224 = vector.shape_cast %223 : vector<1x64x64xbf16> to vector<64x64xbf16>
    %c1_101 = arith.constant 1 : index
    %c0_102 = arith.constant 0 : index
    %c0_103 = arith.constant 0 : index
    %225 = vector.load %arg13[%c1_101, %c0_102, %c0_103] : memref<2x1x64xf32, #tpu.memory_space<vmem>>, vector<1x1x64xf32>
    %226 = vector.shape_cast %225 : vector<1x1x64xf32> to vector<1x64xf32>
    %c1_104 = arith.constant 1 : index
    %c0_105 = arith.constant 0 : index
    %c0_106 = arith.constant 0 : index
    %227 = vector.load %arg14[%c1_104, %c0_105, %c0_106] : memref<2x1x64xf32, #tpu.memory_space<vmem>>, vector<1x1x64xf32>
    %228 = vector.shape_cast %227 : vector<1x1x64xf32> to vector<1x64xf32>
    %c1_107 = arith.constant 1 : index
    %c0_108 = arith.constant 0 : index
    %c0_109 = arith.constant 0 : index
    %229 = vector.load %arg15[%c1_107, %c0_108, %c0_109] : memref<2x64x512xbf16, #tpu.memory_space<vmem>>, vector<1x64x512xbf16>
    %230 = vector.shape_cast %229 : vector<1x64x512xbf16> to vector<64x512xbf16>
    %c1_110 = arith.constant 1 : index
    %c0_111 = arith.constant 0 : index
    %c0_112 = arith.constant 0 : index
    %231 = vector.load %arg16[%c1_110, %c0_111, %c0_112] : memref<2x1x512xf32, #tpu.memory_space<vmem>>, vector<1x1x512xf32>
    %232 = vector.shape_cast %231 : vector<1x1x512xf32> to vector<1x512xf32>
    %c1_113 = arith.constant 1 : index
    %c0_114 = arith.constant 0 : index
    %c0_115 = arith.constant 0 : index
    %233 = vector.load %arg17[%c1_113, %c0_114, %c0_115] : memref<2x256x64xbf16, #tpu.memory_space<vmem>>, vector<1x256x64xbf16>
    %234 = vector.shape_cast %233 : vector<1x256x64xbf16> to vector<256x64xbf16>
    %c1_116 = arith.constant 1 : index
    %c0_117 = arith.constant 0 : index
    %c0_118 = arith.constant 0 : index
    %235 = vector.load %arg18[%c1_116, %c0_117, %c0_118] : memref<2x1x64xf32, #tpu.memory_space<vmem>>, vector<1x1x64xf32>
    %236 = vector.shape_cast %235 : vector<1x1x64xf32> to vector<1x64xf32>
    %237 = arith.mulf %216, %216 : vector<9x64xf32>
    %cst_119 = arith.constant dense<0.000000e+00> : vector<9xf32>
    %238 = vector.multi_reduction <add>, %237, %cst_119 [1] : vector<9x64xf32> to vector<9xf32>
    %239 = vector.shape_cast %238 : vector<9xf32> to vector<9x1xf32>
    %cst_120 = arith.constant 6.400000e+01 : f32
    %240 = vector.broadcast %cst_120 : f32 to vector<9x1xf32>
    %241 = arith.divf %239, %240 : vector<9x1xf32>
    %cst_121 = arith.constant 9.99999997E-7 : f32
    %242 = vector.broadcast %cst_121 : f32 to vector<9x1xf32>
    %243 = arith.addf %241, %242 : vector<9x1xf32>
    %244 = math.rsqrt %243 : vector<9x1xf32>
    %245 = vector.broadcast %244 : vector<9x1xf32> to vector<9x64xf32>
    %246 = arith.mulf %216, %245 : vector<9x64xf32>
    %247 = vector.broadcast %218 : vector<1x64xf32> to vector<9x64xf32>
    %248 = arith.mulf %246, %247 : vector<9x64xf32>
    %249 = arith.truncf %248 : vector<9x64xf32> to vector<9x64xbf16>
    %cst_122 = arith.constant dense<0.000000e+00> : vector<9x192xf32>
    %250 = tpu.matmul %249, %220, %cst_122 {dimension_numbers = #tpu.dot_dimension_numbers<[1], [0], [0], [1], [0, 0, 1, 1], [], []>} : vector<9x64xbf16>, vector<64x192xbf16>, vector<9x192xf32> -> vector<9x192xf32>
    %251 = vector.broadcast %222 : vector<1x192xf32> to vector<9x192xf32>
    %252 = arith.addf %250, %251 : vector<9x192xf32>
    %253 = vector.extract_strided_slice %252 {offsets = [0, 0], sizes = [9, 64], strides = [1, 1]} : vector<9x192xf32> to vector<9x64xf32>
    %254 = arith.mulf %253, %25 : vector<9x64xf32>
    %c63_i32_123 = arith.constant 63 : i32
    %255 = tpu.dynamic_rotate %253 by %c63_i32_123 dim 1 : vector<9x64xf32>, i32 -> vector<9x64xf32>
    %256 = arith.mulf %255, %27 : vector<9x64xf32>
    %257 = arith.addf %254, %256 : vector<9x64xf32>
    %c1_i32_124 = arith.constant 1 : i32
    %258 = tpu.dynamic_rotate %253 by %c1_i32_124 dim 1 : vector<9x64xf32>, i32 -> vector<9x64xf32>
    %259 = arith.mulf %258, %29 : vector<9x64xf32>
    %260 = arith.addf %257, %259 : vector<9x64xf32>
    %261 = vector.extract_strided_slice %252 {offsets = [0, 64], sizes = [9, 64], strides = [1, 1]} : vector<9x192xf32> to vector<9x64xf32>
    %262 = arith.mulf %261, %25 : vector<9x64xf32>
    %c63_i32_125 = arith.constant 63 : i32
    %263 = tpu.dynamic_rotate %261 by %c63_i32_125 dim 1 : vector<9x64xf32>, i32 -> vector<9x64xf32>
    %264 = arith.mulf %263, %27 : vector<9x64xf32>
    %265 = arith.addf %262, %264 : vector<9x64xf32>
    %c1_i32_126 = arith.constant 1 : i32
    %266 = tpu.dynamic_rotate %261 by %c1_i32_126 dim 1 : vector<9x64xf32>, i32 -> vector<9x64xf32>
    %267 = arith.mulf %266, %29 : vector<9x64xf32>
    %268 = arith.addf %265, %267 : vector<9x64xf32>
    %269 = vector.extract_strided_slice %252 {offsets = [0, 128], sizes = [9, 64], strides = [1, 1]} : vector<9x192xf32> to vector<9x64xf32>
    %cst_127 = arith.constant 0.000000e+00 : f32
    %270 = vector.broadcast %cst_127 : f32 to vector<9x64xf32>
    %271 = vector.extract_strided_slice %260 {offsets = [0, 0], sizes = [9, 16], strides = [1, 1]} : vector<9x64xf32> to vector<9x16xf32>
    %272 = arith.truncf %271 : vector<9x16xf32> to vector<9x16xbf16>
    %273 = vector.extract_strided_slice %268 {offsets = [0, 0], sizes = [9, 16], strides = [1, 1]} : vector<9x64xf32> to vector<9x16xf32>
    %274 = arith.truncf %273 : vector<9x16xf32> to vector<9x16xbf16>
    %275 = vector.extract_strided_slice %269 {offsets = [0, 0], sizes = [9, 16], strides = [1, 1]} : vector<9x64xf32> to vector<9x16xf32>
    %276 = arith.truncf %275 : vector<9x16xf32> to vector<9x16xbf16>
    %cst_128 = arith.constant dense<0.000000e+00> : vector<9x9xf32>
    %277 = tpu.matmul %272, %274, %cst_128 {dimension_numbers = #tpu.dot_dimension_numbers<[1], [1], [0], [0], [0, 0, 1, 0], [], []>} : vector<9x16xbf16>, vector<9x16xbf16>, vector<9x9xf32> -> vector<9x9xf32>
    %cst_129 = arith.constant 2.500000e-01 : f32
    %278 = vector.broadcast %cst_129 : f32 to vector<9x9xf32>
    %279 = arith.mulf %277, %278 : vector<9x9xf32>
    %cst_130 = arith.constant dense<0xFF800000> : vector<9xf32>
    %280 = vector.multi_reduction <maximumf>, %279, %cst_130 [1] : vector<9x9xf32> to vector<9xf32>
    %281 = vector.shape_cast %280 : vector<9xf32> to vector<9x1xf32>
    %282 = vector.broadcast %281 : vector<9x1xf32> to vector<9x9xf32>
    %283 = arith.subf %279, %282 : vector<9x9xf32>
    %284 = math.exp %283 : vector<9x9xf32>
    %cst_131 = arith.constant dense<0.000000e+00> : vector<9xf32>
    %285 = vector.multi_reduction <add>, %284, %cst_131 [1] : vector<9x9xf32> to vector<9xf32>
    %286 = vector.shape_cast %285 : vector<9xf32> to vector<9x1xf32>
    %287 = tpu.reciprocal %286 {approx = true} : vector<9x1xf32> -> vector<9x1xf32>
    %288 = vector.broadcast %287 : vector<9x1xf32> to vector<9x9xf32>
    %289 = arith.mulf %284, %288 : vector<9x9xf32>
    %290 = arith.truncf %289 : vector<9x9xf32> to vector<9x9xbf16>
    %cst_132 = arith.constant dense<0.000000e+00> : vector<9x16xf32>
    %291 = tpu.matmul %290, %276, %cst_132 {dimension_numbers = #tpu.dot_dimension_numbers<[1], [0], [0], [1], [0, 0, 1, 1], [], []>} : vector<9x9xbf16>, vector<9x16xbf16>, vector<9x16xf32> -> vector<9x16xf32>
    %292 = arith.truncf %291 : vector<9x16xf32> to vector<9x16xbf16>
    %293 = vector.extract_strided_slice %224 {offsets = [0, 0], sizes = [16, 64], strides = [1, 1]} : vector<64x64xbf16> to vector<16x64xbf16>
    %cst_133 = arith.constant dense<0.000000e+00> : vector<9x64xf32>
    %294 = tpu.matmul %292, %293, %cst_133 {dimension_numbers = #tpu.dot_dimension_numbers<[1], [0], [0], [1], [0, 0, 1, 1], [], []>} : vector<9x16xbf16>, vector<16x64xbf16>, vector<9x64xf32> -> vector<9x64xf32>
    %295 = arith.addf %270, %294 : vector<9x64xf32>
    %296 = vector.extract_strided_slice %260 {offsets = [0, 16], sizes = [9, 16], strides = [1, 1]} : vector<9x64xf32> to vector<9x16xf32>
    %297 = arith.truncf %296 : vector<9x16xf32> to vector<9x16xbf16>
    %298 = vector.extract_strided_slice %268 {offsets = [0, 16], sizes = [9, 16], strides = [1, 1]} : vector<9x64xf32> to vector<9x16xf32>
    %299 = arith.truncf %298 : vector<9x16xf32> to vector<9x16xbf16>
    %300 = vector.extract_strided_slice %269 {offsets = [0, 16], sizes = [9, 16], strides = [1, 1]} : vector<9x64xf32> to vector<9x16xf32>
    %301 = arith.truncf %300 : vector<9x16xf32> to vector<9x16xbf16>
    %cst_134 = arith.constant dense<0.000000e+00> : vector<9x9xf32>
    %302 = tpu.matmul %297, %299, %cst_134 {dimension_numbers = #tpu.dot_dimension_numbers<[1], [1], [0], [0], [0, 0, 1, 0], [], []>} : vector<9x16xbf16>, vector<9x16xbf16>, vector<9x9xf32> -> vector<9x9xf32>
    %cst_135 = arith.constant 2.500000e-01 : f32
    %303 = vector.broadcast %cst_135 : f32 to vector<9x9xf32>
    %304 = arith.mulf %302, %303 : vector<9x9xf32>
    %cst_136 = arith.constant dense<0xFF800000> : vector<9xf32>
    %305 = vector.multi_reduction <maximumf>, %304, %cst_136 [1] : vector<9x9xf32> to vector<9xf32>
    %306 = vector.shape_cast %305 : vector<9xf32> to vector<9x1xf32>
    %307 = vector.broadcast %306 : vector<9x1xf32> to vector<9x9xf32>
    %308 = arith.subf %304, %307 : vector<9x9xf32>
    %309 = math.exp %308 : vector<9x9xf32>
    %cst_137 = arith.constant dense<0.000000e+00> : vector<9xf32>
    %310 = vector.multi_reduction <add>, %309, %cst_137 [1] : vector<9x9xf32> to vector<9xf32>
    %311 = vector.shape_cast %310 : vector<9xf32> to vector<9x1xf32>
    %312 = tpu.reciprocal %311 {approx = true} : vector<9x1xf32> -> vector<9x1xf32>
    %313 = vector.broadcast %312 : vector<9x1xf32> to vector<9x9xf32>
    %314 = arith.mulf %309, %313 : vector<9x9xf32>
    %315 = arith.truncf %314 : vector<9x9xf32> to vector<9x9xbf16>
    %cst_138 = arith.constant dense<0.000000e+00> : vector<9x16xf32>
    %316 = tpu.matmul %315, %301, %cst_138 {dimension_numbers = #tpu.dot_dimension_numbers<[1], [0], [0], [1], [0, 0, 1, 1], [], []>} : vector<9x9xbf16>, vector<9x16xbf16>, vector<9x16xf32> -> vector<9x16xf32>
    %317 = arith.truncf %316 : vector<9x16xf32> to vector<9x16xbf16>
    %318 = vector.extract_strided_slice %224 {offsets = [16, 0], sizes = [16, 64], strides = [1, 1]} : vector<64x64xbf16> to vector<16x64xbf16>
    %cst_139 = arith.constant dense<0.000000e+00> : vector<9x64xf32>
    %319 = tpu.matmul %317, %318, %cst_139 {dimension_numbers = #tpu.dot_dimension_numbers<[1], [0], [0], [1], [0, 0, 1, 1], [], []>} : vector<9x16xbf16>, vector<16x64xbf16>, vector<9x64xf32> -> vector<9x64xf32>
    %320 = arith.addf %295, %319 : vector<9x64xf32>
    %321 = vector.extract_strided_slice %260 {offsets = [0, 32], sizes = [9, 16], strides = [1, 1]} : vector<9x64xf32> to vector<9x16xf32>
    %322 = arith.truncf %321 : vector<9x16xf32> to vector<9x16xbf16>
    %323 = vector.extract_strided_slice %268 {offsets = [0, 32], sizes = [9, 16], strides = [1, 1]} : vector<9x64xf32> to vector<9x16xf32>
    %324 = arith.truncf %323 : vector<9x16xf32> to vector<9x16xbf16>
    %325 = vector.extract_strided_slice %269 {offsets = [0, 32], sizes = [9, 16], strides = [1, 1]} : vector<9x64xf32> to vector<9x16xf32>
    %326 = arith.truncf %325 : vector<9x16xf32> to vector<9x16xbf16>
    %cst_140 = arith.constant dense<0.000000e+00> : vector<9x9xf32>
    %327 = tpu.matmul %322, %324, %cst_140 {dimension_numbers = #tpu.dot_dimension_numbers<[1], [1], [0], [0], [0, 0, 1, 0], [], []>} : vector<9x16xbf16>, vector<9x16xbf16>, vector<9x9xf32> -> vector<9x9xf32>
    %cst_141 = arith.constant 2.500000e-01 : f32
    %328 = vector.broadcast %cst_141 : f32 to vector<9x9xf32>
    %329 = arith.mulf %327, %328 : vector<9x9xf32>
    %cst_142 = arith.constant dense<0xFF800000> : vector<9xf32>
    %330 = vector.multi_reduction <maximumf>, %329, %cst_142 [1] : vector<9x9xf32> to vector<9xf32>
    %331 = vector.shape_cast %330 : vector<9xf32> to vector<9x1xf32>
    %332 = vector.broadcast %331 : vector<9x1xf32> to vector<9x9xf32>
    %333 = arith.subf %329, %332 : vector<9x9xf32>
    %334 = math.exp %333 : vector<9x9xf32>
    %cst_143 = arith.constant dense<0.000000e+00> : vector<9xf32>
    %335 = vector.multi_reduction <add>, %334, %cst_143 [1] : vector<9x9xf32> to vector<9xf32>
    %336 = vector.shape_cast %335 : vector<9xf32> to vector<9x1xf32>
    %337 = tpu.reciprocal %336 {approx = true} : vector<9x1xf32> -> vector<9x1xf32>
    %338 = vector.broadcast %337 : vector<9x1xf32> to vector<9x9xf32>
    %339 = arith.mulf %334, %338 : vector<9x9xf32>
    %340 = arith.truncf %339 : vector<9x9xf32> to vector<9x9xbf16>
    %cst_144 = arith.constant dense<0.000000e+00> : vector<9x16xf32>
    %341 = tpu.matmul %340, %326, %cst_144 {dimension_numbers = #tpu.dot_dimension_numbers<[1], [0], [0], [1], [0, 0, 1, 1], [], []>} : vector<9x9xbf16>, vector<9x16xbf16>, vector<9x16xf32> -> vector<9x16xf32>
    %342 = arith.truncf %341 : vector<9x16xf32> to vector<9x16xbf16>
    %343 = vector.extract_strided_slice %224 {offsets = [32, 0], sizes = [16, 64], strides = [1, 1]} : vector<64x64xbf16> to vector<16x64xbf16>
    %cst_145 = arith.constant dense<0.000000e+00> : vector<9x64xf32>
    %344 = tpu.matmul %342, %343, %cst_145 {dimension_numbers = #tpu.dot_dimension_numbers<[1], [0], [0], [1], [0, 0, 1, 1], [], []>} : vector<9x16xbf16>, vector<16x64xbf16>, vector<9x64xf32> -> vector<9x64xf32>
    %345 = arith.addf %320, %344 : vector<9x64xf32>
    %346 = vector.extract_strided_slice %260 {offsets = [0, 48], sizes = [9, 16], strides = [1, 1]} : vector<9x64xf32> to vector<9x16xf32>
    %347 = arith.truncf %346 : vector<9x16xf32> to vector<9x16xbf16>
    %348 = vector.extract_strided_slice %268 {offsets = [0, 48], sizes = [9, 16], strides = [1, 1]} : vector<9x64xf32> to vector<9x16xf32>
    %349 = arith.truncf %348 : vector<9x16xf32> to vector<9x16xbf16>
    %350 = vector.extract_strided_slice %269 {offsets = [0, 48], sizes = [9, 16], strides = [1, 1]} : vector<9x64xf32> to vector<9x16xf32>
    %351 = arith.truncf %350 : vector<9x16xf32> to vector<9x16xbf16>
    %cst_146 = arith.constant dense<0.000000e+00> : vector<9x9xf32>
    %352 = tpu.matmul %347, %349, %cst_146 {dimension_numbers = #tpu.dot_dimension_numbers<[1], [1], [0], [0], [0, 0, 1, 0], [], []>} : vector<9x16xbf16>, vector<9x16xbf16>, vector<9x9xf32> -> vector<9x9xf32>
    %cst_147 = arith.constant 2.500000e-01 : f32
    %353 = vector.broadcast %cst_147 : f32 to vector<9x9xf32>
    %354 = arith.mulf %352, %353 : vector<9x9xf32>
    %cst_148 = arith.constant dense<0xFF800000> : vector<9xf32>
    %355 = vector.multi_reduction <maximumf>, %354, %cst_148 [1] : vector<9x9xf32> to vector<9xf32>
    %356 = vector.shape_cast %355 : vector<9xf32> to vector<9x1xf32>
    %357 = vector.broadcast %356 : vector<9x1xf32> to vector<9x9xf32>
    %358 = arith.subf %354, %357 : vector<9x9xf32>
    %359 = math.exp %358 : vector<9x9xf32>
    %cst_149 = arith.constant dense<0.000000e+00> : vector<9xf32>
    %360 = vector.multi_reduction <add>, %359, %cst_149 [1] : vector<9x9xf32> to vector<9xf32>
    %361 = vector.shape_cast %360 : vector<9xf32> to vector<9x1xf32>
    %362 = tpu.reciprocal %361 {approx = true} : vector<9x1xf32> -> vector<9x1xf32>
    %363 = vector.broadcast %362 : vector<9x1xf32> to vector<9x9xf32>
    %364 = arith.mulf %359, %363 : vector<9x9xf32>
    %365 = arith.truncf %364 : vector<9x9xf32> to vector<9x9xbf16>
    %cst_150 = arith.constant dense<0.000000e+00> : vector<9x16xf32>
    %366 = tpu.matmul %365, %351, %cst_150 {dimension_numbers = #tpu.dot_dimension_numbers<[1], [0], [0], [1], [0, 0, 1, 1], [], []>} : vector<9x9xbf16>, vector<9x16xbf16>, vector<9x16xf32> -> vector<9x16xf32>
    %367 = arith.truncf %366 : vector<9x16xf32> to vector<9x16xbf16>
    %368 = vector.extract_strided_slice %224 {offsets = [48, 0], sizes = [16, 64], strides = [1, 1]} : vector<64x64xbf16> to vector<16x64xbf16>
    %cst_151 = arith.constant dense<0.000000e+00> : vector<9x64xf32>
    %369 = tpu.matmul %367, %368, %cst_151 {dimension_numbers = #tpu.dot_dimension_numbers<[1], [0], [0], [1], [0, 0, 1, 1], [], []>} : vector<9x16xbf16>, vector<16x64xbf16>, vector<9x64xf32> -> vector<9x64xf32>
    %370 = arith.addf %345, %369 : vector<9x64xf32>
    %371 = arith.addf %216, %370 : vector<9x64xf32>
    %372 = vector.broadcast %226 : vector<1x64xf32> to vector<9x64xf32>
    %373 = arith.addf %371, %372 : vector<9x64xf32>
    %374 = arith.mulf %373, %373 : vector<9x64xf32>
    %cst_152 = arith.constant dense<0.000000e+00> : vector<9xf32>
    %375 = vector.multi_reduction <add>, %374, %cst_152 [1] : vector<9x64xf32> to vector<9xf32>
    %376 = vector.shape_cast %375 : vector<9xf32> to vector<9x1xf32>
    %cst_153 = arith.constant 6.400000e+01 : f32
    %377 = vector.broadcast %cst_153 : f32 to vector<9x1xf32>
    %378 = arith.divf %376, %377 : vector<9x1xf32>
    %cst_154 = arith.constant 9.99999997E-7 : f32
    %379 = vector.broadcast %cst_154 : f32 to vector<9x1xf32>
    %380 = arith.addf %378, %379 : vector<9x1xf32>
    %381 = math.rsqrt %380 : vector<9x1xf32>
    %382 = vector.broadcast %381 : vector<9x1xf32> to vector<9x64xf32>
    %383 = arith.mulf %373, %382 : vector<9x64xf32>
    %384 = vector.broadcast %228 : vector<1x64xf32> to vector<9x64xf32>
    %385 = arith.mulf %383, %384 : vector<9x64xf32>
    %386 = arith.truncf %385 : vector<9x64xf32> to vector<9x64xbf16>
    %cst_155 = arith.constant dense<0.000000e+00> : vector<9x512xf32>
    %387 = tpu.matmul %386, %230, %cst_155 {dimension_numbers = #tpu.dot_dimension_numbers<[1], [0], [0], [1], [0, 0, 1, 1], [], []>} : vector<9x64xbf16>, vector<64x512xbf16>, vector<9x512xf32> -> vector<9x512xf32>
    %388 = vector.broadcast %232 : vector<1x512xf32> to vector<9x512xf32>
    %389 = arith.addf %387, %388 : vector<9x512xf32>
    %390 = vector.extract_strided_slice %389 {offsets = [0, 0], sizes = [9, 256], strides = [1, 1]} : vector<9x512xf32> to vector<9x256xf32>
    %391 = vector.extract_strided_slice %389 {offsets = [0, 256], sizes = [9, 256], strides = [1, 1]} : vector<9x512xf32> to vector<9x256xf32>
    %392 = arith.negf %390 : vector<9x256xf32>
    %393 = math.exp %392 : vector<9x256xf32>
    %cst_156 = arith.constant 1.000000e+00 : f32
    %394 = vector.broadcast %cst_156 : f32 to vector<9x256xf32>
    %395 = arith.addf %394, %393 : vector<9x256xf32>
    %396 = arith.divf %394, %395 : vector<9x256xf32>
    %397 = arith.mulf %390, %396 : vector<9x256xf32>
    %398 = arith.mulf %397, %391 : vector<9x256xf32>
    %399 = arith.truncf %398 : vector<9x256xf32> to vector<9x256xbf16>
    %cst_157 = arith.constant dense<0.000000e+00> : vector<9x64xf32>
    %400 = tpu.matmul %399, %234, %cst_157 {dimension_numbers = #tpu.dot_dimension_numbers<[1], [0], [0], [1], [0, 0, 1, 1], [], []>} : vector<9x256xbf16>, vector<256x64xbf16>, vector<9x64xf32> -> vector<9x64xf32>
    %401 = vector.broadcast %236 : vector<1x64xf32> to vector<9x64xf32>
    %402 = arith.addf %400, %401 : vector<9x64xf32>
    %403 = arith.addf %373, %402 : vector<9x64xf32>
    %404 = arith.mulf %403, %403 : vector<9x64xf32>
    %cst_158 = arith.constant dense<0.000000e+00> : vector<9xf32>
    %405 = vector.multi_reduction <add>, %404, %cst_158 [1] : vector<9x64xf32> to vector<9xf32>
    %406 = vector.shape_cast %405 : vector<9xf32> to vector<9x1xf32>
    %cst_159 = arith.constant 6.400000e+01 : f32
    %407 = vector.broadcast %cst_159 : f32 to vector<9x1xf32>
    %408 = arith.divf %406, %407 : vector<9x1xf32>
    %cst_160 = arith.constant 9.99999997E-7 : f32
    %409 = vector.broadcast %cst_160 : f32 to vector<9x1xf32>
    %410 = arith.addf %408, %409 : vector<9x1xf32>
    %411 = math.rsqrt %410 : vector<9x1xf32>
    %412 = vector.broadcast %411 : vector<9x1xf32> to vector<9x64xf32>
    %413 = arith.mulf %403, %412 : vector<9x64xf32>
    %c0_161 = arith.constant 0 : index
    %c0_162 = arith.constant 0 : index
    %414 = vector.load %arg19[%c0_161, %c0_162] : memref<1x64xf32, #tpu.memory_space<vmem>>, vector<1x64xf32>
    %415 = vector.broadcast %414 : vector<1x64xf32> to vector<9x64xf32>
    %416 = arith.mulf %413, %415 : vector<9x64xf32>
    %417 = arith.truncf %416 : vector<9x64xf32> to vector<9x64xbf16>
    %c0_163 = arith.constant 0 : index
    %c0_164 = arith.constant 0 : index
    %418 = vector.load %arg20[%c0_163, %c0_164] : memref<64x32xbf16, #tpu.memory_space<vmem>>, vector<64x32xbf16>
    %cst_165 = arith.constant dense<0.000000e+00> : vector<9x32xf32>
    %419 = tpu.matmul %417, %418, %cst_165 {dimension_numbers = #tpu.dot_dimension_numbers<[1], [0], [0], [1], [0, 0, 1, 1], [], []>} : vector<9x64xbf16>, vector<64x32xbf16>, vector<9x32xf32> -> vector<9x32xf32>
    %c0_166 = arith.constant 0 : index
    %c0_167 = arith.constant 0 : index
    %420 = vector.load %arg21[%c0_166, %c0_167] : memref<1x32xf32, #tpu.memory_space<vmem>>, vector<1x32xf32>
    %421 = vector.broadcast %420 : vector<1x32xf32> to vector<9x32xf32>
    %422 = arith.addf %419, %421 : vector<9x32xf32>
    %c0_168 = arith.constant 0 : index
    %c0_169 = arith.constant 0 : index
    %c0_170 = arith.constant 0 : index
    %423 = vector.load %arg22[%c0_168, %c0_169, %c0_170] : memref<1x9x32xf32, #tpu.memory_space<vmem>>, vector<1x9x32xf32>
    %424 = vector.shape_cast %423 : vector<1x9x32xf32> to vector<9x32xf32>
    %425 = vector.shape_cast %422 : vector<9x32xf32> to vector<1x9x32xf32>
    tpu.vector_store %arg22[%c0_168, %c0_169, %c0_170], %425 {strides = array<i32>} : memref<1x9x32xf32, #tpu.memory_space<vmem>>, vector<1x9x32xf32>,
    return
  }
  func.func @transform_0(%arg0: i32) -> (i32, i32, i32) {
    %c0_i32 = arith.constant 0 : i32
    %c0_i32_0 = arith.constant 0 : i32
    %c0_i32_1 = arith.constant 0 : i32
    return %arg0, %c0_i32, %c0_i32_0 : i32, i32, i32
  }
  func.func @transform_1(%arg0: i32) -> (i32, i32, i32) {
    %c0_i32 = arith.constant 0 : i32
    %c0_i32_0 = arith.constant 0 : i32
    %c0_i32_1 = arith.constant 0 : i32
    return %arg0, %c0_i32, %c0_i32_0 : i32, i32, i32
  }
  func.func @transform_2(%arg0: i32) -> (i32, i32, i32) {
    %c0_i32 = arith.constant 0 : i32
    %c0_i32_0 = arith.constant 0 : i32
    %c0_i32_1 = arith.constant 0 : i32
    return %arg0, %c0_i32, %c0_i32_0 : i32, i32, i32
  }
  func.func @transform_3(%arg0: i32) -> (i32, i32, i32) {
    %c0_i32 = arith.constant 0 : i32
    %c0_i32_0 = arith.constant 0 : i32
    %c0_i32_1 = arith.constant 0 : i32
    return %arg0, %c0_i32, %c0_i32_0 : i32, i32, i32
  }
  func.func @transform_4(%arg0: i32) -> (i32, i32, i32) {
    %c0_i32 = arith.constant 0 : i32
    %c0_i32_0 = arith.constant 0 : i32
    %c0_i32_1 = arith.constant 0 : i32
    return %arg0, %c0_i32, %c0_i32_0 : i32, i32, i32
  }
  func.func @transform_5(%arg0: i32) -> (i32, i32) {
    %c0_i32 = arith.constant 0 : i32
    %c0_i32_0 = arith.constant 0 : i32
    %c0_i32_1 = arith.constant 0 : i32
    return %c0_i32, %c0_i32_0 : i32, i32
  }
  func.func @transform_6(%arg0: i32) -> (i32, i32) {
    %c0_i32 = arith.constant 0 : i32
    %c0_i32_0 = arith.constant 0 : i32
    %c0_i32_1 = arith.constant 0 : i32
    return %c0_i32, %c0_i32_0 : i32, i32
  }
  func.func @transform_7(%arg0: i32) -> (i32, i32) {
    %c0_i32 = arith.constant 0 : i32
    %c0_i32_0 = arith.constant 0 : i32
    %c0_i32_1 = arith.constant 0 : i32
    return %c0_i32, %c0_i32_0 : i32, i32
  }
  func.func @transform_8(%arg0: i32) -> (i32, i32, i32) {
    %c0_i32 = arith.constant 0 : i32
    %c0_i32_0 = arith.constant 0 : i32
    %c0_i32_1 = arith.constant 0 : i32
    %c0_i32_2 = arith.constant 0 : i32
    return %c0_i32, %c0_i32_0, %c0_i32_1 : i32, i32, i32
  }
  func.func @transform_9(%arg0: i32) -> (i32, i32, i32) {
    %c0_i32 = arith.constant 0 : i32
    %c0_i32_0 = arith.constant 0 : i32
    %c0_i32_1 = arith.constant 0 : i32
    %c0_i32_2 = arith.constant 0 : i32
    return %c0_i32, %c0_i32_0, %c0_i32_1 : i32, i32, i32
  }
  func.func @transform_10(%arg0: i32) -> (i32, i32, i32) {
    %c0_i32 = arith.constant 0 : i32
    %c0_i32_0 = arith.constant 0 : i32
    %c0_i32_1 = arith.constant 0 : i32
    %c0_i32_2 = arith.constant 0 : i32
    return %c0_i32, %c0_i32_0, %c0_i32_1 : i32, i32, i32
  }
  func.func @transform_11(%arg0: i32) -> (i32, i32, i32) {
    %c0_i32 = arith.constant 0 : i32
    %c0_i32_0 = arith.constant 0 : i32
    %c0_i32_1 = arith.constant 0 : i32
    %c0_i32_2 = arith.constant 0 : i32
    return %c0_i32, %c0_i32_0, %c0_i32_1 : i32, i32, i32
  }
  func.func @transform_12(%arg0: i32) -> (i32, i32, i32) {
    %c0_i32 = arith.constant 0 : i32
    %c0_i32_0 = arith.constant 0 : i32
    %c0_i32_1 = arith.constant 0 : i32
    %c0_i32_2 = arith.constant 0 : i32
    return %c0_i32, %c0_i32_0, %c0_i32_1 : i32, i32, i32
  }
  func.func @transform_13(%arg0: i32) -> (i32, i32, i32) {
    %c0_i32 = arith.constant 0 : i32
    %c0_i32_0 = arith.constant 0 : i32
    %c0_i32_1 = arith.constant 0 : i32
    %c0_i32_2 = arith.constant 0 : i32
    return %c0_i32, %c0_i32_0, %c0_i32_1 : i32, i32, i32
  }
  func.func @transform_14(%arg0: i32) -> (i32, i32, i32) {
    %c0_i32 = arith.constant 0 : i32
    %c0_i32_0 = arith.constant 0 : i32
    %c0_i32_1 = arith.constant 0 : i32
    %c0_i32_2 = arith.constant 0 : i32
    return %c0_i32, %c0_i32_0, %c0_i32_1 : i32, i32, i32
  }
  func.func @transform_15(%arg0: i32) -> (i32, i32, i32) {
    %c0_i32 = arith.constant 0 : i32
    %c0_i32_0 = arith.constant 0 : i32
    %c0_i32_1 = arith.constant 0 : i32
    %c0_i32_2 = arith.constant 0 : i32
    return %c0_i32, %c0_i32_0, %c0_i32_1 : i32, i32, i32
  }
  func.func @transform_16(%arg0: i32) -> (i32, i32, i32) {
    %c0_i32 = arith.constant 0 : i32
    %c0_i32_0 = arith.constant 0 : i32
    %c0_i32_1 = arith.constant 0 : i32
    %c0_i32_2 = arith.constant 0 : i32
    return %c0_i32, %c0_i32_0, %c0_i32_1 : i32, i32, i32
  }
  func.func @transform_17(%arg0: i32) -> (i32, i32, i32) {
    %c0_i32 = arith.constant 0 : i32
    %c0_i32_0 = arith.constant 0 : i32
    %c0_i32_1 = arith.constant 0 : i32
    %c0_i32_2 = arith.constant 0 : i32
    return %c0_i32, %c0_i32_0, %c0_i32_1 : i32, i32, i32
  }
  func.func @transform_18(%arg0: i32) -> (i32, i32) {
    %c0_i32 = arith.constant 0 : i32
    %c0_i32_0 = arith.constant 0 : i32
    %c0_i32_1 = arith.constant 0 : i32
    return %c0_i32, %c0_i32_0 : i32, i32
  }
  func.func @transform_19(%arg0: i32) -> (i32, i32) {
    %c0_i32 = arith.constant 0 : i32
    %c0_i32_0 = arith.constant 0 : i32
    %c0_i32_1 = arith.constant 0 : i32
    return %c0_i32, %c0_i32_0 : i32, i32
  }
  func.func @transform_20(%arg0: i32) -> (i32, i32) {
    %c0_i32 = arith.constant 0 : i32
    %c0_i32_0 = arith.constant 0 : i32
    %c0_i32_1 = arith.constant 0 : i32
    return %c0_i32, %c0_i32_0 : i32, i32
  }
  func.func @transform_21(%arg0: i32) -> (i32, i32, i32) {
    %c0_i32 = arith.constant 0 : i32
    %c0_i32_0 = arith.constant 0 : i32
    %c0_i32_1 = arith.constant 0 : i32
    return %arg0, %c0_i32, %c0_i32_0 : i32, i32, i32
  }
}

</mosaic_0001>

<bundles_post_ra>
// kernel: tpu_custom_call.1
= control target key start
LH: loop header
LB: loop body
LE: loop exit
PB: predicated region body
PF: predicated region fallthrough
CT: control target
= control target key end

     0   :  { %s5896_s0 = inlined_call_operand.vmem [shape: f32[2,9,768], index: 0, kind: input, shape index: {}]   ;;  %s5897_s1 = inlined_call_operand.vmem [shape: f32[2,9,64], index: 1, kind: input, shape index: {}]   ;;  %s5898_s2 = inlined_call_operand.vmem [shape: f32[2,9,64], index: 2, kind: input, shape index: {}]   ;;  %s5899_s3 = inlined_call_operand.vmem [shape: f32[2,9,64], index: 3, kind: input, shape index: {}]   ;;  %s5900_s4 = inlined_call_operand.vmem [shape: f32[2,9,64], index: 4, kind: input, shape index: {}]   ;;  %s5901_s5 = inlined_call_operand.vmem [shape: bf16[768,64], index: 5, kind: input, shape index: {}]   ;;  %s5902_s6 = inlined_call_operand.vmem [shape: f32[1,64], index: 6, kind: input, shape index: {}]   ;;  %s5903_s7 = inlined_call_operand.vmem [shape: f32[1,64], index: 7, kind: input, shape index: {}]   ;;  %s5904_s8 = inlined_call_operand.vmem [shape: f32[2,1,64], index: 8, kind: input, shape index: {}]   ;;  %s5905_s9 = inlined_call_operand.vmem [shape: bf16[2,64,192], index: 9, kind: input, shape index: {}]   ;;  %s5906_s10 = inlined_call_operand.vmem [shape: f32[2,1,192], index: 10, kind: input, shape index: {}]   ;;  %s5907_s11 = inlined_call_operand.vmem [shape: bf16[2,64,64], index: 11, kind: input, shape index: {}]   ;;  %s5908_s12 = inlined_call_operand.vmem [shape: f32[2,1,64], index: 12, kind: input, shape index: {}]   ;;  %s5909_s13 = inlined_call_operand.vmem [shape: f32[2,1,64], index: 13, kind: input, shape index: {}]   ;;  %s5910_s14 = inlined_call_operand.vmem [shape: bf16[2,64,512], index: 14, kind: input, shape index: {}]   ;;  %s5911_s15 = inlined_call_operand.vmem [shape: f32[2,1,512], index: 15, kind: input, shape index: {}]   ;;  %s5912_s16 = inlined_call_operand.vmem [shape: bf16[2,256,64], index: 16, kind: input, shape index: {}]   ;;  %s5913_s17 = inlined_call_operand.vmem [shape: f32[2,1,64], index: 17, kind: input, shape index: {}]   ;;  %s5914_s18 = inlined_call_operand.vmem [shape: f32[1,64], index: 18, kind: input, shape index: {}]   ;;  %s5915_s19 = inlined_call_operand.vmem [shape: bf16[64,32], index: 19, kind: input, shape index: {}]   ;;  %s5916_s20 = inlined_call_operand.vmem [shape: f32[1,32], index: 20, kind: input, shape index: {}]   ;;  %s5917_s21 = inlined_call_operand.vmem [shape: f32[2,9,32], index: 21, kind: output, shape index: {}]  }
   0x1   :  { %5937 = sst [smem:[#allocation3_spill]] %s5896_s0 }
   0x2   :  { %5938 = sst [smem:[#allocation4_spill]] %s5897_s1 }
   0x3   :  { %5939 = sst [smem:[#allocation5_spill]] %s5898_s2  ;;  %s4789_s2 = smov 0  }
   0x4   :  { %5940 = sst [smem:[#allocation6_spill]] %s5899_s3 }
   0x5   :  { %5941 = sst [smem:[#allocation7_spill]] %s5900_s4 }
   0x6   :  { %5942 = sst [smem:[#allocation8_spill]] %s5901_s5 }
   0x7 LB: > { %5943 = sst [smem:[#allocation2_spill]] %s4664_s2  ;;  %s3662_s25 = sadd.s32 4294967295, %s4664_s2   ;;  %s4664_s2 = sphi %s4789_s2, %s31_s2  }
   0x8   : > { %p3666_p0 = scmp.ge.s32.totalorder %s4664_s2, 1  ;;  %p627_p1 = scmp.lt.s32.totalorder %s4664_s2, 3 }
   0xa   : > { %p628_p2 = pnand %p3666_p0, %p627_p1 }
   0xb   : > { %s5944_s3 = sld [smem:[#allocation8_spill]] (!%p628_p2)  ;;  %p707_p3 = scmp.lt.s32.totalorder (!%p628_p2), %s3662_s25, 1 }
   0xc   : > { %631 = sbr.rel (%p628_p2) target bundleno = 5763 (0x1683), region = 104  ;;  %s5945_s24 = sld [smem:[#allocation3_spill]] (!%p628_p2) }
   0xd   : > { %s5946_s22 = sld [smem:[#allocation4_spill]] (!%p628_p2)  ;;  %s5935_s28 = smov (!%p628_p2), 1  }
   0xe   : > { %s5933_s30 = smov (!%p628_p2), 63   ;;  %s5928_s29 = smov (!%p628_p2), 48  }
   0xf   : > { %s5920_s0 = smov (!%p628_p2), 16   ;;  %s5921_s5 = smov (!%p628_p2), 80  }
  0x11   : > { %v4367_v0 = vld [vmem:[%s5944_s3 + $0x38] sm:$0xff]  ;;  %v4366_v4 = vld [vmem:[%s5944_s3 + $0x30] sm:$0xff]  ;;  %v4365_v8 = vld [vmem:[%s5944_s3 + $0x28] sm:$0xff]  ;;  %s5970_s25 = smov (!%p707_p3, %s3662_s25), 1  ;;  %vm1234_vm0 = vcmask 523264   ;;  %vm1238_vm1 = vcmask 516096  }
  0x12   : > { %v4375_v1 = vld [vmem:[%s5944_s3 + $0x78] sm:$0xff]  ;;  %1144 = vmatpush.bf16.msra.mxu0 %v4367_v0  ;;  %v4374_v5 = vld [vmem:[%s5944_s3 + $0x70] sm:$0xff]  ;;  %v4373_v9 = vld [vmem:[%s5944_s3 + $0x68] sm:$0xff]  ;;  %s4500_s26 = smul.u32 96, %s5970_s25  ;;  %vm1639_vm15 = vcmask 1043456  }
  0x13   : > { %v4383_v2 = vld [vmem:[%s5944_s3 + $0xb8] sm:$0xff]  ;;  %1158 = vmatpush.bf16.msra.mxu1 %v4375_v1  ;;  %v4382_v6 = vld [vmem:[%s5944_s3 + $0xb0] sm:$0xff]  ;;  %v4381_v10 = vld [vmem:[%s5944_s3 + $0xa8] sm:$0xff] }
  0x14   : > { %v4391_v3 = vld [vmem:[%s5944_s3 + $0xf8] sm:$0xff]  ;;  %1172 = vmatpush.bf16.msra.mxu2 %v4383_v2  ;;  %v4390_v7 = vld [vmem:[%s5944_s3 + $0xf0] sm:$0xff]  ;;  %v4389_v11 = vld [vmem:[%s5944_s3 + $0xe8] sm:$0xff]  ;;  %s4891_s2 = scalar_lea.vmem %s5945_s24, %s4500_s26  ;;  %s5947_s24 = sld [smem:[#allocation6_spill]] }
  0x15   : > { %1186 = vmatpush.bf16.msra.mxu3 %v4391_v3  ;;  %v4364_v12 = vld [vmem:[%s5944_s3 + $0x20] sm:$0xff]  ;;  %v4363_v16 = vld [vmem:[%s5944_s3 + $0x18] sm:$0xff]  ;;  %v4362_v20 = vld [vmem:[%s5944_s3 + $0x10] sm:$0xff]  ;;  %s5948_s26 = sld [smem:[#allocation7_spill]] }
  0x16   : > { %1145 = vmatpush.bf16.msra.mxu0 %v4366_v4  ;;  %v4372_v13 = vld [vmem:[%s5944_s3 + $0x60] sm:$0xff]  ;;  %v4371_v17 = vld [vmem:[%s5944_s3 + $0x58] sm:$0xff]  ;;  %v4370_v21 = vld [vmem:[%s5944_s3 + $0x50] sm:$0xff] }
  0x17   : > { %1159 = vmatpush.bf16.msra.mxu1 %v4374_v5  ;;  %v4380_v14 = vld [vmem:[%s5944_s3 + $0xa0] sm:$0xff]  ;;  %v4379_v18 = vld [vmem:[%s5944_s3 + $0x98] sm:$0xff]  ;;  %v4378_v22 = vld [vmem:[%s5944_s3 + $0x90] sm:$0xff] }
  0x18   : > { %1173 = vmatpush.bf16.msra.mxu2 %v4382_v6  ;;  %v4388_v15 = vld [vmem:[%s5944_s3 + $0xe0] sm:$0xff]  ;;  %v4387_v19 = vld [vmem:[%s5944_s3 + $0xd8] sm:$0xff]  ;;  %v4386_v23 = vld [vmem:[%s5944_s3 + $0xd0] sm:$0xff] }
  0x19   : > { %1187 = vmatpush.bf16.msra.mxu3 %v4390_v7  ;;  %v4361_v24 = vld [vmem:[%s5944_s3 + $0x8] sm:$0xff]  ;;  %v4360_v28 = vld [vmem:[%s5944_s3] sm:$0xff]  ;;  %v744_v31 = vld [vmem:[%s4891_s2 + $0x30] sm:$0x1] }
  0x1a   : > { %1146 = vmatpush.bf16.msra.mxu0 %v4365_v8  ;;  %v4369_v25 = vld [vmem:[%s5944_s3 + $0x48] sm:$0xff]  ;;  %v4368_v29 = vld [vmem:[%s5944_s3 + $0x40] sm:$0xff]  ;;  %v745_v33 = vld [vmem:[%s4891_s2 + $0x38] sm:$0x1] }
  0x1b   : > { %1160 = vmatpush.bf16.msra.mxu1 %v4373_v9  ;;  %v4377_v26 = vld [vmem:[%s5944_s3 + $0x88] sm:$0xff]  ;;  %v738_v30 = vld [vmem:[%s4891_s2] sm:$0xff]  ;;  %v4399_v34 = vld [vmem:[%s5944_s3 + $0x138] sm:$0xff] }
  0x1c   : > { %1174 = vmatpush.bf16.msra.mxu2 %v4381_v10  ;;  %v4385_v27 = vld [vmem:[%s5944_s3 + $0xc8] sm:$0xff]  ;;  %v4407_v35 = vld [vmem:[%s5944_s3 + $0x178] sm:$0xff]  ;;  %v4376_v36 = vld [vmem:[%s5944_s3 + $0x80] sm:$0xff]  ;;  %v750_v40 = vpack.c.bf16 %v744_v31, %v738_v30 }
  0x1d   : > { %1188 = vmatpush.bf16.msra.mxu3 %v4389_v11  ;;  %v739_v32 = vld [vmem:[%s4891_s2 + $0x8] sm:$0xff]  ;;  %v4384_v37 = vld [vmem:[%s5944_s3 + $0xc0] sm:$0xff]  ;;  %v740_v38 = vld [vmem:[%s4891_s2 + $0x10] sm:$0xff] }
  0x1e   : > { %1147 = vmatpush.bf16.msra.mxu0 %v4364_v12  ;;  %v746_v39 = vld [vmem:[%s4891_s2 + $0x40] sm:$0x1]  ;;  %v741_v41 = vld [vmem:[%s4891_s2 + $0x18] sm:$0xff]  ;;  %v747_v42 = vld [vmem:[%s4891_s2 + $0x48] sm:$0x1]  ;;  %v751_v43 = vpack.c.bf16 %v745_v33, %v739_v32 }
  0x1f   : > { %1161 = vmatpush.bf16.msra.mxu1 %v4372_v13  ;;  %v4398_v44 = vld [vmem:[%s5944_s3 + $0x130] sm:$0xff]  ;;  %v752_v46 = vpack.c.bf16 %v746_v39, %v740_v38  ;;  %v753_v47 = vpack.c.bf16 %v747_v42, %v741_v41  ;;  %v4397_v48 = vld [vmem:[%s5944_s3 + $0x128] sm:$0xff]  ;;  %v4396_v50 = vld [vmem:[%s5944_s3 + $0x120] sm:$0xff] }
  0x20   : > { %1175 = vmatpush.bf16.msra.mxu2 %v4380_v14  ;;  %v4406_v45 = vld [vmem:[%s5944_s3 + $0x170] sm:$0xff]  ;;  %v4405_v49 = vld [vmem:[%s5944_s3 + $0x168] sm:$0xff]  ;;  %v4404_v51 = vld [vmem:[%s5944_s3 + $0x160] sm:$0xff] }
  0x21   : > { %1189 = vmatpush.bf16.msra.mxu3 %v4388_v15  ;;  %v4395_v52 = vld [vmem:[%s5944_s3 + $0x118] sm:$0xff]  ;;  %v4394_v54 = vld [vmem:[%s5944_s3 + $0x110] sm:$0xff]  ;;  %v4393_v56 = vld [vmem:[%s5944_s3 + $0x108] sm:$0xff] }
  0x22   : > { %1148 = vmatpush.bf16.msra.mxu0 %v4363_v16  ;;  %v4403_v53 = vld [vmem:[%s5944_s3 + $0x158] sm:$0xff]  ;;  %v4402_v55 = vld [vmem:[%s5944_s3 + $0x150] sm:$0xff]  ;;  %v4401_v57 = vld [vmem:[%s5944_s3 + $0x148] sm:$0xff] }
  0x23   : > { %1162 = vmatpush.bf16.msra.mxu1 %v4371_v17  ;;  %v4392_v58 = vld [vmem:[%s5944_s3 + $0x100] sm:$0xff]  ;;  %v748_v61 = vld [vmem:[%s4891_s2 + $0x50] sm:$0x1]  ;;  %v743_v62 = vld [vmem:[%s4891_s2 + $0x28] sm:$0xff] }
  0x24   : > { %1176 = vmatpush.bf16.msra.mxu2 %v4379_v18  ;;  %v4400_v59 = vld [vmem:[%s5944_s3 + $0x140] sm:$0xff]  ;;  %v749_v63 = vld [vmem:[%s4891_s2 + $0x58] sm:$0x1] }
  0x25   : > { %1190 = vmatpush.bf16.msra.mxu3 %v4387_v19  ;;  %v742_v60 = vld [vmem:[%s4891_s2 + $0x20] sm:$0xff]  ;;  %v755_v1 = vpack.c.bf16 %v749_v63, %v743_v62  ;;  %s4969_s2 = sshll.u32 %s5970_s25, 4  ;;  %s5949_s25 = sld [smem:[#allocation5_spill]] }
  0x26   : > { %1149 = vmatpush.bf16.msra.mxu0 %v4362_v20  ;;  %v754_v0 = vpack.c.bf16 %v748_v61, %v742_v60  ;;  %v4522_v4 = vld [vmem:[%s5902_s6] ss:$0 sm:$0xff]  ;;  %s716_s23 = scalar_lea.vmem %s5946_s22, %s4969_s2  ;;  %s726_s27 = scalar_lea.vmem %s5947_s24, %s4969_s2 }
  0x27   : > { %1163 = vmatpush.bf16.msra.mxu1 %v4370_v21  ;;  %v1228_v19 = vld [vmem:[%s716_s23] sm:$0xff]  ;;  %v1229_v30 = vld [vmem:[%s716_s23 + $0x8] sm:$0x1]  ;;  %s4667_s23 = smov 64   ;;  %s731_s4 = scalar_lea.vmem %s5948_s26, %s4969_s2 }
  0x28   : > { %1177 = vmatpush.bf16.msra.mxu2 %v4378_v22  ;;  %s5931_s24 = smov 127   ;;  %s5924_s26 = smov 112  }
  0x29   : > { %1191 = vmatpush.bf16.msra.mxu3 %v4386_v23  ;;  %s5926_s22 = smov 96  }
  0x2a   : > { %1150 = vmatpush.bf16.msra.mxu0 %v4361_v24 }
  0x2b   : > { %1164 = vmatpush.bf16.msra.mxu1 %v4369_v25  ;;  %s5088_s1 = scalar_lea.vmem %s5949_s25, %s4969_s2  ;;  %s5962_s25 = smov 16  }
  0x2c   : > { %1178 = vmatpush.bf16.msra.mxu2 %v4377_v26 }
  0x2d   : > { %1192 = vmatpush.bf16.msra.mxu3 %v4385_v27 }
  0x2e   : > { %1151 = vmatpush.bf16.msra.mxu0 %v4360_v28 }
  0x2f   : > { %1165 = vmatpush.bf16.msra.mxu1 %v4368_v29 }
  0x30   : > { %1179 = vmatpush.bf16.msra.mxu2 %v4376_v36 }
  0x31   : > { %1193 = vmatpush.bf16.msra.mxu3 %v4384_v37  ;;  %1152 = vmatmul.bf16.vlgmr.msra.gmra.mxu0 %v750_v40 }
  0x32   : > { %1200 = vmatpush.bf16.msrb.mxu0 %v4399_v34  ;;  %1166 = vmatmul.bf16.vlgmr.msra.gmra.mxu1 %v751_v43 }
  0x33   : > { %1214 = vmatpush.bf16.msrb.mxu1 %v4407_v35  ;;  %1180 = vmatmul.bf16.vlgmr.msra.gmra.mxu2 %v752_v46  ;;  %v4666_v35 = vmov 64.0  }
  0x34   : > { %1194 = vmatmul.bf16.vlgmr.msra.gmra.mxu3 %v753_v47  ;;  %4534 = vrcp.f32 %v4666_v35 }
  0x36   : > { %1201 = vmatpush.bf16.msrb.mxu0 %v4398_v44 }
  0x37   : > { %1215 = vmatpush.bf16.msrb.mxu1 %v4406_v45 }
  0x3a   : > { %1202 = vmatpush.bf16.msrb.mxu0 %v4397_v48  ;;  %v4535_v36 = vpop.eup %4534 }
  0x3b   : > { %1216 = vmatpush.bf16.msrb.mxu1 %v4405_v49  ;;  %v1243_v37 = vmul.f32 64.0, %v4535_v36  ;;  %vm1247_vm2 = vweird.f32 %v4535_v36 }
  0x3d   : > { %v1244_v38 = vsub.f32 1.0, %v1243_v37 }
  0x3e   : > { %1203 = vmatpush.bf16.msrb.mxu0 %v4396_v50 }
  0x3f   : > { %1217 = vmatpush.bf16.msrb.mxu1 %v4404_v51  ;;  %v1245_v39 = vmul.f32 %v4535_v36, %v1244_v38 }
  0x41   : > { %v1246_v40 = vadd.f32 %v4535_v36, %v1245_v39 }
  0x42   : > { %1204 = vmatpush.bf16.msrb.mxu0 %v4395_v52 }
  0x43   : > { %1218 = vmatpush.bf16.msrb.mxu1 %v4403_v53  ;;  %v4977_v41 = vsel %vm1247_vm2, %v4535_v36, %v1246_v40  ;;  %vm1640_vm2 = vcmask 1044480  }
  0x46   : > { %1205 = vmatpush.bf16.msrb.mxu0 %v4394_v54 }
  0x47   : > { %1219 = vmatpush.bf16.msrb.mxu1 %v4402_v55 }
  0x4a   : > { %1206 = vmatpush.bf16.msrb.mxu0 %v4393_v56  ;;  %v4523_v56 = vld [vmem:[%s5903_s7] ss:$0 sm:$0xff] }
  0x4b   : > { %1220 = vmatpush.bf16.msrb.mxu1 %v4401_v57 }
  0x4e   : > { %1207 = vmatpush.bf16.msrb.mxu0 %v4392_v58 }
  0x4f   : > { %1221 = vmatpush.bf16.msrb.mxu1 %v4400_v59 }
  0x51   : > { %1208 = vmatmul.bf16.vlgmr.msrb.gmra.mxu0 %v754_v0 }
  0x52   : > { %1222 = vmatmul.bf16.vlgmr.msrb.gmra.mxu1 %v755_v1 }
  0xae   : > { %v1153_v2 = vpop.f32.mrf.mxu0 }
  0xaf   : > { %v1167_v3 = vpop.f32.mrf.mxu1  ;;  %v1154_v5 = vadd.f32 %v4522_v4, %v1153_v2 }
  0xb1   : > { %v1168_v7 = vadd.f32 %v1167_v3, %v1154_v5 }
  0xb6   : > { %v1181_v6 = vpop.f32.mrf.mxu2  ;;  %v1155_v8 = vpop.f32.mrf.mxu0 }
  0xb7   : > { %v1169_v9 = vpop.f32.mrf.mxu1  ;;  %v1195_v10 = vpop.f32.mrf.mxu3  ;;  %v1182_v11 = vadd.f32 %v1181_v6, %v1168_v7  ;;  %v1156_v12 = vadd.f32 %v4522_v4, %v1155_v8  ;;  %v3896_v7 = vld [vmem:[%s5905_s9 + $0x30] sm:$0xf]  ;;  %v4415_v8 = vld [vmem:[%s5905_s9 + $0x34] sm:$0xf0] }
  0xb9   : > { %v1196_v13 = vadd.f32 %v1195_v10, %v1182_v11  ;;  %v1170_v14 = vadd.f32 %v1169_v9, %v1156_v12  ;;  %v4414_v9 = vld [vmem:[%s5905_s9 + $0x34] sm:$0xf]  ;;  %v3897_v10 = vor.u32 %v4415_v8, %v3896_v7  ;;  %v3898_v11 = vld [vmem:[%s5905_s9 + $0x38] sm:$0xf0] }
  0xba   : > { %v3901_v12 = vor.u32 %v4414_v9, %v3898_v11 }
  0xbb   : > { %1449 = vmatpush.bf16.msrb.mxu2 %v3897_v10 }
  0xbc   : > { %1463 = vmatpush.bf16.msrb.mxu3 %v3901_v12  ;;  %v1283_v12 = vld [vmem:[%s726_s27] sm:$0xff] }
  0xbe   : > { %v1183_v15 = vpop.f32.mrf.mxu2 }
  0xbf   : > { %v1184_v20 = vadd.f32 %v1183_v15, %v1170_v14  ;;  %v1197_v22 = vpop.f32.mrf.mxu3  ;;  %v4413_v14 = vld [vmem:[%s5905_s9 + $0x24] sm:$0xf0]  ;;  %v4412_v15 = vld [vmem:[%s5905_s9 + $0x24] sm:$0xf] }
  0xc1   : > { %v1198_v24 = vadd.f32 %v1197_v22, %v1184_v20  ;;  %v4411_v20 = vld [vmem:[%s5905_s9 + $0x14] sm:$0xf0] }
  0xce   : > { %v1209_v16 = vpop.f32.mrf.mxu0 }
  0xcf   : > { %v1223_v17 = vpop.f32.mrf.mxu1  ;;  %v1210_v18 = vadd.f32 %v1209_v16, %v1196_v13  ;;  %v3888_v13 = vld [vmem:[%s5905_s9 + $0x20] sm:$0xf] }
  0xd0   : > { %v3889_v16 = vor.u32 %v4413_v14, %v3888_v13  ;;  %v1285_v13 = vld [vmem:[%s731_s4] sm:$0xff] }
  0xd1   : > { %v1224_v21 = vadd.f32 %v1223_v17, %v1210_v18  ;;  %v3890_v17 = vld [vmem:[%s5905_s9 + $0x28] sm:$0xf0] }
  0xd2   : > { %v3893_v18 = vor.u32 %v4412_v15, %v3890_v17  ;;  %1450 = vmatpush.bf16.msrb.mxu2 %v3889_v16  ;;  %v1284_v15 = vld [vmem:[%s726_s27 + $0x8] sm:$0x1]  ;;  %s5929_s27 = smov 65  }
  0xd3   : > { %v1230_v23 = vadd.f32 %v1228_v19, %v1224_v21  ;;  %v3880_v19 = vld [vmem:[%s5905_s9 + $0x10] sm:$0xf]  ;;  %v4410_v21 = vld [vmem:[%s5905_s9 + $0x14] sm:$0xf]  ;;  %v1286_v17 = vld [vmem:[%s731_s4 + $0x8] sm:$0x1] }
  0xd4   : > { %1464 = vmatpush.bf16.msrb.mxu3 %v3893_v18  ;;  %v3881_v22 = vor.u32 %v4411_v20, %v3880_v19  ;;  %v5091_v18 = vld [vmem:[%s5088_s1 + $0x8] sm:$0x1]  ;;  %v5094_v19 = vld [vmem:[%s5088_s1] sm:$0xff]  ;;  %s5923_s4 = smov 32  }
  0xd5   : > { %v1232_v25 = vmul.f32 %v1230_v23, %v1230_v23 }
  0xd6   : > { %v1211_v26 = vpop.f32.mrf.mxu0  ;;  %1451 = vmatpush.bf16.msrb.mxu2 %v3881_v22 }
  0xd7   : > { %v1212_v27 = vadd.f32 %v1211_v26, %v1198_v24  ;;  %v1235_v28 = vsel %vm1234_vm0, %v1232_v25, 0.0  ;;  %v1225_v29 = vpop.f32.mrf.mxu1  ;;  %v3872_v25 = vld [vmem:[%s5905_s9] sm:$0xf]  ;;  %v4409_v26 = vld [vmem:[%s5905_s9 + $0x4] sm:$0xf0] }
  0xd8   : > { %1236 = vadd.xlane.f32.xlu0 %v1235_v28 }
  0xd9   : > { %v1226_v31 = vadd.f32 %v1225_v29, %v1212_v27  ;;  %v4408_v27 = vld [vmem:[%s5905_s9 + $0x4] sm:$0xf]  ;;  %v3873_v29 = vor.u32 %v4409_v26, %v3872_v25 }
  0xdb   : > { %v1231_v32 = vadd.f32 %v1229_v30, %v1226_v31  ;;  %v3874_v30 = vld [vmem:[%s5905_s9 + $0x8] sm:$0xf0]  ;;  %1452 = vmatpush.bf16.msrb.mxu2 %v3873_v29 }
  0xdd   : > { %v1233_v33 = vmul.f32 %v1231_v32, %v1231_v32 }
  0xdf   : > { %v1239_v34 = vsel %vm1238_vm1, %v1233_v33, 0.0 }
  0xe0   : > { %1240 = vadd.xlane.f32.xlu0 %v1239_v34 }
 0x14b   : > { %v1237_v42 = vpop.xlane.xlu0 %1236 }
 0x14c   : > { %v1249_v43 = vmul.f32 %v4977_v41, %v1237_v42 }
 0x14e   : > { %v1251_v44 = vadd.f32 1e-06, %v1249_v43 }
 0x150   : > { %4536 = vrsqrt.f32 %v1251_v44  ;;  %vm1259_vm4 = vweird.f32 %v1251_v44 }
 0x153   : > { %v1241_v45 = vpop.xlane.xlu0 %1240 }
 0x154   : > { %v1250_v46 = vmul.f32 %v4977_v41, %v1241_v45 }
 0x156   : > { %v4537_v47 = vpop.eup %4536  ;;  %v1252_v48 = vadd.f32 1e-06, %v1250_v46 }
 0x157   : > { %v1254_v49 = vmul.f32 %v4537_v47, %v1251_v44  ;;  %vm1260_vm3 = vweird.f32 %v4537_v47 }
 0x158   : > { %4538 = vrsqrt.f32 %v1252_v48  ;;  %vm1261_vm5 = vmor %vm1259_vm4, %vm1260_vm3  ;;  %vm1269_vm7 = vweird.f32 %v1252_v48  ;;  %vm1475_vm3 = vcmask 1048064   ;;  %vm1588_vm4 = vcmask 130048  }
 0x159   : > { %v1255_v50 = vmul.f32 %v4537_v47, %v1254_v49 }
 0x15b   : > { %v1256_v51 = vmul.f32 0.5, %v1255_v50 }
 0x15d   : > { %v1257_v52 = vsub.f32 1.5, %v1256_v51 }
 0x15e   : > { %v4539_v53 = vpop.eup %4538 }
 0x15f   : > { %v1258_v54 = vmul.f32 %v4537_v47, %v1257_v52  ;;  %v1264_v55 = vmul.f32 %v4539_v53, %v1252_v48  ;;  %vm1270_vm6 = vweird.f32 %v4539_v53  ;;  %v4524_v52 = vld [vmem:[%s5904_s8] ss:$0 sm:$0xff] }
 0x160   : > { %vm1271_vm8 = vmor %vm1269_vm7, %vm1270_vm6  ;;  %vm1615_vm6 = vcmask 65536  }
 0x161   : > { %v1262_v57 = vsel %vm1261_vm5, %v4537_v47, %v1258_v54  ;;  %v1265_v58 = vmul.f32 %v4539_v53, %v1264_v55  ;;  %vm1611_vm5 = vcmask 72704  }
 0x162   : > { %v1273_v59 = vmul.f32 %v1262_v57, %v1230_v23  ;;  %v3882_v23 = vld [vmem:[%s5905_s9 + $0x18] sm:$0xf0] }
 0x163   : > { %v1266_v60 = vmul.f32 0.5, %v1265_v58  ;;  %v3885_v24 = vor.u32 %v4410_v21, %v3882_v23  ;;  %v1296_v58 = vld [vmem:[%s5906_s10] sm:$0x3] }
 0x164   : > { %v4984_v61 = vmul.f32 %v4523_v56, %v1273_v59  ;;  %v1398_v59 = vperm.slane %v1296_v58, 0 }
 0x165   : > { %v1267_v62 = vsub.f32 1.5, %v1266_v60  ;;  %1465 = vmatpush.bf16.msrb.mxu3 %v3885_v24 }
 0x166   : > { %v1357_v63 = vmul.f32 %v4984_v61, %v4984_v61 }
 0x167   : > { %v1268_v0 = vmul.f32 %v4539_v53, %v1267_v62 }
 0x168   : > { %v1359_v1 = vsel %vm1234_vm0, %v1357_v63, 0.0 }
 0x169   : > { %v1272_v2 = vsel %vm1271_vm8, %v4539_v53, %v1268_v0  ;;  %1360 = vadd.xlane.f32.xlu1 %v1359_v1  ;;  %v1399_v0 = vperm.slane %v1296_v58, 1  ;;  %v4668_v1 = vmov 65535  }
 0x16a   : > { %v1274_v3 = vmul.f32 %v1272_v2, %v1231_v32  ;;  %v3877_v32 = vor.u32 %v4408_v27, %v3874_v30  ;;  %v1641_v2 = vsel %vm1639_vm15, 4294967295, %v4668_v1 }
 0x16b   : > { %v5060_v9 = vsel %vm1640_vm2, %v1641_v2, 0 }
 0x16c   : > { %v4989_v4 = vmul.f32 %v4523_v56, %v1274_v3  ;;  %1466 = vmatpush.bf16.msrb.mxu3 %v3877_v32 }
 0x16e   : > { %v1358_v5 = vmul.f32 %v4989_v4, %v4989_v4 }
 0x170   : > { %v1362_v6 = vsel %vm1238_vm1, %v1358_v5, 0.0 }
 0x171   : > { %1363 = vadd.xlane.f32.xlu1 %v1362_v6 }
 0x1dc   : > { %v1361_v28 = vpop.xlane.xlu1 %1360 }
 0x1dd   : > { %v1365_v31 = vmul.f32 %v1361_v28, %v4977_v41 }
 0x1df   : > { %v1367_v33 = vadd.f32 1e-06, %v1365_v31 }
 0x1e1   : > { %4540 = vrsqrt.f32 %v1367_v33  ;;  %vm1375_vm10 = vweird.f32 %v1367_v33 }
 0x1e4   : > { %v1364_v34 = vpop.xlane.xlu1 %1363 }
 0x1e5   : > { %v1366_v35 = vmul.f32 %v1364_v34, %v4977_v41 }
 0x1e7   : > { %v4541_v36 = vpop.eup %4540  ;;  %v1368_v37 = vadd.f32 1e-06, %v1366_v35 }
 0x1e8   : > { %v1370_v38 = vmul.f32 %v4541_v36, %v1367_v33  ;;  %vm1376_vm9 = vweird.f32 %v4541_v36 }
 0x1e9   : > { %4542 = vrsqrt.f32 %v1368_v37  ;;  %vm1377_vm11 = vmor %vm1375_vm10, %vm1376_vm9  ;;  %vm1385_vm13 = vweird.f32 %v1368_v37 }
 0x1ea   : > { %v1371_v39 = vmul.f32 %v4541_v36, %v1370_v38 }
 0x1ec   : > { %v1372_v40 = vmul.f32 0.5, %v1371_v39 }
 0x1ee   : > { %v1373_v42 = vsub.f32 1.5, %v1372_v40 }
 0x1ef   : > { %v4543_v43 = vpop.eup %4542 }
 0x1f0   : > { %v1380_v44 = vmul.f32 %v4543_v43, %v1368_v37  ;;  %v1374_v45 = vmul.f32 %v4541_v36, %v1373_v42  ;;  %vm1386_vm12 = vweird.f32 %v4543_v43 }
 0x1f1   : > { %vm1387_vm14 = vmor %vm1385_vm13, %vm1386_vm12 }
 0x1f2   : > { %v1381_v46 = vmul.f32 %v4543_v43, %v1380_v44  ;;  %v1378_v48 = vsel %vm1377_vm11, %v4541_v36, %v1374_v45 }
 0x1f3   : > { %v1389_v51 = vmul.f32 %v1378_v48, %v4984_v61 }
 0x1f4   : > { %v1382_v47 = vmul.f32 0.5, %v1381_v46 }
 0x1f5   : > { %v1394_v55 = vmul.f32 %v4524_v52, %v1389_v51 }
 0x1f6   : > { %v1383_v49 = vsub.f32 1.5, %v1382_v47 }
 0x1f8   : > { %v1384_v50 = vmul.f32 %v4543_v43, %v1383_v49 }
 0x1fa   : > { %v1388_v53 = vsel %vm1387_vm14, %v4543_v43, %v1384_v50 }
 0x1fb   : > { %v1390_v54 = vmul.f32 %v1388_v53, %v4989_v4 }
 0x1fd   : > { %v1395_v56 = vmul.f32 %v4524_v52, %v1390_v54 }
 0x1ff   : > { %v1396_v57 = vpack.c.bf16 %v1395_v56, %v1394_v55 }
 0x201   : > { %3902 = vmatmul.msk.bf16.vlgmr.msrb.gmra.mxu2 %vm1234_vm0, %v1396_v57  ;;  %3903 = vmatmul.msk.bf16.vlgmr.msrb.gmra.mxu3 %vm1234_vm0, %v1396_v57 }
 0x284   : > { %v1454_v60 = vpop.f32.mrf.mxu2  ;;  %v1468_v62 = vpop.f32.mrf.mxu3 }
 0x285   : > { %v5054_v63 = vadd.f32 %v1454_v60, %v1398_v59  ;;  %v1469_v6 = vadd.f32 %v1468_v62, %v1399_v0 }
 0x287   : > { %1540 = vrot.lane.b32.xlu2 %v5054_v63, %s4667_s23 }
 0x28c   : > { %v1456_v3 = vpop.f32.mrf.mxu2  ;;  %v1470_v5 = vpop.f32.mrf.mxu3 }
 0x28d   : > { %v5058_v7 = vadd.f32 %v1456_v3, %v1398_v59  ;;  %v1471_v8 = vadd.f32 %v1470_v5, %v1399_v0  ;;  %v1473_v3 = vmul.f32 %v5054_v63, %v5094_v19 }
 0x28f   : > { %v5062_v10 = vpack.c.bf16 %v1471_v8, %v1469_v6  ;;  %1542 = vrot.lane.b32.xlu2 %v5058_v7, %s4667_s23  ;;  %v1474_v6 = vmul.f32 %v5058_v7, %v5091_v18 }
 0x291   : > { %v1644_v11 = vand.u32 %v5060_v9, %v5062_v10 }
 0x293   : > { %1653 = vmatpush.bf16.msra.mxu3 %v1644_v11 }
 0x297   : > { %1490 = vrot.lane.b32.xlu2 %v1283_v12, %s5935_s28 }
 0x29f   : > { %1510 = vrot.lane.b32.xlu2 %v1285_v13, %s5933_s30 }
 0x2e1   : > { %v1541_v14 = vpop.permute.xlu2 %1540 }
 0x2e2   : > { %1546 = vrot.lane.b32.xlu0 %v1541_v14, %s4667_s23 }
 0x2e9   : > { %v1543_v16 = vpop.permute.xlu2 %1542 }
 0x2ea   : > { %1492 = vrot.lane.b32.xlu0 %v1284_v15, %s5935_s28  ;;  %1549 = vrot.lane.b32.xlu1 %v1543_v16, %s4667_s23 }
 0x2f1   : > { %v5106_v24 = vpop.permute.xlu2 %1490 }
 0x2f2   : > { %1476 = vrot.lane.b32.xlu0 %v5054_v63, %s4667_s23  ;;  %1512 = vrot.lane.b32.xlu1 %v1286_v17, %s5933_s30 }
 0x2f9   : > { %v5108_v25 = vpop.permute.xlu2 %1510 }
 0x2fa   : > { %1532 = vrot.lane.b32.xlu0 %v5091_v18, %s4667_s23  ;;  %1530 = vrot.lane.b32.xlu1 %v5094_v19, %s4667_s23 }
 0x354   : > { %v1547_v20 = vpop.permute.xlu0 %1546 }
 0x355   : > { %v1548_v21 = vsel %vm1475_vm3, %v1547_v20, %v1541_v14 }
 0x356   : > { %1552 = vrot.lane.b32.xlu2 %v1548_v21, %s4667_s23 }
 0x35c   : > { %v1550_v22 = vpop.permute.xlu1 %1549  ;;  %v5115_v30 = vpop.permute.xlu0 %1492 }
 0x35d   : > { %v1551_v23 = vsel %vm1475_vm3, %v1550_v22, %v1543_v16 }
 0x35e   : > { %1554 = vrot.lane.b32.xlu2 %v1551_v23, %s4667_s23 }
 0x364   : > { %v5117_v32 = vpop.permute.xlu1 %1512  ;;  %v1477_v36 = vpop.permute.xlu0 %1476 }
 0x365   : > { %v1478_v39 = vsel %vm1475_vm3, %v1477_v36, %v5054_v63 }
 0x366   : > { %1479 = vrot.lane.b32.xlu2 %v5058_v7, %s4667_s23 }
 0x36c   : > { %v5130_v40 = vpop.permute.xlu0 %1532  ;;  %v5132_v42 = vpop.permute.xlu1 %1530 }
 0x36d   : > { %v1537_v45 = vmul.f32 %v5130_v40, %v5058_v7  ;;  %v1536_v46 = vmul.f32 %v5132_v42, %v5054_v63 }
 0x3b0   : > { %v1553_v26 = vpop.permute.xlu2 %1552 }
 0x3b1   : > { %v1556_v27 = vsel %vm1475_vm3, %v1553_v26, %v1541_v14 }
 0x3b2   : > { %v1558_v28 = vmul.f32 %v1556_v27, %v5106_v24  ;;  %v1570_v29 = vmul.f32 %v1556_v27, %v5108_v25 }
 0x3b4   : > { %1574 = vrot.lane.b32.xlu0 %v1570_v29, %s5935_s28  ;;  %1562 = vrot.lane.b32.xlu2 %v1558_v28, %s5933_s30 }
 0x3b8   : > { %v1555_v31 = vpop.permute.xlu2 %1554 }
 0x3b9   : > { %v1557_v33 = vsel %vm1475_vm3, %v1555_v31, %v1543_v16 }
 0x3ba   : > { %v1559_v34 = vmul.f32 %v1557_v33, %v5115_v30  ;;  %v1571_v35 = vmul.f32 %v1557_v33, %v5117_v32 }
 0x3bc   : > { %1564 = vrot.lane.b32.xlu1 %v1559_v34, %s5933_s30  ;;  %1576 = vrot.lane.b32.xlu2 %v1571_v35, %s5935_s28  ;;  %s5955_s28 = smov 63  }
 0x3c0   : > { %v1480_v37 = vpop.permute.xlu2 %1479 }
 0x3c1   : > { %v1481_v38 = vsel %vm1475_vm3, %v1480_v37, %v5058_v7 }
 0x3c2   : > { %1484 = vrot.lane.b32.xlu0 %v1481_v38, %s4667_s23 }
 0x3c4   : > { %1482 = vrot.lane.b32.xlu1 %v1478_v39, %s4667_s23 }
 0x40e   : > { %v1563_v43 = vpop.permute.xlu2 %1562 }
 0x40f   : > { %v1568_v48 = vadd.f32 %v1563_v43, %v1536_v46  ;;  %v4416_v46 = vld [vmem:[%s5907_s11] sm:$0xff] }
 0x416   : > { %v1577_v50 = vpop.permute.xlu2 %1576 }
 0x426   : > { %v1575_v44 = vpop.permute.xlu0 %1574 }
 0x427   : > { %v1580_v51 = vadd.f32 %v1575_v44, %v1568_v48 }
 0x42e   : > { %v1565_v47 = vpop.permute.xlu1 %1564 }
 0x42f   : > { %v1569_v49 = vadd.f32 %v1565_v47, %v1537_v45 }
 0x431   : > { %v1581_v52 = vadd.f32 %v1577_v50, %v1569_v49 }
 0x433   : > { %v5138_v53 = vpack.c.bf16 %v1581_v52, %v1580_v51 }
 0x434   : > { %v1485_v54 = vpop.permute.xlu0 %1484 }
 0x435   : > { %v1487_v55 = vsel %vm1475_vm3, %v1485_v54, %v5058_v7  ;;  %1586 = vrot.lane.b32.xlu2 %v5138_v53, %s4667_s23 }
 0x436   : > { %v1497_v56 = vmul.f32 %v5115_v30, %v1487_v55  ;;  %v1483_v57 = vpop.permute.xlu1 %1482  ;;  %v1517_v62 = vmul.f32 %v5117_v32, %v1487_v55 }
 0x437   : > { %v1486_v58 = vsel %vm1475_vm3, %v1483_v57, %v5054_v63 }
 0x438   : > { %v1496_v59 = vmul.f32 %v5106_v24, %v1486_v58  ;;  %1502 = vrot.lane.b32.xlu0 %v1497_v56, %s5931_s24  ;;  %v1516_v60 = vmul.f32 %v5108_v25, %v1486_v58 }
 0x43a   : > { %1500 = vrot.lane.b32.xlu1 %v1496_v59, %s5931_s24  ;;  %s5954_s24 = smov 1  }
 0x43d   : > { %1520 = vrot.lane.b32.xlu2 %v1516_v60, %s5929_s27 }
 0x442   : > { %1522 = vrot.lane.b32.xlu1 %v1517_v62, %s5929_s27  ;;  %s5956_s27 = smov 127  }
 0x48f   : > { %v1587_v0 = vpop.permute.xlu2 %1586 }
 0x490   : > { %v1593_v1 = vsel %vm1588_vm4, %v1587_v0, 0 }
 0x491   : > { %1602 = vmatpush.bf16.xpose.msra.mxu2 %v1593_v1 }
 0x497   : > { %v1521_v12 = vpop.permute.xlu2 %1520 }
 0x4aa   : > { %v1503_v5 = vpop.permute.xlu0 %1502 }
 0x4ab   : > { %v1507_v11 = vadd.f32 %v1503_v5, %v1474_v6 }
 0x4ac   : > { %v1501_v2 = vpop.permute.xlu1 %1500 }
 0x4ad   : > { %v1506_v8 = vadd.f32 %v1501_v2, %v1473_v3 }
 0x4af   : > { %v1526_v14 = vadd.f32 %v1521_v12, %v1506_v8 }
 0x4b4   : > { %v1523_v13 = vpop.permute.xlu1 %1522 }
 0x4b5   : > { %v1527_v15 = vadd.f32 %v1523_v13, %v1507_v11 }
 0x4b7   : > { %v1582_v16 = vpack.c.bf16 %v1527_v15, %v1526_v14 }
 0x4b9   : > { %3904 = vmatmul.msk.bf16.vlgmr.msra.gmra.mxu2 %vm1588_vm4, %v1582_v16 }
 0x53c   : > { %v1604_v17 = vpop.f32.mrf.mxu2 }
 0x53d   : > { %v1609_v20 = vmul.f32 0.25, %v1604_v17 }
 0x53f   : > { %v1612_v21 = vsel %vm1611_vm5, %v1609_v20, -inf }
 0x540   : > { %1613 = vmax.xlane.f32.xlu0 %v1612_v21 }
 0x544   : > { %v1606_v63 = vpop.f32.mrf.mxu2 }
 0x545   : > { %v1610_v19 = vmul.f32 0.25, %v1606_v63 }
 0x547   : > { %v1616_v7 = vsel %vm1615_vm6, %v1610_v19, -inf }
 0x548   : > { %1617 = vmax.xlane.f32.xlu2 %v1616_v7 }
 0x560   : > { %1664 = vrot.lane.b32.xlu2 %v5138_v53, %s5928_s29  ;;  %s5957_s29 = smov 65  }
 0x568   : > { %1880 = vrot.lane.b32.xlu2 %v5138_v53, %s5920_s0  ;;  %s5961_s0 = smov 32  }
 0x5b3   : > { %v1614_v18 = vpop.xlane.xlu0 %1613 }
 0x5b4   : > { %v1619_v22 = vsub.f32 %v1609_v20, %v1614_v18 }
 0x5b6   : > { %v1621_v23 = vmul.f32 1.442695, %v1619_v22 }
 0x5b8   : > { %4544 = vpow2.f32 %v1621_v23 }
 0x5bb   : > { %v1618_v26 = vpop.xlane.xlu2 %1617 }
 0x5bc   : > { %v1620_v27 = vsub.f32 %v1610_v19, %v1618_v26 }
 0x5be   : > { %v4545_v28 = vpop.eup %4544  ;;  %v1623_v29 = vmul.f32 1.442695, %v1620_v27 }
 0x5bf   : > { %v1625_v31 = vsel %vm1611_vm5, %v4545_v28, 0.0 }
 0x5c0   : > { %4546 = vpow2.f32 %v1623_v29  ;;  %1626 = vadd.xlane.f32.xlu1 %v1625_v31 }
 0x5c3   : > { %v1665_v33 = vpop.permute.xlu2 %1664 }
 0x5c4   : > { %v1670_v34 = vsel %vm1588_vm4, %v1665_v33, 0 }
 0x5c5   : > { %1679 = vmatpush.bf16.xpose.msrb.mxu3 %v1670_v34 }
 0x5c6   : > { %v4547_v35 = vpop.eup %4546 }
 0x5c7   : > { %v1628_v36 = vsel %vm1615_vm6, %v4547_v35, 0.0 }
 0x5c8   : > { %1629 = vadd.xlane.f32.xlu0 %v1628_v36 }
 0x5cb   : > { %v1881_v50 = vpop.permute.xlu2 %1880 }
 0x5d9   : > { %1662 = vrot.lane.b32.xlu1 %v1582_v16, %s5924_s26 }
 0x5dc   : > { %1783 = vrot.lane.b32.xlu0 %v5138_v53, %s5923_s4  ;;  %v1886_v53 = vsel %vm1588_vm4, %v1881_v50, 0  ;;  %s5963_s4 = smov 80  }
 0x5e1   : > { %1878 = vrot.lane.b32.xlu1 %v1582_v16, %s5921_s5 }
 0x5e4   : > { %1781 = vrot.lane.b32.xlu0 %v1582_v16, %s5926_s22 }
 0x633   : > { %v1627_v37 = vpop.xlane.xlu1 %1626 }
 0x634   : > { %4548 = vrcp.f32 %v1627_v37 }
 0x63a   : > { %v4549_v39 = vpop.eup %4548 }
 0x63b   : > { %v1630_v38 = vpop.xlane.xlu0 %1629  ;;  %v1633_v44 = vmul.f32 %v4549_v39, %v4545_v28 }
 0x63c   : > { %4550 = vrcp.f32 %v1630_v38 }
 0x642   : > { %v4551_v43 = vpop.eup %4550 }
 0x643   : > { %v1634_v45 = vmul.f32 %v4551_v43, %v4547_v35 }
 0x645   : > { %v1635_v47 = vpack.c.bf16 %v1634_v45, %v1633_v44 }
 0x647   : > { %3905 = vmatmul.msk.bf16.vlgmr.msra.gmra.mxu3 %vm1611_vm5, %v1635_v47 }
 0x648   : > { %1774 = vmatpush.bf16.msra.mxu3 %v4416_v46 }
 0x64b   : > { %v1663_v51 = vpop.permute.xlu1 %1662 }
 0x64e   : > { %v1784_v48 = vpop.permute.xlu0 %1783 }
 0x64f   : > { %v1789_v49 = vsel %vm1588_vm4, %v1784_v48, 0 }
 0x650   : > { %1798 = vmatpush.bf16.xpose.msra.mxu0 %v1789_v49 }
 0x653   : > { %v1879_v6 = vpop.permute.xlu1 %1878 }
 0x656   : > { %v1782_v52 = vpop.permute.xlu0 %1781 }
 0x657   : > { %3906 = vmatmul.msk.bf16.vlgmr.msrb.gmra.mxu3 %vm1588_vm4, %v1663_v51  ;;  %3918 = vmatmul.msk.bf16.vlgmr.msra.gmra.mxu0 %vm1588_vm4, %v1782_v52 }
 0x658   : > { %1895 = vmatpush.bf16.xpose.msrb.mxu3 %v1886_v53 }
 0x6ca   : > { %v1655_v54 = vpop.f32.mrf.mxu3 }
 0x6d2   : > { %v1657_v55 = vpop.f32.mrf.mxu3 }
 0x6d3   : > { %v1660_v56 = vpack.c.bf16 %v1657_v55, %v1655_v54 }
 0x6d4   : > { %v1800_v57 = vpop.f32.mrf.mxu0 }
 0x6d5   : > { %v1805_v58 = vmul.f32 0.25, %v1800_v57  ;;  %3917 = vmatmul.msk.bf16.vlgmr.msra.gmra.mxu3 %vm1588_vm4, %v1660_v56 }
 0x6d7   : > { %v1807_v59 = vsel %vm1611_vm5, %v1805_v58, -inf }
 0x6d8   : > { %1808 = vmax.xlane.f32.xlu1 %v1807_v59 }
 0x6da   : > { %v1681_v60 = vpop.f32.mrf.mxu3 }
 0x6db   : > { %v1686_v62 = vmul.f32 0.25, %v1681_v60 }
 0x6dc   : > { %v1802_v1 = vpop.f32.mrf.mxu0 }
 0x6dd   : > { %v1688_v0 = vsel %vm1611_vm5, %v1686_v62, -inf  ;;  %v1806_v2 = vmul.f32 0.25, %v1802_v1 }
 0x6de   : > { %1689 = vmax.xlane.f32.xlu2 %v1688_v0 }
 0x6df   : > { %v1810_v8 = vsel %vm1615_vm6, %v1806_v2, -inf }
 0x6e2   : > { %v1683_v3 = vpop.f32.mrf.mxu3 }
 0x6e3   : > { %v1687_v5 = vmul.f32 0.25, %v1683_v3 }
 0x6e5   : > { %3925 = vmatmul.msk.bf16.vlgmr.msrb.gmra.mxu3 %vm1588_vm4, %v1879_v6  ;;  %v1691_v11 = vsel %vm1615_vm6, %v1687_v5, -inf }
 0x6e6   : > { %1811 = vmax.xlane.f32.xlu2 %v1810_v8  ;;  %1692 = vmax.xlane.f32.xlu0 %v1691_v11 }
 0x74b   : > { %v1809_v12 = vpop.xlane.xlu1 %1808 }
 0x74c   : > { %v1813_v15 = vsub.f32 %v1805_v58, %v1809_v12 }
 0x74e   : > { %v1815_v17 = vmul.f32 1.442695, %v1813_v15 }
 0x751   : > { %v1690_v13 = vpop.xlane.xlu2 %1689 }
 0x752   : > { %v1694_v14 = vsub.f32 %v1686_v62, %v1690_v13 }
 0x754   : > { %v1696_v16 = vmul.f32 1.442695, %v1694_v14 }
 0x756   : > { %4552 = vpow2.f32 %v1696_v16 }
 0x757   : > { %4554 = vpow2.f32 %v1815_v17 }
 0x758   : > { %v5188_v20 = vpop.f32.mrf.mxu3 }
 0x759   : > { %v1693_v19 = vpop.xlane.xlu0 %1692  ;;  %v1812_v27 = vpop.xlane.xlu2 %1811 }
 0x75a   : > { %v1695_v22 = vsub.f32 %v1687_v5, %v1693_v19  ;;  %v1814_v31 = vsub.f32 %v1806_v2, %v1812_v27 }
 0x75c   : > { %v4553_v21 = vpop.eup %4552  ;;  %v1698_v26 = vmul.f32 1.442695, %v1695_v22  ;;  %v1817_v34 = vmul.f32 1.442695, %v1814_v31 }
 0x75d   : > { %v1700_v63 = vsel %vm1611_vm5, %v4553_v21, 0.0  ;;  %v5193_v18 = vpop.eup %4554 }
 0x75e   : > { %1701 = vadd.xlane.f32.xlu2 %v1700_v63  ;;  %v1819_v23 = vsel %vm1611_vm5, %v5193_v18, 0.0  ;;  %4556 = vpow2.f32 %v1698_v26 }
 0x75f   : > { %4558 = vpow2.f32 %v1817_v34 }
 0x760   : > { %v5191_v7 = vpop.f32.mrf.mxu3 }
 0x764   : > { %v4557_v35 = vpop.eup %4556 }
 0x765   : > { %v1703_v38 = vsel %vm1615_vm6, %v4557_v35, 0.0  ;;  %v4559_v43 = vpop.eup %4558 }
 0x766   : > { %1820 = vadd.xlane.f32.xlu2 %v1819_v23  ;;  %v1822_v44 = vsel %vm1615_vm6, %v4559_v43, 0.0 }
 0x768   : > { %v1897_v28 = vpop.f32.mrf.mxu3 }
 0x769   : > { %v1902_v29 = vmul.f32 0.25, %v1897_v28 }
 0x76b   : > { %v1904_v33 = vsel %vm1611_vm5, %v1902_v29, -inf }
 0x76c   : > { %1905 = vmax.xlane.f32.xlu0 %v1904_v33 }
 0x770   : > { %v1899_v36 = vpop.f32.mrf.mxu3 }
 0x771   : > { %v1903_v37 = vmul.f32 0.25, %v1899_v36 }
 0x773   : > { %v1907_v39 = vsel %vm1615_vm6, %v1903_v37, -inf }
 0x774   : > { %1704 = vadd.xlane.f32.xlu0 %v1703_v38  ;;  %1908 = vmax.xlane.f32.xlu1 %v1907_v39 }
 0x77c   : > { %1823 = vadd.xlane.f32.xlu0 %v1822_v44 }
 0x77e   : > { %1830 = vrot.lane.b32.xlu2 %v5062_v10, %s5926_s22 }
 0x78d   : > { %1712 = vrot.lane.b32.xlu1 %v5062_v10, %s5924_s26 }
 0x795   : > { %1927 = vrot.lane.b32.xlu1 %v5062_v10, %s5921_s5  ;;  %s5960_s5 = smov 112  }
 0x7d1   : > { %v1702_v51 = vpop.xlane.xlu2 %1701 }
 0x7d9   : > { %v1821_v57 = vpop.xlane.xlu2 %1820 }
 0x7df   : > { %v1906_v45 = vpop.xlane.xlu0 %1905 }
 0x7e0   : > { %v1910_v46 = vsub.f32 %v1902_v29, %v1906_v45 }
 0x7e1   : > { %v1831_v59 = vpop.permute.xlu2 %1830 }
 0x7e2   : > { %v1912_v47 = vmul.f32 1.442695, %v1910_v46  ;;  %v1836_v2 = vand.u32 %v1831_v59, %v5060_v9  ;;  %v3982_v59 = vld [vmem:[%s5910_s14 + $0x60] sm:$0xf] }
 0x7e4   : > { %4560 = vpow2.f32 %v1912_v47 }
 0x7e7   : > { %v1909_v48 = vpop.xlane.xlu1 %1908  ;;  %v1705_v55 = vpop.xlane.xlu0 %1704 }
 0x7e8   : > { %v1911_v49 = vsub.f32 %v1903_v37, %v1909_v48 }
 0x7ea   : > { %v4561_v50 = vpop.eup %4560  ;;  %v1914_v52 = vmul.f32 1.442695, %v1911_v49  ;;  %v4525_v49 = vld [vmem:[%s5908_s12] ss:$0 sm:$0xff] }
 0x7eb   : > { %v1916_v53 = vsel %vm1611_vm5, %v4561_v50, 0.0 }
 0x7ec   : > { %4562 = vpow2.f32 %v1914_v52  ;;  %1917 = vadd.xlane.f32.xlu0 %v1916_v53 }
 0x7ed   : > { %4564 = vrcp.f32 %v1705_v55 }
 0x7ee   : > { %4566 = vrcp.f32 %v1702_v51 }
 0x7ef   : > { %v1824_v5 = vpop.xlane.xlu0 %1823 }
 0x7f0   : > { %4568 = vrcp.f32 %v1824_v5 }
 0x7f1   : > { %4570 = vrcp.f32 %v1821_v57 }
 0x7f2   : > { %v4563_v54 = vpop.eup %4562 }
 0x7f3   : > { %v1919_v56 = vsel %vm1615_vm6, %v4563_v54, 0.0  ;;  %v4565_v10 = vpop.eup %4564 }
 0x7f4   : > { %1920 = vadd.xlane.f32.xlu0 %v1919_v56  ;;  %v4567_v58 = vpop.eup %4566  ;;  %v1709_v60 = vmul.f32 %v4565_v10, %v4557_v35  ;;  %v4419_v35 = vld [vmem:[%s5907_s11 + $0x18] sm:$0xff] }
 0x7f5   : > { %v1708_v1 = vmul.f32 %v4567_v58, %v4553_v21  ;;  %v4417_v21 = vld [vmem:[%s5907_s11 + $0x8] sm:$0xff] }
 0x7f6   : > { %v4569_v11 = vpop.eup %4568  ;;  %1751 = vmatpush.bf16.msrb.mxu2 %v4417_v21  ;;  %v4431_v21 = vld [vmem:[%s5910_s14 + $0x54] sm:$0xf0] }
 0x7f7   : > { %v1710_v3 = vpack.c.bf16 %v1709_v60, %v1708_v1  ;;  %v4571_v12 = vpop.eup %4570  ;;  %v1828_v13 = vmul.f32 %v4569_v11, %v4559_v43  ;;  %v4434_v60 = vld [vmem:[%s5910_s14 + $0x6c] sm:$0xf0]  ;;  %v3990_v1 = vld [vmem:[%s5910_s14 + $0x68] sm:$0xf] }
 0x7f8   : > { %v1827_v14 = vmul.f32 %v4571_v12, %v5193_v18  ;;  %v4418_v18 = vld [vmem:[%s5907_s11 + $0x10] sm:$0xff]  ;;  %v3966_v12 = vld [vmem:[%s5910_s14 + $0x40] sm:$0xf] }
 0x7fa   : > { %v1829_v15 = vpack.c.bf16 %v1828_v13, %v1827_v14  ;;  %1869 = vmatpush.bf16.msra.mxu2 %v4418_v18  ;;  %v4430_v13 = vld [vmem:[%s5910_s14 + $0x4c] sm:$0xf0]  ;;  %v4428_v14 = vld [vmem:[%s5910_s14 + $0x44] sm:$0xf]  ;;  %v3950_v18 = vld [vmem:[%s5910_s14 + $0x20] sm:$0xf] }
 0x7ff   : > { %v1713_v62 = vpop.permute.xlu1 %1712 }
 0x800   : > { %v1718_v0 = vand.u32 %v1713_v62, %v5060_v9  ;;  %v3983_v62 = vor.u32 %v4434_v60, %v3982_v59 }
 0x802   : > { %1727 = vmatpush.bf16.msra.mxu1 %v1718_v0  ;;  %v3984_v0 = vld [vmem:[%s5910_s14 + $0x70] sm:$0xf0] }
 0x805   : > { %3907 = vmatmul.msk.bf16.vlgmr.msra.gmra.mxu1 %vm1611_vm5, %v1710_v3 }
 0x806   : > { %1845 = vmatpush.bf16.msrb.mxu1 %v1836_v2  ;;  %v4435_v2 = vld [vmem:[%s5910_s14 + $0x74] sm:$0xf0] }
 0x807   : > { %v1928_v6 = vpop.permute.xlu1 %1927  ;;  %v3991_v5 = vor.u32 %v4435_v2, %v3990_v1 }
 0x808   : > { %v1933_v8 = vand.u32 %v1928_v6, %v5060_v9  ;;  %v4433_v6 = vld [vmem:[%s5910_s14 + $0x6c] sm:$0xf] }
 0x80a   : > { %1942 = vmatpush.bf16.msrb.mxu0 %v1933_v8  ;;  %1966 = vmatpush.bf16.msra.mxu1 %v4419_v35  ;;  %v3992_v8 = vld [vmem:[%s5910_s14 + $0x78] sm:$0xf0] }
 0x80b   : > { %v3995_v11 = vor.u32 %v4433_v6, %v3992_v8 }
 0x80e   : > { %2146 = vmatpush.bf16.msra.mxu0 %v3991_v5 }
 0x815   : > { %3919 = vmatmul.msk.bf16.vlgmr.msrb.gmra.mxu1 %vm1611_vm5, %v1829_v15  ;;  %v3967_v15 = vor.u32 %v4430_v13, %v3966_v12  ;;  %v4526_v13 = vld [vmem:[%s5909_s13] ss:$0 sm:$0xff] }
 0x816   : > { %2160 = vmatpush.bf16.msrb.mxu1 %v3995_v11 }
 0x85f   : > { %v1918_v16 = vpop.xlane.xlu0 %1917 }
 0x860   : > { %4572 = vrcp.f32 %v1918_v16  ;;  %v3968_v16 = vld [vmem:[%s5910_s14 + $0x50] sm:$0xf0] }
 0x866   : > { %v4573_v63 = vpop.eup %4572 }
 0x867   : > { %v1921_v17 = vpop.xlane.xlu0 %1920  ;;  %v1924_v22 = vmul.f32 %v4573_v63, %v4561_v50  ;;  %v3971_v63 = vor.u32 %v4428_v14, %v3968_v16 }
 0x868   : > { %4574 = vrcp.f32 %v1921_v17  ;;  %v3974_v17 = vld [vmem:[%s5910_s14 + $0x48] sm:$0xf] }
 0x86e   : > { %v4575_v19 = vpop.eup %4574 }
 0x86f   : > { %v1925_v23 = vmul.f32 %v4575_v19, %v4563_v54  ;;  %v3975_v19 = vor.u32 %v4431_v21, %v3974_v17 }
 0x871   : > { %v1926_v26 = vpack.c.bf16 %v1925_v23, %v1924_v22  ;;  %v4429_v22 = vld [vmem:[%s5910_s14 + $0x4c] sm:$0xf]  ;;  %v3976_v23 = vld [vmem:[%s5910_s14 + $0x58] sm:$0xf0]  ;;  %2147 = vmatpush.bf16.msra.mxu0 %v3975_v19 }
 0x872   : > { %v4443_v19 = vld [vmem:[%s5912_s16 + $0x38] sm:$0xff] }
 0x873   : > { %3926 = vmatmul.msk.bf16.vlgmr.msrb.gmra.mxu0 %vm1611_vm5, %v1926_v26  ;;  %v3979_v26 = vor.u32 %v4429_v22, %v3976_v23  ;;  %v4451_v22 = vld [vmem:[%s5912_s16 + $0x78] sm:$0xff]  ;;  %v4442_v23 = vld [vmem:[%s5912_s16 + $0x30] sm:$0xff] }
 0x875   : > { %2161 = vmatpush.bf16.msrb.mxu1 %v3979_v26  ;;  %v4450_v26 = vld [vmem:[%s5912_s16 + $0x70] sm:$0xff] }
 0x882   : > { %v1729_v27 = vpop.f32.mrf.mxu1 }
 0x88a   : > { %v1731_v28 = vpop.f32.mrf.mxu1 }
 0x88b   : > { %v1734_v29 = vpack.c.bf16 %v1731_v28, %v1729_v27  ;;  %v4426_v27 = vld [vmem:[%s5910_s14 + $0x2c] sm:$0xf0]  ;;  %v4424_v28 = vld [vmem:[%s5910_s14 + $0x24] sm:$0xf] }
 0x88d   : > { %3912 = vmatmul.msk.bf16.vlgmr.msrb.gmra.mxu2 %vm1588_vm4, %v1734_v29  ;;  %v3951_v29 = vor.u32 %v4426_v27, %v3950_v18  ;;  %v4441_v18 = vld [vmem:[%s5912_s16 + $0x28] sm:$0xff] }
 0x88e   : > { %2118 = vmatpush.bf16.msrb.mxu2 %v3983_v62  ;;  %v4449_v27 = vld [vmem:[%s5912_s16 + $0x68] sm:$0xff] }
 0x892   : > { %v1847_v31 = vpop.f32.mrf.mxu1  ;;  %2119 = vmatpush.bf16.msrb.mxu2 %v3967_v15 }
 0x896   : > { %2120 = vmatpush.bf16.msrb.mxu2 %v3951_v29  ;;  %v4440_v29 = vld [vmem:[%s5912_s16 + $0x20] sm:$0xff] }
 0x89a   : > { %v1849_v33 = vpop.f32.mrf.mxu1 }
 0x89b   : > { %v1852_v34 = vpack.c.bf16 %v1849_v33, %v1847_v31  ;;  %v3952_v31 = vld [vmem:[%s5910_s14 + $0x30] sm:$0xf0]  ;;  %v3958_v33 = vld [vmem:[%s5910_s14 + $0x28] sm:$0xf] }
 0x89c   : > { %v3955_v35 = vor.u32 %v4424_v28, %v3952_v31  ;;  %v5373_v28 = vld [vmem:[%s5911_s15] sm:$0xf] }
 0x89d   : > { %3924 = vmatmul.msk.bf16.vlgmr.msra.gmra.mxu2 %vm1588_vm4, %v1852_v34  ;;  %v4427_v34 = vld [vmem:[%s5910_s14 + $0x34] sm:$0xf0]  ;;  %v4448_v31 = vld [vmem:[%s5912_s16 + $0x60] sm:$0xff] }
 0x8f0   : > { %v1944_v36 = vpop.f32.mrf.mxu0 }
 0x8f8   : > { %v1946_v37 = vpop.f32.mrf.mxu0 }
 0x8f9   : > { %v1949_v38 = vpack.c.bf16 %v1946_v37, %v1944_v36  ;;  %v3959_v36 = vor.u32 %v4427_v34, %v3958_v33  ;;  %v4425_v37 = vld [vmem:[%s5910_s14 + $0x2c] sm:$0xf]  ;;  %v2023_v33 = vperm.slane %v5373_v28, 0  ;;  %v2024_v34 = vperm.slane %v5373_v28, 1 }
 0x8fb   : > { %3931 = vmatmul.msk.bf16.vlgmr.msra.gmra.mxu1 %vm1588_vm4, %v1949_v38  ;;  %v3960_v38 = vld [vmem:[%s5910_s14 + $0x38] sm:$0xf0]  ;;  %2148 = vmatpush.bf16.msra.mxu0 %v3959_v36 }
 0x910   : > { %v1753_v39 = vpop.f32.mrf.mxu2 }
 0x911   : > { %v1777_v45 = vadd.f32 %v5188_v20, %v1753_v39  ;;  %v3963_v39 = vor.u32 %v4425_v37, %v3960_v38  ;;  %v4439_v37 = vld [vmem:[%s5912_s16 + $0x18] sm:$0xff] }
 0x912   : > { %v4447_v38 = vld [vmem:[%s5912_s16 + $0x58] sm:$0xff] }
 0x913   : > { %2162 = vmatpush.bf16.msrb.mxu1 %v3963_v39 }
 0x918   : > { %v1755_v43 = vpop.f32.mrf.mxu2 }
 0x919   : > { %v1779_v52 = vadd.f32 %v5191_v7, %v1755_v43 }
 0x920   : > { %v1871_v44 = vpop.f32.mrf.mxu2 }
 0x921   : > { %v1876_v46 = vadd.f32 %v1871_v44, %v1777_v45  ;;  %v3934_v44 = vld [vmem:[%s5910_s14] sm:$0xf]  ;;  %v4422_v45 = vld [vmem:[%s5910_s14 + $0xc] sm:$0xf0] }
 0x928   : > { %v1873_v51 = vpop.f32.mrf.mxu2 }
 0x929   : > { %v1877_v54 = vadd.f32 %v1873_v51, %v1779_v52  ;;  %v4423_v51 = vld [vmem:[%s5910_s14 + $0x14] sm:$0xf0] }
 0x978   : > { %v1968_v47 = vpop.f32.mrf.mxu1 }
 0x979   : > { %v1973_v48 = vadd.f32 %v1968_v47, %v1876_v46  ;;  %v4420_v46 = vld [vmem:[%s5910_s14 + $0x4] sm:$0xf] }
 0x97b   : > { %v1975_v50 = vadd.f32 %v1973_v48, %v4984_v61  ;;  %v3935_v48 = vor.u32 %v4422_v45, %v3934_v44 }
 0x97d   : > { %v5234_v53 = vadd.f32 %v4525_v49, %v1975_v50  ;;  %v3942_v50 = vld [vmem:[%s5910_s14 + $0x8] sm:$0xf]  ;;  %2121 = vmatpush.bf16.msrb.mxu2 %v3935_v48 }
 0x97f   : > { %v1982_v55 = vmul.f32 %v5234_v53, %v5234_v53 }
 0x980   : > { %v1970_v56 = vpop.f32.mrf.mxu1 }
 0x981   : > { %v1974_v20 = vadd.f32 %v1970_v56, %v1877_v54  ;;  %v1984_v57 = vsel %vm1234_vm0, %v1982_v55, 0.0  ;;  %v3943_v54 = vor.u32 %v4423_v51, %v3942_v50  ;;  %v4421_v55 = vld [vmem:[%s5910_s14 + $0xc] sm:$0xf]  ;;  %v3944_v56 = vld [vmem:[%s5910_s14 + $0x18] sm:$0xf0]  ;;  %2355 = vmatpush.bf16.msra.mxu2 %v4443_v19 }
 0x982   : > { %1985 = vadd.xlane.f32.xlu0 %v1984_v57  ;;  %v3947_v57 = vor.u32 %v4421_v55, %v3944_v56  ;;  %v4437_v50 = vld [vmem:[%s5912_s16 + $0x8] sm:$0xff] }
 0x983   : > { %v1976_v10 = vadd.f32 %v1974_v20, %v4989_v4  ;;  %v4432_v4 = vld [vmem:[%s5910_s14 + $0x64] sm:$0xf]  ;;  %2149 = vmatpush.bf16.msra.mxu0 %v3943_v54  ;;  %v4445_v51 = vld [vmem:[%s5912_s16 + $0x48] sm:$0xff] }
 0x984   : > { %v3987_v3 = vor.u32 %v4432_v4, %v3984_v0  ;;  %2163 = vmatpush.bf16.msrb.mxu1 %v3947_v57 }
 0x985   : > { %v5240_v58 = vadd.f32 %v4525_v49, %v1976_v10  ;;  %v3936_v49 = vld [vmem:[%s5910_s14 + $0x10] sm:$0xf0]  ;;  %2356 = vmatpush.bf16.msra.mxu2 %v4442_v23 }
 0x986   : > { %2132 = vmatpush.bf16.msra.mxu3 %v3987_v3  ;;  %v3939_v52 = vor.u32 %v4420_v46, %v3936_v49  ;;  %v4438_v46 = vld [vmem:[%s5912_s16 + $0x10] sm:$0xff] }
 0x987   : > { %v1983_v61 = vmul.f32 %v5240_v58, %v5240_v58 }
 0x989   : > { %v1987_v7 = vsel %vm1238_vm1, %v1983_v61, 0.0  ;;  %2357 = vmatpush.bf16.msra.mxu2 %v4441_v18  ;;  %v2025_v18 = vperm.slane %v5373_v28, 2 }
 0x98a   : > { %1988 = vadd.xlane.f32.xlu1 %v1987_v7  ;;  %2133 = vmatpush.bf16.msra.mxu3 %v3971_v63 }
 0x98d   : > { %2358 = vmatpush.bf16.msra.mxu2 %v4440_v29 }
 0x98e   : > { %2134 = vmatpush.bf16.msra.mxu3 %v3955_v35 }
 0x991   : > { %2359 = vmatpush.bf16.msra.mxu2 %v4439_v37 }
 0x992   : > { %2135 = vmatpush.bf16.msra.mxu3 %v3939_v52 }
 0x995   : > { %2360 = vmatpush.bf16.msra.mxu2 %v4438_v46 }
 0x996   : > { %2369 = vmatpush.bf16.msrb.mxu3 %v4451_v22 }
 0x999   : > { %2361 = vmatpush.bf16.msra.mxu2 %v4437_v50 }
 0x99a   : > { %2370 = vmatpush.bf16.msrb.mxu3 %v4450_v26 }
 0x99e   : > { %2371 = vmatpush.bf16.msrb.mxu3 %v4449_v27 }
 0x9a2   : > { %2372 = vmatpush.bf16.msrb.mxu3 %v4448_v31 }
 0x9a6   : > { %2373 = vmatpush.bf16.msrb.mxu3 %v4447_v38 }
 0x9f5   : > { %v1986_v43 = vpop.xlane.xlu0 %1985 }
 0x9f6   : > { %v1990_v47 = vmul.f32 %v1986_v43, %v4977_v41 }
 0x9f8   : > { %v1992_v20 = vadd.f32 1e-06, %v1990_v47  ;;  %v4446_v47 = vld [vmem:[%s5912_s16 + $0x50] sm:$0xff] }
 0x9f9   : > { %2374 = vmatpush.bf16.msrb.mxu3 %v4446_v47 }
 0x9fa   : > { %4576 = vrsqrt.f32 %v1992_v20  ;;  %vm2000_vm8 = vweird.f32 %v1992_v20 }
 0x9fd   : > { %v1989_v10 = vpop.xlane.xlu1 %1988  ;;  %2375 = vmatpush.bf16.msrb.mxu3 %v4445_v51 }
 0x9fe   : > { %v1991_v61 = vmul.f32 %v1989_v10, %v4977_v41 }
 0xa00   : > { %v4577_v7 = vpop.eup %4576  ;;  %v1993_v59 = vadd.f32 1e-06, %v1991_v61  ;;  %v4436_v61 = vld [vmem:[%s5912_s16] sm:$0xff] }
 0xa01   : > { %v1995_v60 = vmul.f32 %v4577_v7, %v1992_v20  ;;  %vm2001_vm7 = vweird.f32 %v4577_v7  ;;  %2362 = vmatpush.bf16.msra.mxu2 %v4436_v61  ;;  %v2026_v61 = vperm.slane %v5373_v28, 3 }
 0xa02   : > { %4578 = vrsqrt.f32 %v1993_v59  ;;  %vm2002_vm9 = vmor %vm2000_vm8, %vm2001_vm7  ;;  %vm2010_vm11 = vweird.f32 %v1993_v59 }
 0xa03   : > { %v1996_v4 = vmul.f32 %v4577_v7, %v1995_v60 }
 0xa05   : > { %v1997_v62 = vmul.f32 0.5, %v1996_v4 }
 0xa07   : > { %v1998_v0 = vsub.f32 1.5, %v1997_v62 }
 0xa08   : > { %v4579_v1 = vpop.eup %4578 }
 0xa09   : > { %v2005_v2 = vmul.f32 %v4579_v1, %v1993_v59  ;;  %v1999_v3 = vmul.f32 %v4577_v7, %v1998_v0  ;;  %vm2011_vm10 = vweird.f32 %v4579_v1 }
 0xa0a   : > { %vm2012_vm12 = vmor %vm2010_vm11, %vm2011_vm10 }
 0xa0b   : > { %v2006_v5 = vmul.f32 %v4579_v1, %v2005_v2  ;;  %v2003_v8 = vsel %vm2002_vm9, %v4577_v7, %v1999_v3  ;;  %v4444_v7 = vld [vmem:[%s5912_s16 + $0x40] sm:$0xff] }
 0xa0c   : > { %v2014_v14 = vmul.f32 %v2003_v8, %v5234_v53  ;;  %2376 = vmatpush.bf16.msrb.mxu3 %v4444_v7 }
 0xa0d   : > { %v2007_v6 = vmul.f32 0.5, %v2006_v5 }
 0xa0e   : > { %v2019_v17 = vmul.f32 %v4526_v13, %v2014_v14 }
 0xa0f   : > { %v2008_v11 = vsub.f32 1.5, %v2007_v6 }
 0xa11   : > { %v2009_v12 = vmul.f32 %v4579_v1, %v2008_v11 }
 0xa13   : > { %v2013_v15 = vsel %vm2012_vm12, %v4579_v1, %v2009_v12 }
 0xa14   : > { %v2015_v16 = vmul.f32 %v2013_v15, %v5240_v58 }
 0xa16   : > { %v2020_v21 = vmul.f32 %v4526_v13, %v2015_v16 }
 0xa18   : > { %v2021_v63 = vpack.c.bf16 %v2020_v21, %v2019_v17 }
 0xa1a   : > { %3996 = vmatmul.msk.bf16.vlgmr.msrb.gmra.mxu2 %vm1234_vm0, %v2021_v63  ;;  %3997 = vmatmul.msk.bf16.vlgmr.msra.gmra.mxu3 %vm1234_vm0, %v2021_v63 }
 0xa1b   : > { %3998 = vmatmul.msk.bf16.vlgmr.msra.gmra.mxu0 %vm1234_vm0, %v2021_v63  ;;  %3999 = vmatmul.msk.bf16.vlgmr.msrb.gmra.mxu1 %vm1234_vm0, %v2021_v63 }
 0xa98   : > { %v2151_v12 = vpop.f32.mrf.mxu0  ;;  %v2165_v17 = vpop.f32.mrf.mxu1 }
 0xa9d   : > { %v2123_v35 = vpop.f32.mrf.mxu2  ;;  %v2137_v36 = vpop.f32.mrf.mxu3 }
 0xa9e   : > { %v5389_v39 = vadd.f32 %v2123_v35, %v2023_v33  ;;  %v5391_v43 = vadd.f32 %v2137_v36, %v2024_v34 }
 0xaa0   : > { %v4000_v44 = vmul.f32 -1.442695, %v5389_v39  ;;  %v4001_v45 = vmul.f32 -1.442695, %v5391_v43  ;;  %v2153_v50 = vpop.f32.mrf.mxu0 }
 0xaa2   : > { %4580 = vpow2.f32 %v4000_v44 }
 0xaa3   : > { %4582 = vpow2.f32 %v4001_v45 }
 0xaa5   : > { %v2125_v48 = vpop.f32.mrf.mxu2  ;;  %v2139_v49 = vpop.f32.mrf.mxu3 }
 0xaa6   : > { %v5407_v52 = vadd.f32 %v2125_v48, %v2023_v33  ;;  %v5409_v54 = vadd.f32 %v2139_v49, %v2024_v34 }
 0xaa8   : > { %v4581_v55 = vpop.eup %4580  ;;  %v4002_v56 = vmul.f32 -1.442695, %v5407_v52  ;;  %v4003_v10 = vmul.f32 -1.442695, %v5409_v54 }
 0xaa9   : > { %v4583_v20 = vpop.eup %4582  ;;  %v2182_v57 = vadd.f32 1.0, %v4581_v55 }
 0xaaa   : > { %v2183_v59 = vadd.f32 1.0, %v4583_v20  ;;  %4584 = vpow2.f32 %v4002_v56 }
 0xaab   : > { %4586 = vrcp.f32 %v2182_v57  ;;  %v2197_v16 = vand.u32 2147483648, %v2182_v57  ;;  %vm2191_vm14 = vweird.f32 %v2182_v57  ;;  %v2195_v21 = vand.u32 2147483647, %v2182_v57 }
 0xaac   : > { %4588 = vrcp.f32 %v2183_v59  ;;  %v2210_v23 = vand.u32 2147483647, %v2183_v59  ;;  %v2212_v29 = vand.u32 2147483648, %v2183_v59  ;;  %vm2206_vm7 = vweird.f32 %v2183_v59 }
 0xaad   : > { %4590 = vpow2.f32 %v4003_v10  ;;  %v2198_v33 = vor.u32 1.1754944e-38, %v2197_v16  ;;  %vm2196_vm8 = vcmp.eq.f32.partialorder %v2195_v21, 8.507059e+37 }
 0xaae   : > { %vm2211_vm11 = vcmp.eq.f32.partialorder %v2210_v23, 8.507059e+37  ;;  %v2213_v47 = vor.u32 1.1754944e-38, %v2212_v29 }
 0xab0   : > { %v4585_v60 = vpop.eup %4584 }
 0xab1   : > { %v4587_v4 = vpop.eup %4586  ;;  %v2184_v62 = vadd.f32 1.0, %v4585_v60  ;;  %v2152_v60 = vadd.f32 %v2151_v12, %v2025_v18 }
 0xab2   : > { %v4589_v0 = vpop.eup %4588  ;;  %v2187_v1 = vmul.f32 %v4587_v4, %v2182_v57  ;;  %vm2192_vm13 = vweird.f32 %v4587_v4 }
 0xab3   : > { %v4591_v2 = vpop.eup %4590  ;;  %v2202_v3 = vmul.f32 %v4589_v0, %v2183_v59  ;;  %4592 = vrcp.f32 %v2184_v62  ;;  %vm5422_vm15 = vmor %vm2191_vm14, %vm2192_vm13  ;;  %vm2207_vm2 = vweird.f32 %v4589_v0  ;;  %v2227_v34 = vand.u32 2147483648, %v2184_v62 }
 0xab4   : > { %v2188_v5 = vsub.f32 1.0, %v2187_v1  ;;  %v5419_v6 = vadd.f32 1.0, %v4591_v2  ;;  %vm5430_vm9 = vmor %vm2206_vm7, %vm2207_vm2  ;;  %v2225_v38 = vand.u32 2147483647, %v2184_v62  ;;  %vm2221_vm12 = vweird.f32 %v2184_v62 }
 0xab5   : > { %v2203_v8 = vsub.f32 1.0, %v2202_v3  ;;  %v2228_v51 = vor.u32 1.1754944e-38, %v2227_v34  ;;  %v4458_v34 = vld [vmem:[%s5905_s9 + $0x74] sm:$0xf] }
 0xab6   : > { %v2189_v11 = vmul.f32 %v4587_v4, %v2188_v5  ;;  %4594 = vrcp.f32 %v5419_v6  ;;  %v2242_v49 = vand.u32 2147483648, %v5419_v6  ;;  %v2240_v56 = vand.u32 2147483647, %v5419_v6 }
 0xab7   : > { %v2204_v13 = vmul.f32 %v4589_v0, %v2203_v8  ;;  %vm2236_vm2 = vweird.f32 %v5419_v6 }
 0xab8   : > { %v2190_v14 = vadd.f32 %v4587_v4, %v2189_v11  ;;  %v2243_v1 = vor.u32 1.1754944e-38, %v2242_v49  ;;  %v2166_v11 = vadd.f32 %v2165_v17, %v2026_v61  ;;  %v4455_v49 = vld [vmem:[%s5905_s9 + $0x54] sm:$0xf0] }
 0xab9   : > { %v4593_v15 = vpop.eup %4592  ;;  %v2205_v22 = vadd.f32 %v4589_v0, %v2204_v13 }
 0xaba   : > { %v2217_v63 = vmul.f32 %v4593_v15, %v2184_v62  ;;  %v2194_v27 = vsel %vm5422_vm15, %v4587_v4, %v2190_v14  ;;  %vm2222_vm10 = vweird.f32 %v4593_v15  ;;  %vm2226_vm15 = vcmp.eq.f32.partialorder %v2225_v38, 8.507059e+37  ;;  %v2167_v62 = vpop.f32.mrf.mxu1  ;;  %v4457_v38 = vld [vmem:[%s5905_s9 + $0x64] sm:$0xf0] }
 0xabb   : > { %v2199_v44 = vsel %vm2196_vm8, %v2198_v33, %v2194_v27  ;;  %v2209_v45 = vsel %vm5430_vm9, %v4589_v0, %v2205_v22  ;;  %vm2223_vm13 = vmor %vm2221_vm12, %vm2222_vm10  ;;  %v2154_v4 = vadd.f32 %v2153_v50, %v2025_v18  ;;  %vm2241_vm8 = vcmp.eq.f32.partialorder %v2240_v56, 8.507059e+37  ;;  %v4459_v33 = vld [vmem:[%s5905_s9 + $0x74] sm:$0xf0]  ;;  %v4454_v50 = vld [vmem:[%s5905_s9 + $0x54] sm:$0xf] }
 0xabc   : > { %v4595_v26 = vpop.eup %4594  ;;  %v2218_v31 = vsub.f32 1.0, %v2217_v63  ;;  %v2246_v20 = vmul.f32 %v2199_v44, %v5389_v39  ;;  %v2214_v57 = vsel %vm2211_vm11, %v2213_v47, %v2209_v45  ;;  %v2168_v28 = vadd.f32 %v2167_v62, %v2026_v61  ;;  %v4456_v44 = vld [vmem:[%s5905_s9 + $0x64] sm:$0xf]  ;;  %v4453_v61 = vld [vmem:[%s5905_s9 + $0x44] sm:$0xf0] }
 0xabd   : > { %v2232_v35 = vmul.f32 %v4595_v26, %v5419_v6  ;;  %vm2237_vm14 = vweird.f32 %v4595_v26  ;;  %v2247_v2 = vmul.f32 %v2214_v57, %v5391_v43 }
 0xabe   : > { %v2219_v37 = vmul.f32 %v4593_v15, %v2218_v31  ;;  %vm2238_vm7 = vmor %vm2236_vm2, %vm2237_vm14  ;;  %v2250_v39 = vmul.f32 %v2246_v20, %v2152_v60  ;;  %v4142_v60 = vld [vmem:[%s5905_s9 + $0x48] sm:$0xf0] }
 0xabf   : > { %v2233_v46 = vsub.f32 1.0, %v2232_v35  ;;  %v2251_v6 = vmul.f32 %v2247_v2, %v2166_v11  ;;  %v4166_v35 = vld [vmem:[%s5905_s9 + $0x78] sm:$0xf0] }
 0xac0   : > { %v2220_v48 = vadd.f32 %v4593_v15, %v2219_v37  ;;  %v4169_v36 = vor.u32 %v4458_v34, %v4166_v35  ;;  %v4156_v37 = vld [vmem:[%s5905_s9 + $0x60] sm:$0xf] }
 0xac1   : > { %v2234_v55 = vmul.f32 %v4595_v26, %v2233_v46  ;;  %v4157_v45 = vor.u32 %v4457_v38, %v4156_v37  ;;  %v4158_v46 = vld [vmem:[%s5905_s9 + $0x68] sm:$0xf0] }
 0xac2   : > { %v2224_v10 = vsel %vm2223_vm13, %v4593_v15, %v2220_v48  ;;  %2571 = vmatpush.bf16.msra.mxu1 %v4169_v36  ;;  %v4161_v47 = vor.u32 %v4456_v44, %v4158_v46  ;;  %v4148_v48 = vld [vmem:[%s5905_s9 + $0x50] sm:$0xf] }
 0xac3   : > { %v2229_v7 = vsel %vm2226_vm15, %v2228_v51, %v2224_v10  ;;  %v2235_v59 = vadd.f32 %v4595_v26, %v2234_v55  ;;  %v4149_v51 = vor.u32 %v4455_v49, %v4148_v48  ;;  %v4150_v55 = vld [vmem:[%s5905_s9 + $0x58] sm:$0xf0]  ;;  %v4140_v10 = vld [vmem:[%s5905_s9 + $0x40] sm:$0xf] }
 0xac4   : > { %v2248_v0 = vmul.f32 %v2229_v7, %v5407_v52  ;;  %v4527_v52 = vld [vmem:[%s5913_s17] ss:$0 sm:$0xff]  ;;  %v4153_v20 = vor.u32 %v4454_v50, %v4150_v55  ;;  %v4452_v7 = vld [vmem:[%s5905_s9 + $0x44] sm:$0xf] }
 0xac5   : > { %v2239_v3 = vsel %vm2238_vm7, %v4595_v26, %v2235_v59  ;;  %v4141_v59 = vor.u32 %v4453_v61, %v4140_v10  ;;  %v4145_v62 = vor.u32 %v4452_v7, %v4142_v60 }
 0xac6   : > { %v2252_v5 = vmul.f32 %v2248_v0, %v2154_v4  ;;  %v2244_v8 = vsel %vm2241_vm8, %v2243_v1, %v2239_v3  ;;  %2572 = vmatpush.bf16.msra.mxu1 %v4161_v47 }
 0xac7   : > { %v2249_v13 = vmul.f32 %v2244_v8, %v5409_v54 }
 0xac8   : > { %v2254_v14 = vpack.c.bf16 %v2252_v5, %v2250_v39 }
 0xac9   : > { %v2253_v12 = vmul.f32 %v2249_v13, %v2168_v28 }
 0xaca   : > { %2363 = vmatmul.bf16.vlgmr.msra.gmra.mxu2 %v2254_v14  ;;  %2573 = vmatpush.bf16.msra.mxu1 %v4153_v20 }
 0xacb   : > { %v2255_v15 = vpack.c.bf16 %v2253_v12, %v2251_v6 }
 0xacd   : > { %2377 = vmatmul.bf16.vlgmr.msrb.gmra.mxu3 %v2255_v15 }
 0xace   : > { %2574 = vmatpush.bf16.msra.mxu1 %v4145_v62 }
 0xb4d   : > { %v2364_v43 = vpop.f32.mrf.mxu2 }
 0xb4e   : > { %v2365_v16 = vadd.f32 %v4527_v52, %v2364_v43 }
 0xb50   : > { %v2378_v21 = vpop.f32.mrf.mxu3 }
 0xb51   : > { %v2379_v63 = vadd.f32 %v2378_v21, %v2365_v16  ;;  %v4528_v16 = vld [vmem:[%s5904_s8 + $0x1] ss:$0 sm:$0xff] }
 0xb53   : > { %v5448_v19 = vadd.f32 %v2379_v63, %v5234_v53  ;;  %v4164_v53 = vld [vmem:[%s5905_s9 + $0x70] sm:$0xf] }
 0xb55   : > { %v2366_v17 = vpop.f32.mrf.mxu2  ;;  %v2465_v54 = vmul.f32 %v5448_v19, %v5448_v19 }
 0xb56   : > { %v2367_v22 = vadd.f32 %v4527_v52, %v2366_v17 }
 0xb57   : > { %v2467_v23 = vsel %vm1234_vm0, %v2465_v54, 0.0 }
 0xb58   : > { %v2380_v26 = vpop.f32.mrf.mxu3  ;;  %2468 = vadd.xlane.f32.xlu2 %v2467_v23 }
 0xb59   : > { %v2381_v18 = vadd.f32 %v2380_v26, %v2367_v22  ;;  %v4077_v26 = vld [vmem:[%s5906_s10 + $0x2] sm:$0x3] }
 0xb5b   : > { %v5454_v27 = vadd.f32 %v2381_v18, %v5240_v58  ;;  %v4165_v58 = vor.u32 %v4459_v33, %v4164_v53  ;;  %v2506_v18 = vperm.slane %v4077_v26, 0  ;;  %v2507_v33 = vperm.slane %v4077_v26, 1 }
 0xb5d   : > { %v2466_v29 = vmul.f32 %v5454_v27, %v5454_v27  ;;  %2557 = vmatpush.bf16.msrb.mxu0 %v4165_v58 }
 0xb5f   : > { %v2470_v31 = vsel %vm1238_vm1, %v2466_v29, 0.0 }
 0xb60   : > { %2471 = vadd.xlane.f32.xlu0 %v2470_v31 }
 0xb61   : > { %2558 = vmatpush.bf16.msrb.mxu0 %v4157_v45 }
 0xb65   : > { %2559 = vmatpush.bf16.msrb.mxu0 %v4149_v51 }
 0xb69   : > { %2560 = vmatpush.bf16.msrb.mxu0 %v4141_v59 }
 0xbcb   : > { %v2469_v56 = vpop.xlane.xlu2 %2468 }
 0xbcc   : > { %v2473_v57 = vmul.f32 %v2469_v56, %v4977_v41 }
 0xbce   : > { %v2475_v4 = vadd.f32 1e-06, %v2473_v57 }
 0xbd0   : > { %4596 = vrsqrt.f32 %v2475_v4  ;;  %vm2483_vm10 = vweird.f32 %v2475_v4 }
 0xbd3   : > { %v2472_v0 = vpop.xlane.xlu0 %2471 }
 0xbd4   : > { %v2474_v1 = vmul.f32 %v2472_v0, %v4977_v41 }
 0xbd6   : > { %v4597_v2 = vpop.eup %4596  ;;  %v2476_v3 = vadd.f32 1e-06, %v2474_v1 }
 0xbd7   : > { %v2478_v39 = vmul.f32 %v4597_v2, %v2475_v4  ;;  %vm2484_vm9 = vweird.f32 %v4597_v2 }
 0xbd8   : > { %4598 = vrsqrt.f32 %v2476_v3  ;;  %vm2485_vm11 = vmor %vm2483_vm10, %vm2484_vm9  ;;  %vm2493_vm13 = vweird.f32 %v2476_v3 }
 0xbd9   : > { %v2479_v5 = vmul.f32 %v4597_v2, %v2478_v39 }
 0xbdb   : > { %v2480_v8 = vmul.f32 0.5, %v2479_v5 }
 0xbdd   : > { %v2481_v11 = vsub.f32 1.5, %v2480_v8 }
 0xbde   : > { %v4599_v28 = vpop.eup %4598 }
 0xbdf   : > { %v2488_v13 = vmul.f32 %v4599_v28, %v2476_v3  ;;  %v2482_v14 = vmul.f32 %v4597_v2, %v2481_v11  ;;  %vm2494_vm12 = vweird.f32 %v4599_v28 }
 0xbe0   : > { %vm2495_vm14 = vmor %vm2493_vm13, %vm2494_vm12 }
 0xbe1   : > { %v2489_v6 = vmul.f32 %v4599_v28, %v2488_v13  ;;  %v2486_v15 = vsel %vm2485_vm11, %v4597_v2, %v2482_v14 }
 0xbe2   : > { %v2497_v21 = vmul.f32 %v2486_v15, %v5448_v19 }
 0xbe3   : > { %v2490_v12 = vmul.f32 0.5, %v2489_v6 }
 0xbe4   : > { %v2502_v54 = vmul.f32 %v4528_v16, %v2497_v21 }
 0xbe5   : > { %v2491_v52 = vsub.f32 1.5, %v2490_v12 }
 0xbe7   : > { %v2492_v43 = vmul.f32 %v4599_v28, %v2491_v52 }
 0xbe9   : > { %v2496_v63 = vsel %vm2495_vm14, %v4599_v28, %v2492_v43 }
 0xbea   : > { %v2498_v17 = vmul.f32 %v2496_v63, %v5454_v27 }
 0xbec   : > { %v2503_v22 = vmul.f32 %v4528_v16, %v2498_v17  ;;  %v4656_v17 = vld [vmem:[%s5088_s1 + $0x8] sm:$0x1] }
 0xbee   : > { %v2504_v23 = vpack.c.bf16 %v2503_v22, %v2502_v54  ;;  %v4657_v22 = vld [vmem:[%s5088_s1] sm:$0xff]  ;;  %s5959_s1 = smov 96  }
 0xbf0   : > { %4170 = vmatmul.msk.bf16.vlgmr.msrb.gmra.mxu0 %vm1234_vm0, %v2504_v23  ;;  %4171 = vmatmul.msk.bf16.vlgmr.msra.gmra.mxu1 %vm1234_vm0, %v2504_v23 }
 0xc6d   : > { %v2562_v29 = vpop.f32.mrf.mxu0  ;;  %v2576_v31 = vpop.f32.mrf.mxu1 }
 0xc6e   : > { %v5519_v53 = vadd.f32 %v2562_v29, %v2506_v18  ;;  %v2577_v35 = vadd.f32 %v2576_v31, %v2507_v33 }
 0xc70   : > { %2623 = vrot.lane.b32.xlu0 %v5519_v53, %s4667_s23  ;;  %v2619_v5 = vmul.f32 %v5519_v53, %v5132_v42 }
 0xc75   : > { %v2564_v34 = vpop.f32.mrf.mxu0  ;;  %v2578_v58 = vpop.f32.mrf.mxu1 }
 0xc76   : > { %v5523_v36 = vadd.f32 %v2564_v34, %v2506_v18  ;;  %v2579_v37 = vadd.f32 %v2578_v58, %v2507_v33 }
 0xc78   : > { %v5525_v38 = vpack.c.bf16 %v2579_v37, %v2577_v35  ;;  %2625 = vrot.lane.b32.xlu0 %v5523_v36, %s4667_s23  ;;  %v2620_v11 = vmul.f32 %v5523_v36, %v5130_v40  ;;  %v2582_v54 = vmul.f32 %v4656_v17, %v5523_v36 }
 0xc7a   : > { %v2720_v44 = vand.u32 %v5525_v38, %v5060_v9 }
 0xc7c   : > { %2729 = vmatpush.bf16.msrb.mxu1 %v2720_v44 }
 0xce2   : > { %v2624_v45 = vpop.permute.xlu0 %2623 }
 0xce3   : > { %2629 = vrot.lane.b32.xlu0 %v2624_v45, %s4667_s23 }
 0xcea   : > { %v2626_v46 = vpop.permute.xlu0 %2625 }
 0xceb   : > { %2583 = vrot.lane.b32.xlu0 %v5519_v53, %s4667_s23  ;;  %2632 = vrot.lane.b32.xlu1 %v2626_v46, %s4667_s23 }
 0xd55   : > { %v2630_v47 = vpop.permute.xlu0 %2629 }
 0xd56   : > { %v2631_v48 = vsel %vm1475_vm3, %v2630_v47, %v2624_v45 }
 0xd57   : > { %2635 = vrot.lane.b32.xlu2 %v2631_v48, %s4667_s23 }
 0xd5d   : > { %v2633_v49 = vpop.permute.xlu1 %2632  ;;  %v2584_v57 = vpop.permute.xlu0 %2583 }
 0xd5e   : > { %v2634_v50 = vsel %vm1475_vm3, %v2633_v49, %v2626_v46  ;;  %v2585_v62 = vsel %vm1475_vm3, %v2584_v57, %v5519_v53 }
 0xd5f   : > { %2637 = vrot.lane.b32.xlu0 %v2634_v50, %s4667_s23 }
 0xd67   : > { %2586 = vrot.lane.b32.xlu0 %v5523_v36, %s4667_s23 }
 0xdb1   : > { %v2636_v51 = vpop.permute.xlu2 %2635 }
 0xdb2   : > { %v2639_v55 = vsel %vm1475_vm3, %v2636_v51, %v2624_v45 }
 0xdb3   : > { %v2641_v56 = vmul.f32 %v2639_v55, %v5106_v24  ;;  %v2653_v20 = vmul.f32 %v2639_v55, %v5108_v25 }
 0xdb5   : > { %2657 = vrot.lane.b32.xlu0 %v2653_v20, %s5954_s24  ;;  %2645 = vrot.lane.b32.xlu1 %v2641_v56, %s5955_s28 }
 0xdd1   : > { %v2638_v10 = vpop.permute.xlu0 %2637 }
 0xdd2   : > { %v2640_v61 = vsel %vm1475_vm3, %v2638_v10, %v2626_v46  ;;  %v4460_v10 = vld [vmem:[%s5907_s11 + $0x20] sm:$0xff] }
 0xdd3   : > { %v2642_v7 = vmul.f32 %v2640_v61, %v5115_v30  ;;  %v2654_v59 = vmul.f32 %v2640_v61, %v5117_v32  ;;  %2850 = vmatpush.bf16.msra.mxu1 %v4460_v10 }
 0xdd5   : > { %2659 = vrot.lane.b32.xlu1 %v2654_v59, %s5954_s24  ;;  %2647 = vrot.lane.b32.xlu2 %v2642_v7, %s5955_s28 }
 0xdd9   : > { %v2587_v60 = vpop.permute.xlu0 %2586 }
 0xdda   : > { %v2588_v4 = vsel %vm1475_vm3, %v2587_v60, %v5523_v36 }
 0xddb   : > { %2591 = vrot.lane.b32.xlu0 %v2588_v4, %s4667_s23 }
 0xddd   : > { %2589 = vrot.lane.b32.xlu2 %v2585_v62, %s4667_s23 }
 0xe27   : > { %v2646_v39 = vpop.permute.xlu1 %2645  ;;  %v2658_v28 = vpop.permute.xlu0 %2657 }
 0xe28   : > { %v2651_v8 = vadd.f32 %v2646_v39, %v2619_v5 }
 0xe2a   : > { %v2663_v6 = vadd.f32 %v2658_v28, %v2651_v8 }
 0xe2f   : > { %v2648_v0 = vpop.permute.xlu2 %2647 }
 0xe30   : > { %v2652_v13 = vadd.f32 %v2648_v0, %v2620_v11 }
 0xe37   : > { %v2590_v1 = vpop.permute.xlu2 %2589 }
 0xe38   : > { %v2593_v2 = vsel %vm1475_vm3, %v2590_v1, %v5519_v53 }
 0xe39   : > { %v2595_v3 = vmul.f32 %v2593_v2, %v5106_v24  ;;  %v2607_v40 = vmul.f32 %v2593_v2, %v5108_v25 }
 0xe3b   : > { %2599 = vrot.lane.b32.xlu2 %v2595_v3, %s5956_s27 }
 0xe47   : > { %v2660_v14 = vpop.permute.xlu1 %2659 }
 0xe48   : > { %v2664_v12 = vadd.f32 %v2660_v14, %v2652_v13 }
 0xe4a   : > { %v2666_v15 = vpack.c.bf16 %v2664_v12, %v2663_v6 }
 0xe4c   : > { %2669 = vrot.lane.b32.xlu1 %v2666_v15, %s4667_s23  ;;  %s5958_s23 = smov 48  }
 0xe4d   : > { %v2592_v24 = vpop.permute.xlu0 %2591 }
 0xe4e   : > { %v2594_v52 = vsel %vm1475_vm3, %v2592_v24, %v5523_v36 }
 0xe4f   : > { %v2596_v42 = vmul.f32 %v2594_v52, %v5115_v30  ;;  %v2608_v43 = vmul.f32 %v2594_v52, %v5117_v32  ;;  %v2581_v30 = vmul.f32 %v4657_v22, %v5519_v53 }
 0xe51   : > { %2613 = vrot.lane.b32.xlu2 %v2608_v43, %s5957_s29  ;;  %2601 = vrot.lane.b32.xlu0 %v2596_v42, %s5956_s27 }
 0xe54   : > { %2611 = vrot.lane.b32.xlu1 %v2607_v40, %s5957_s29 }
 0xe95   : > { %v2600_v16 = vpop.permute.xlu2 %2599 }
 0xe96   : > { %v2605_v26 = vadd.f32 %v2600_v16, %v2581_v30 }
 0xeab   : > { %v2614_v18 = vpop.permute.xlu2 %2613 }
 0xebe   : > { %v2670_v21 = vpop.permute.xlu1 %2669 }
 0xebf   : > { %v2675_v63 = vsel %vm1588_vm4, %v2670_v21, 0 }
 0xec0   : > { %2684 = vmatpush.bf16.xpose.msra.mxu0 %v2675_v63 }
 0xec3   : > { %v2602_v32 = vpop.permute.xlu0 %2601 }
 0xec4   : > { %v2606_v23 = vadd.f32 %v2602_v32, %v2582_v54 }
 0xec6   : > { %v2618_v29 = vadd.f32 %v2614_v18, %v2606_v23  ;;  %v2612_v31 = vpop.permute.xlu1 %2611 }
 0xec7   : > { %v2617_v25 = vadd.f32 %v2612_v31, %v2605_v26 }
 0xec9   : > { %v2665_v33 = vpack.c.bf16 %v2618_v29, %v2617_v25 }
 0xecb   : > { %4172 = vmatmul.msk.bf16.vlgmr.msra.gmra.mxu0 %vm1588_vm4, %v2665_v33 }
 0xf48   : > { %v2686_v34 = vpop.f32.mrf.mxu0 }
 0xf49   : > { %v2691_v58 = vmul.f32 0.25, %v2686_v34 }
 0xf4b   : > { %v2693_v35 = vsel %vm1611_vm5, %v2691_v58, -inf }
 0xf4c   : > { %2694 = vmax.xlane.f32.xlu0 %v2693_v35 }
 0xf50   : > { %v2688_v37 = vpop.f32.mrf.mxu0 }
 0xf51   : > { %v2692_v36 = vmul.f32 0.25, %v2688_v37 }
 0xf53   : > { %v2696_v44 = vsel %vm1615_vm6, %v2692_v36, -inf }
 0xf54   : > { %2697 = vmax.xlane.f32.xlu1 %v2696_v44 }
 0xf6d   : > { %2740 = vrot.lane.b32.xlu1 %v2666_v15, %s5958_s23 }
 0xf75   : > { %2857 = vrot.lane.b32.xlu1 %v2665_v33, %s5959_s1 }
 0xfbf   : > { %v2695_v53 = vpop.xlane.xlu0 %2694 }
 0xfc0   : > { %v2699_v45 = vsub.f32 %v2691_v58, %v2695_v53 }
 0xfc2   : > { %v2701_v46 = vmul.f32 1.442695, %v2699_v45 }
 0xfc4   : > { %4600 = vpow2.f32 %v2701_v46 }
 0xfc7   : > { %v2698_v47 = vpop.xlane.xlu1 %2697 }
 0xfc8   : > { %v2700_v48 = vsub.f32 %v2692_v36, %v2698_v47 }
 0xfca   : > { %v4601_v49 = vpop.eup %4600  ;;  %v2703_v50 = vmul.f32 1.442695, %v2700_v48 }
 0xfcb   : > { %v2705_v51 = vsel %vm1611_vm5, %v4601_v49, 0.0 }
 0xfcc   : > { %4602 = vpow2.f32 %v2703_v50  ;;  %2706 = vadd.xlane.f32.xlu2 %v2705_v51 }
 0xfd2   : > { %v4603_v55 = vpop.eup %4602 }
 0xfd3   : > { %v2708_v56 = vsel %vm1615_vm6, %v4603_v55, 0.0 }
 0xfd4   : > { %2709 = vadd.xlane.f32.xlu0 %v2708_v56 }
 0xfdf   : > { %v2741_v20 = vpop.permute.xlu1 %2740 }
 0xfe0   : > { %v2746_v57 = vsel %vm1588_vm4, %v2741_v20, 0 }
 0xfe1   : > { %2755 = vmatpush.bf16.xpose.msrb.mxu2 %v2746_v57 }
 0xfe4   : > { %2738 = vrot.lane.b32.xlu2 %v2665_v33, %s5960_s5 }
 0xfe7   : > { %v2858_v8 = vpop.permute.xlu1 %2857 }
 0xfe8   : > { %2859 = vrot.lane.b32.xlu0 %v2666_v15, %s5961_s0 }
 0xfec   : > { %2956 = vrot.lane.b32.xlu2 %v2666_v15, %s5962_s25 }
 0xff0   : > { %2954 = vrot.lane.b32.xlu0 %v2665_v33, %s5963_s4 }
0x103f   : > { %v2707_v61 = vpop.xlane.xlu2 %2706 }
0x1040   : > { %4604 = vrcp.f32 %v2707_v61 }
0x1046   : > { %v4605_v60 = vpop.eup %4604 }
0x1047   : > { %v2739_v7 = vpop.permute.xlu2 %2738  ;;  %v2710_v59 = vpop.xlane.xlu0 %2709  ;;  %v2713_v62 = vmul.f32 %v4605_v60, %v4601_v49 }
0x1048   : > { %4606 = vrcp.f32 %v2710_v59  ;;  %4174 = vmatmul.msk.bf16.vlgmr.msrb.gmra.mxu2 %vm1588_vm4, %v2739_v7 }
0x104e   : > { %v4607_v4 = vpop.eup %4606 }
0x104f   : > { %v2714_v0 = vmul.f32 %v4607_v4, %v4603_v55  ;;  %v2957_v1 = vpop.permute.xlu2 %2956 }
0x1050   : > { %v2962_v3 = vsel %vm1588_vm4, %v2957_v1, 0 }
0x1051   : > { %v2715_v2 = vpack.c.bf16 %v2714_v0, %v2713_v62 }
0x1053   : > { %4173 = vmatmul.msk.bf16.vlgmr.msrb.gmra.mxu1 %vm1611_vm5, %v2715_v2 }
0x1054   : > { %2971 = vmatpush.bf16.xpose.msrb.mxu1 %v2962_v3 }
0x105a   : > { %v2860_v39 = vpop.permute.xlu0 %2859 }
0x105b   : > { %v2865_v5 = vsel %vm1588_vm4, %v2860_v39, 0 }
0x105c   : > { %2874 = vmatpush.bf16.xpose.msra.mxu2 %v2865_v5 }
0x1062   : > { %v2955_v16 = vpop.permute.xlu0 %2954 }
0x1063   : > { %4186 = vmatmul.msk.bf16.vlgmr.msra.gmra.mxu2 %vm1588_vm4, %v2858_v8 }
0x10cb   : > { %v2757_v11 = vpop.f32.mrf.mxu2 }
0x10cc   : > { %v2762_v28 = vmul.f32 0.25, %v2757_v11 }
0x10ce   : > { %v2764_v13 = vsel %vm1611_vm5, %v2762_v28, -inf }
0x10cf   : > { %2765 = vmax.xlane.f32.xlu2 %v2764_v13 }
0x10d0   : > { %v2731_v14 = vpop.f32.mrf.mxu1 }
0x10d3   : > { %v2759_v6 = vpop.f32.mrf.mxu2 }
0x10d4   : > { %v2763_v12 = vmul.f32 0.25, %v2759_v6 }
0x10d6   : > { %v2767_v15 = vsel %vm1615_vm6, %v2763_v12, -inf }
0x10d7   : > { %2768 = vmax.xlane.f32.xlu1 %v2767_v15 }
0x10d8   : > { %v2733_v24 = vpop.f32.mrf.mxu1 }
0x10d9   : > { %v2736_v52 = vpack.c.bf16 %v2733_v24, %v2731_v14 }
0x10db   : > { %4185 = vmatmul.msk.bf16.vlgmr.msra.gmra.mxu1 %vm1588_vm4, %v2736_v52 }
0x10e6   : > { %v2876_v42 = vpop.f32.mrf.mxu2 }
0x10e7   : > { %v2881_v43 = vmul.f32 0.25, %v2876_v42 }
0x10e9   : > { %v2883_v40 = vsel %vm1611_vm5, %v2881_v43, -inf }
0x10ea   : > { %2884 = vmax.xlane.f32.xlu1 %v2883_v40 }
0x10eb   : > { %4193 = vmatmul.msk.bf16.vlgmr.msrb.gmra.mxu1 %vm1588_vm4, %v2955_v16  ;;  %v4461_v16 = vld [vmem:[%s5907_s11 + $0x28] sm:$0xff] }
0x10ec   : > { %2827 = vmatpush.bf16.msrb.mxu0 %v4461_v16 }
0x10ee   : > { %v2878_v25 = vpop.f32.mrf.mxu2 }
0x10ef   : > { %v2882_v34 = vmul.f32 0.25, %v2878_v25 }
0x10f1   : > { %v2886_v53 = vsel %vm1615_vm6, %v2882_v34, -inf }
0x1142   : > { %v2766_v23 = vpop.xlane.xlu2 %2765 }
0x1143   : > { %v2770_v29 = vsub.f32 %v2762_v28, %v2766_v23 }
0x1145   : > { %v2772_v33 = vmul.f32 1.442695, %v2770_v29 }
0x114a   : > { %v2769_v21 = vpop.xlane.xlu1 %2768 }
0x114b   : > { %v2771_v63 = vsub.f32 %v2763_v12, %v2769_v21 }
0x114d   : > { %v2774_v17 = vmul.f32 1.442695, %v2771_v63 }
0x114f   : > { %4608 = vpow2.f32 %v2774_v17 }
0x1150   : > { %4610 = vpow2.f32 %v2772_v33  ;;  %v4463_v33 = vld [vmem:[%s5907_s11 + $0x38] sm:$0xff] }
0x1155   : > { %v4609_v54 = vpop.eup %4608 }
0x1156   : > { %v2779_v22 = vsel %vm1615_vm6, %v4609_v54, 0.0  ;;  %v4611_v46 = vpop.eup %4610 }
0x1157   : > { %2780 = vadd.xlane.f32.xlu1 %v2779_v22  ;;  %v2776_v47 = vsel %vm1611_vm5, %v4611_v46, 0.0 }
0x1158   : > { %v5605_v30 = vpop.f32.mrf.mxu1 }
0x115d   : > { %v2885_v58 = vpop.xlane.xlu1 %2884 }
0x115e   : > { %v2889_v36 = vsub.f32 %v2881_v43, %v2885_v58 }
0x1160   : > { %v5607_v32 = vpop.f32.mrf.mxu1  ;;  %v2891_v45 = vmul.f32 1.442695, %v2889_v36 }
0x1162   : > { %4612 = vpow2.f32 %v2891_v45 }
0x1168   : > { %v2973_v26 = vpop.f32.mrf.mxu1  ;;  %v5613_v48 = vpop.eup %4612 }
0x1169   : > { %v2978_v18 = vmul.f32 0.25, %v2973_v26  ;;  %v2895_v49 = vsel %vm1611_vm5, %v5613_v48, 0.0 }
0x116b   : > { %v2980_v31 = vsel %vm1611_vm5, %v2978_v18, -inf }
0x116c   : > { %2981 = vmax.xlane.f32.xlu0 %v2980_v31 }
0x1170   : > { %v2975_v35 = vpop.f32.mrf.mxu1 }
0x1171   : > { %v2979_v37 = vmul.f32 0.25, %v2975_v35 }
0x1173   : > { %v2983_v44 = vsel %vm1615_vm6, %v2979_v37, -inf }
0x1174   : > { %2984 = vmax.xlane.f32.xlu2 %v2983_v44  ;;  %2887 = vmax.xlane.f32.xlu0 %v2886_v53 }
0x117c   : > { %2777 = vadd.xlane.f32.xlu2 %v2776_v47 }
0x1184   : > { %2896 = vadd.xlane.f32.xlu2 %v2895_v49 }
0x1188   : > { %2788 = vrot.lane.b32.xlu0 %v5525_v38, %s5960_s5  ;;  %s736_s5 = scalar_lea.vmem %s5917_s21, %s4969_s2 }
0x1190   : > { %3003 = vrot.lane.b32.xlu0 %v5525_v38, %s5963_s4 }
0x11ca   : > { %v2781_v62 = vpop.xlane.xlu1 %2780 }
0x11df   : > { %v2982_v50 = vpop.xlane.xlu0 %2981 }
0x11e0   : > { %v2986_v51 = vsub.f32 %v2978_v18, %v2982_v50 }
0x11e2   : > { %v2988_v55 = vmul.f32 1.442695, %v2986_v51 }
0x11e4   : > { %4614 = vpow2.f32 %v2988_v55  ;;  %v4529_v55 = vld [vmem:[%s5908_s12 + $0x1] ss:$0 sm:$0xff] }
0x11e7   : > { %v2985_v56 = vpop.xlane.xlu2 %2984  ;;  %v2888_v20 = vpop.xlane.xlu0 %2887 }
0x11e8   : > { %v2987_v57 = vsub.f32 %v2979_v37, %v2985_v56  ;;  %v2890_v7 = vsub.f32 %v2882_v34, %v2888_v20  ;;  %v4462_v34 = vld [vmem:[%s5907_s11 + $0x30] sm:$0xff] }
0x11e9   : > { %2945 = vmatpush.bf16.msra.mxu0 %v4462_v34  ;;  %v4228_v34 = vld [vmem:[%s5910_s14 + $0xb8] sm:$0xf0] }
0x11ea   : > { %v4615_v10 = vpop.eup %4614  ;;  %v2990_v61 = vmul.f32 1.442695, %v2987_v57  ;;  %v2893_v60 = vmul.f32 1.442695, %v2890_v7 }
0x11eb   : > { %v2992_v59 = vsel %vm1611_vm5, %v4615_v10, 0.0 }
0x11ec   : > { %4616 = vpow2.f32 %v2990_v61  ;;  %2993 = vadd.xlane.f32.xlu2 %v2992_v59 }
0x11ef   : > { %v2778_v4 = vpop.xlane.xlu2 %2777 }
0x11f0   : > { %4618 = vrcp.f32 %v2778_v4 }
0x11f1   : > { %4620 = vpow2.f32 %v2893_v60 }
0x11f2   : > { %v4617_v0 = vpop.eup %4616  ;;  %4622 = vrcp.f32 %v2781_v62 }
0x11f3   : > { %v2995_v1 = vsel %vm1615_vm6, %v4617_v0, 0.0 }
0x11f4   : > { %2996 = vadd.xlane.f32.xlu1 %v2995_v1  ;;  %v4478_v1 = vld [vmem:[%s5910_s14 + $0xec] sm:$0xf0] }
0x11f6   : > { %v4619_v2 = vpop.eup %4618 }
0x11f7   : > { %v4621_v3 = vpop.eup %4620  ;;  %v2784_v5 = vmul.f32 %v4619_v2, %v4611_v46  ;;  %v2897_v15 = vpop.xlane.xlu2 %2896 }
0x11f8   : > { %v4623_v39 = vpop.eup %4622  ;;  %v2898_v28 = vsel %vm1615_vm6, %v4621_v3, 0.0 }
0x11f9   : > { %v2785_v13 = vmul.f32 %v4623_v39, %v4609_v54  ;;  %v4258_v39 = vld [vmem:[%s5910_s14 + $0xe8] sm:$0xf] }
0x11fa   : > { %v2789_v8 = vpop.permute.xlu0 %2788 }
0x11fb   : > { %v2794_v11 = vand.u32 %v2789_v8, %v5060_v9  ;;  %v2786_v14 = vpack.c.bf16 %v2785_v13, %v2784_v5  ;;  %v4479_v5 = vld [vmem:[%s5910_s14 + $0xf4] sm:$0xf0]  ;;  %v4260_v13 = vld [vmem:[%s5910_s14 + $0xf8] sm:$0xf0] }
0x11fc   : > { %2899 = vadd.xlane.f32.xlu1 %v2898_v28  ;;  %v4477_v28 = vld [vmem:[%s5910_s14 + $0xec] sm:$0xf] }
0x11fd   : > { %2803 = vmatpush.bf16.msra.mxu3 %v2794_v11  ;;  %v4259_v11 = vor.u32 %v4479_v5, %v4258_v39  ;;  %v4530_v5 = vld [vmem:[%s5909_s13 + $0x1] ss:$0 sm:$0xff] }
0x1200   : > { %4175 = vmatmul.msk.bf16.vlgmr.msra.gmra.mxu3 %vm1611_vm5, %v2786_v14  ;;  %v4263_v14 = vor.u32 %v4477_v28, %v4260_v13 }
0x1202   : > { %v3004_v6 = vpop.permute.xlu0 %3003 }
0x1203   : > { %v3009_v12 = vand.u32 %v3004_v6, %v5060_v9  ;;  %v4234_v6 = vld [vmem:[%s5910_s14 + $0xc0] sm:$0xf] }
0x1204   : > { %2906 = vrot.lane.b32.xlu2 %v5525_v38, %s5959_s1 }
0x1205   : > { %3018 = vmatpush.bf16.msrb.mxu2 %v3009_v12  ;;  %v4474_v12 = vld [vmem:[%s5910_s14 + $0xcc] sm:$0xf0] }
0x1209   : > { %3222 = vmatpush.bf16.msra.mxu2 %v4259_v11 }
0x125f   : > { %v2994_v24 = vpop.xlane.xlu2 %2993 }
0x1260   : > { %4624 = vrcp.f32 %v2994_v24  ;;  %v4235_v24 = vor.u32 %v4474_v12, %v4234_v6  ;;  %v4487_v12 = vld [vmem:[%s5912_s16 + $0xb8] sm:$0xff] }
0x1266   : > { %v4625_v40 = vpop.eup %4624 }
0x1267   : > { %v2907_v52 = vpop.permute.xlu2 %2906  ;;  %v2997_v42 = vpop.xlane.xlu1 %2996  ;;  %v3000_v63 = vmul.f32 %v4625_v40, %v4615_v10 }
0x1268   : > { %v2912_v43 = vand.u32 %v2907_v52, %v5060_v9  ;;  %4626 = vrcp.f32 %v2997_v42  ;;  %v4236_v52 = vld [vmem:[%s5910_s14 + $0xd0] sm:$0xf0]  ;;  %v4242_v42 = vld [vmem:[%s5910_s14 + $0xc8] sm:$0xf] }
0x1269   : > { %4628 = vrcp.f32 %v2897_v15  ;;  %v4472_v15 = vld [vmem:[%s5910_s14 + $0xc4] sm:$0xf] }
0x126a   : > { %2921 = vmatpush.bf16.msrb.mxu3 %v2912_v43  ;;  %v4475_v43 = vld [vmem:[%s5910_s14 + $0xd4] sm:$0xf0]  ;;  %v4239_v40 = vor.u32 %v4472_v15, %v4236_v52  ;;  %v4494_v52 = vld [vmem:[%s5912_s16 + $0xf0] sm:$0xff] }
0x126b   : > { %v4243_v16 = vor.u32 %v4475_v43, %v4242_v42  ;;  %v4495_v15 = vld [vmem:[%s5912_s16 + $0xf8] sm:$0xff]  ;;  %v4485_v42 = vld [vmem:[%s5912_s16 + $0xa8] sm:$0xff] }
0x126c   : > { %v4493_v43 = vld [vmem:[%s5912_s16 + $0xe8] sm:$0xff] }
0x126d   : > { %3223 = vmatpush.bf16.msra.mxu2 %v4243_v16  ;;  %v4484_v16 = vld [vmem:[%s5912_s16 + $0xa0] sm:$0xff] }
0x126e   : > { %v4627_v21 = vpop.eup %4626  ;;  %3042 = vmatpush.bf16.msra.mxu3 %v4463_v33  ;;  %v4469_v33 = vld [vmem:[%s5910_s14 + $0xac] sm:$0xf] }
0x126f   : > { %v3001_v38 = vmul.f32 %v4627_v21, %v4617_v0  ;;  %v2900_v17 = vpop.xlane.xlu1 %2899  ;;  %v4629_v22 = vpop.eup %4628  ;;  %v4250_v0 = vld [vmem:[%s5910_s14 + $0xe0] sm:$0xf]  ;;  %v4473_v21 = vld [vmem:[%s5910_s14 + $0xcc] sm:$0xf] }
0x1270   : > { %4630 = vrcp.f32 %v2900_v17  ;;  %v2903_v9 = vmul.f32 %v4629_v22, %v5613_v48  ;;  %v4251_v2 = vor.u32 %v4478_v1, %v4250_v0  ;;  %v4218_v17 = vld [vmem:[%s5910_s14 + $0xa0] sm:$0xf]  ;;  %v4468_v22 = vld [vmem:[%s5910_s14 + $0xa4] sm:$0xf] }
0x1271   : > { %v3002_v54 = vpack.c.bf16 %v3001_v38, %v3000_v63  ;;  %v4244_v63 = vld [vmem:[%s5910_s14 + $0xd8] sm:$0xf0] }
0x1272   : > { %v4247_v38 = vor.u32 %v4473_v21, %v4244_v63  ;;  %v4492_v21 = vld [vmem:[%s5912_s16 + $0xe0] sm:$0xff] }
0x1273   : > { %4194 = vmatmul.msk.bf16.vlgmr.msrb.gmra.mxu2 %vm1611_vm5, %v3002_v54  ;;  %v4470_v54 = vld [vmem:[%s5910_s14 + $0xac] sm:$0xf0] }
0x1276   : > { %v4631_v23 = vpop.eup %4630 }
0x1277   : > { %v2904_v26 = vmul.f32 %v4631_v23, %v4621_v3  ;;  %v4252_v3 = vld [vmem:[%s5910_s14 + $0xf0] sm:$0xf0]  ;;  %v4219_v23 = vor.u32 %v4470_v54, %v4218_v17 }
0x1279   : > { %v2905_v18 = vpack.c.bf16 %v2904_v26, %v2903_v9  ;;  %v4220_v9 = vld [vmem:[%s5910_s14 + $0xb0] sm:$0xf0]  ;;  %v4226_v26 = vld [vmem:[%s5910_s14 + $0xa8] sm:$0xf] }
0x127b   : > { %4187 = vmatmul.msk.bf16.vlgmr.msrb.gmra.mxu3 %vm1611_vm5, %v2905_v18  ;;  %v4471_v18 = vld [vmem:[%s5910_s14 + $0xb4] sm:$0xf0] }
0x127c   : > { %3236 = vmatpush.bf16.msrb.mxu3 %v4263_v14 }
0x1280   : > { %3237 = vmatpush.bf16.msrb.mxu3 %v4247_v38 }
0x1283   : > { %v2805_v29 = vpop.f32.mrf.mxu3 }
0x128b   : > { %v2807_v31 = vpop.f32.mrf.mxu3 }
0x128c   : > { %v2810_v25 = vpack.c.bf16 %v2807_v31, %v2805_v29  ;;  %v4223_v31 = vor.u32 %v4468_v22, %v4220_v9  ;;  %v4483_v22 = vld [vmem:[%s5912_s16 + $0x98] sm:$0xff] }
0x128e   : > { %4180 = vmatmul.msk.bf16.vlgmr.msrb.gmra.mxu0 %vm1588_vm4, %v2810_v25  ;;  %v4227_v25 = vor.u32 %v4471_v18, %v4226_v26 }
0x128f   : > { %3194 = vmatpush.bf16.msrb.mxu0 %v4251_v2 }
0x1290   : > { %3224 = vmatpush.bf16.msra.mxu2 %v4227_v25  ;;  %v4490_v25 = vld [vmem:[%s5912_s16 + $0xd0] sm:$0xff] }
0x1293   : > { %3195 = vmatpush.bf16.msrb.mxu0 %v4235_v24  ;;  %v4486_v24 = vld [vmem:[%s5912_s16 + $0xb0] sm:$0xff] }
0x1297   : > { %3196 = vmatpush.bf16.msrb.mxu0 %v4219_v23  ;;  %v4491_v23 = vld [vmem:[%s5912_s16 + $0xd8] sm:$0xff] }
0x12f6   : > { %v3020_v58 = vpop.f32.mrf.mxu2 }
0x12fe   : > { %v2923_v35 = vpop.f32.mrf.mxu3  ;;  %v3022_v37 = vpop.f32.mrf.mxu2 }
0x12ff   : > { %v3025_v36 = vpack.c.bf16 %v3022_v37, %v3020_v58  ;;  %v4202_v37 = vld [vmem:[%s5910_s14 + $0x80] sm:$0xf] }
0x1301   : > { %4199 = vmatmul.msk.bf16.vlgmr.msra.gmra.mxu3 %vm1588_vm4, %v3025_v36  ;;  %v4466_v36 = vld [vmem:[%s5910_s14 + $0x8c] sm:$0xf0] }
0x1306   : > { %v2925_v44 = vpop.f32.mrf.mxu3 }
0x1307   : > { %v2928_v53 = vpack.c.bf16 %v2925_v44, %v2923_v35  ;;  %v4231_v35 = vor.u32 %v4469_v33, %v4228_v34  ;;  %v4464_v44 = vld [vmem:[%s5910_s14 + $0x84] sm:$0xf] }
0x1309   : > { %4192 = vmatmul.msk.bf16.vlgmr.msra.gmra.mxu0 %vm1588_vm4, %v2928_v53  ;;  %v4203_v53 = vor.u32 %v4466_v36, %v4202_v37  ;;  %3238 = vmatpush.bf16.msrb.mxu3 %v4231_v35  ;;  %v4489_v35 = vld [vmem:[%s5912_s16 + $0xc8] sm:$0xff] }
0x130b   : > { %v2829_v45 = vpop.f32.mrf.mxu0  ;;  %3197 = vmatpush.bf16.msrb.mxu0 %v4203_v53 }
0x130c   : > { %v2853_v47 = vadd.f32 %v5605_v30, %v2829_v45  ;;  %v4204_v45 = vld [vmem:[%s5910_s14 + $0x90] sm:$0xf0] }
0x130f   : > { %3431 = vmatpush.bf16.msra.mxu0 %v4487_v12 }
0x1313   : > { %v2831_v46 = vpop.f32.mrf.mxu0  ;;  %3432 = vmatpush.bf16.msra.mxu0 %v4486_v24 }
0x1314   : > { %v2855_v20 = vadd.f32 %v5607_v32, %v2831_v46  ;;  %v4210_v46 = vld [vmem:[%s5910_s14 + $0x88] sm:$0xf] }
0x1317   : > { %3433 = vmatpush.bf16.msra.mxu0 %v4485_v42 }
0x131b   : > { %3434 = vmatpush.bf16.msra.mxu0 %v4484_v16 }
0x131f   : > { %3435 = vmatpush.bf16.msra.mxu0 %v4483_v22 }
0x1384   : > { %v3044_v48 = vpop.f32.mrf.mxu3 }
0x1386   : > { %v2947_v49 = vpop.f32.mrf.mxu0 }
0x1387   : > { %v2952_v50 = vadd.f32 %v2947_v49, %v2853_v47  ;;  %v4467_v47 = vld [vmem:[%s5910_s14 + $0x94] sm:$0xf0]  ;;  %v4207_v49 = vor.u32 %v4464_v44, %v4204_v45 }
0x1389   : > { %v3049_v51 = vadd.f32 %v3044_v48, %v2952_v50  ;;  %v4211_v50 = vor.u32 %v4467_v47, %v4210_v46 }
0x138b   : > { %v3051_v56 = vadd.f32 %v3049_v51, %v5448_v19  ;;  %v4465_v51 = vld [vmem:[%s5910_s14 + $0x8c] sm:$0xf]  ;;  %3225 = vmatpush.bf16.msra.mxu2 %v4211_v50 }
0x138c   : > { %v3046_v30 = vpop.f32.mrf.mxu3 }
0x138d   : > { %v5651_v57 = vadd.f32 %v4529_v55, %v3051_v56 }
0x138e   : > { %v2949_v10 = vpop.f32.mrf.mxu0 }
0x138f   : > { %v2953_v61 = vadd.f32 %v2949_v10, %v2855_v20  ;;  %v3058_v7 = vmul.f32 %v5651_v57, %v5651_v57 }
0x1391   : > { %v3050_v59 = vadd.f32 %v3046_v30, %v2953_v61  ;;  %v3060_v60 = vsel %vm1234_vm0, %v3058_v7, 0.0 }
0x1392   : > { %3061 = vadd.xlane.f32.xlu1 %v3060_v60 }
0x1393   : > { %v3052_v4 = vadd.f32 %v3050_v59, %v5454_v27  ;;  %v4476_v27 = vld [vmem:[%s5910_s14 + $0xe4] sm:$0xf] }
0x1394   : > { %v4255_v8 = vor.u32 %v4476_v27, %v4252_v3 }
0x1395   : > { %v5657_v62 = vadd.f32 %v4529_v55, %v3052_v4  ;;  %v4212_v55 = vld [vmem:[%s5910_s14 + $0x98] sm:$0xf0] }
0x1396   : > { %3208 = vmatpush.bf16.msra.mxu1 %v4255_v8  ;;  %v4215_v56 = vor.u32 %v4465_v51, %v4212_v55 }
0x1397   : > { %v3059_v19 = vmul.f32 %v5657_v62, %v5657_v62 }
0x1398   : > { %3239 = vmatpush.bf16.msrb.mxu3 %v4215_v56 }
0x1399   : > { %v3063_v32 = vsel %vm1238_vm1, %v3059_v19, 0.0 }
0x139a   : > { %3064 = vadd.xlane.f32.xlu0 %v3063_v32  ;;  %3209 = vmatpush.bf16.msra.mxu1 %v4239_v40  ;;  %v5790_v40 = vld [vmem:[%s5911_s15 + $0x4] sm:$0xf] }
0x139b   : > { %v3099_v63 = vperm.slane %v5790_v40, 0  ;;  %v3100_v38 = vperm.slane %v5790_v40, 1 }
0x139e   : > { %3210 = vmatpush.bf16.msra.mxu1 %v4223_v31  ;;  %v4482_v31 = vld [vmem:[%s5912_s16 + $0x90] sm:$0xff] }
0x139f   : > { %3436 = vmatpush.bf16.msra.mxu0 %v4482_v31 }
0x13a2   : > { %3211 = vmatpush.bf16.msra.mxu1 %v4207_v49  ;;  %v4488_v49 = vld [vmem:[%s5912_s16 + $0xc0] sm:$0xff] }
0x13a6   : > { %3445 = vmatpush.bf16.msrb.mxu1 %v4495_v15 }
0x13aa   : > { %3446 = vmatpush.bf16.msrb.mxu1 %v4494_v52 }
0x13ae   : > { %3447 = vmatpush.bf16.msrb.mxu1 %v4493_v43 }
0x13b2   : > { %3448 = vmatpush.bf16.msrb.mxu1 %v4492_v21 }
0x13b6   : > { %3449 = vmatpush.bf16.msrb.mxu1 %v4491_v23 }
0x13ba   : > { %3450 = vmatpush.bf16.msrb.mxu1 %v4490_v25 }
0x13be   : > { %3451 = vmatpush.bf16.msrb.mxu1 %v4489_v35 }
0x13c2   : > { %3452 = vmatpush.bf16.msrb.mxu1 %v4488_v49 }
0x1405   : > { %v3062_v29 = vpop.xlane.xlu1 %3061 }
0x1406   : > { %v3066_v58 = vmul.f32 %v3062_v29, %v4977_v41 }
0x1408   : > { %v3068_v48 = vadd.f32 1e-06, %v3066_v58  ;;  %v4481_v58 = vld [vmem:[%s5912_s16 + $0x88] sm:$0xff] }
0x1409   : > { %3437 = vmatpush.bf16.msra.mxu0 %v4481_v58  ;;  %v3102_v58 = vperm.slane %v5790_v40, 3 }
0x140a   : > { %4632 = vrsqrt.f32 %v3068_v48  ;;  %vm3076_vm4 = vweird.f32 %v3068_v48 }
0x140d   : > { %v3065_v20 = vpop.xlane.xlu0 %3064 }
0x140e   : > { %v3067_v10 = vmul.f32 %v3065_v20, %v4977_v41 }
0x1410   : > { %v4633_v61 = vpop.eup %4632  ;;  %v3069_v7 = vadd.f32 1e-06, %v3067_v10 }
0x1411   : > { %v3071_v30 = vmul.f32 %v4633_v61, %v3068_v48  ;;  %vm3077_vm3 = vweird.f32 %v4633_v61  ;;  %v4480_v48 = vld [vmem:[%s5912_s16 + $0x80] sm:$0xff] }
0x1412   : > { %4634 = vrsqrt.f32 %v3069_v7  ;;  %vm3078_vm5 = vmor %vm3076_vm4, %vm3077_vm3  ;;  %vm3086_vm15 = vweird.f32 %v3069_v7  ;;  %3438 = vmatpush.bf16.msra.mxu0 %v4480_v48 }
0x1413   : > { %v3072_v59 = vmul.f32 %v4633_v61, %v3071_v30 }
0x1415   : > { %v3073_v60 = vmul.f32 0.5, %v3072_v59 }
0x1417   : > { %v3074_v4 = vsub.f32 1.5, %v3073_v60 }
0x1418   : > { %v4635_v19 = vpop.eup %4634 }
0x1419   : > { %v3081_v32 = vmul.f32 %v4635_v19, %v3069_v7  ;;  %v3075_v0 = vmul.f32 %v4633_v61, %v3074_v4  ;;  %vm3087_vm6 = vweird.f32 %v4635_v19 }
0x141a   : > { %vm3088_vm2 = vmor %vm3086_vm15, %vm3087_vm6 }
0x141b   : > { %v3082_v1 = vmul.f32 %v4635_v19, %v3081_v32  ;;  %v3079_v2 = vsel %vm3078_vm5, %v4633_v61, %v3075_v0 }
0x141c   : > { %v3090_v8 = vmul.f32 %v3079_v2, %v5651_v57 }
0x141d   : > { %v3083_v27 = vmul.f32 0.5, %v3082_v1 }
0x141e   : > { %v3095_v13 = vmul.f32 %v4530_v5, %v3090_v8 }
0x141f   : > { %v3084_v3 = vsub.f32 1.5, %v3083_v27 }
0x1421   : > { %v3085_v39 = vmul.f32 %v4635_v19, %v3084_v3 }
0x1423   : > { %v3089_v11 = vsel %vm3088_vm2, %v4635_v19, %v3085_v39 }
0x1424   : > { %v3091_v28 = vmul.f32 %v3089_v11, %v5657_v62 }
0x1426   : > { %v3096_v14 = vmul.f32 %v4530_v5, %v3091_v28 }
0x1428   : > { %v3097_v6 = vpack.c.bf16 %v3096_v14, %v3095_v13 }
0x142a   : > { %4264 = vmatmul.msk.bf16.vlgmr.msrb.gmra.mxu0 %vm1234_vm0, %v3097_v6  ;;  %4265 = vmatmul.msk.bf16.vlgmr.msra.gmra.mxu1 %vm1234_vm0, %v3097_v6 }
0x142b   : > { %4266 = vmatmul.msk.bf16.vlgmr.msra.gmra.mxu2 %vm1234_vm0, %v3097_v6  ;;  %4267 = vmatmul.msk.bf16.vlgmr.msrb.gmra.mxu3 %vm1234_vm0, %v3097_v6  ;;  %v3101_v6 = vperm.slane %v5790_v40, 2 }
0x14a7   : > { %v3199_v17 = vpop.f32.mrf.mxu0  ;;  %v3213_v54 = vpop.f32.mrf.mxu1 }
0x14a8   : > { %v5806_v9 = vadd.f32 %v3199_v17, %v3099_v63  ;;  %v5808_v26 = vadd.f32 %v3213_v54, %v3100_v38 }
0x14aa   : > { %v4268_v18 = vmul.f32 -1.442695, %v5806_v9  ;;  %v4269_v29 = vmul.f32 -1.442695, %v5808_v26 }
0x14ac   : > { %4636 = vpow2.f32 %v4268_v18 }
0x14ad   : > { %4638 = vpow2.f32 %v4269_v29 }
0x14ae   : > { %v3227_v32 = vpop.f32.mrf.mxu2  ;;  %v3241_v3 = vpop.f32.mrf.mxu3 }
0x14af   : > { %v3201_v33 = vpop.f32.mrf.mxu0  ;;  %v3215_v34 = vpop.f32.mrf.mxu1 }
0x14b0   : > { %v5824_v37 = vadd.f32 %v3201_v33, %v3099_v63  ;;  %v5826_v36 = vadd.f32 %v3215_v34, %v3100_v38 }
0x14b2   : > { %v4637_v44 = vpop.eup %4636  ;;  %v4270_v53 = vmul.f32 -1.442695, %v5824_v37  ;;  %v4271_v47 = vmul.f32 -1.442695, %v5826_v36 }
0x14b3   : > { %v4639_v45 = vpop.eup %4638  ;;  %v3258_v46 = vadd.f32 1.0, %v4637_v44 }
0x14b4   : > { %v3259_v50 = vadd.f32 1.0, %v4639_v45  ;;  %4640 = vpow2.f32 %v4270_v53  ;;  %v3228_v53 = vadd.f32 %v3227_v32, %v3101_v6 }
0x14b5   : > { %4642 = vrcp.f32 %v3258_v46  ;;  %v3273_v27 = vand.u32 2147483648, %v3258_v46  ;;  %vm3267_vm8 = vweird.f32 %v3258_v46  ;;  %v3271_v2 = vand.u32 2147483647, %v3258_v46 }
0x14b6   : > { %4644 = vrcp.f32 %v3259_v50  ;;  %v3286_v11 = vand.u32 2147483647, %v3259_v50  ;;  %v3288_v14 = vand.u32 2147483648, %v3259_v50  ;;  %vm3282_vm11 = vweird.f32 %v3259_v50  ;;  %v3229_v31 = vpop.f32.mrf.mxu2  ;;  %v3243_v48 = vpop.f32.mrf.mxu3 }
0x14b7   : > { %4646 = vpow2.f32 %v4271_v47  ;;  %v3274_v15 = vor.u32 1.1754944e-38, %v3273_v27  ;;  %vm3272_vm12 = vcmp.eq.f32.partialorder %v3271_v2, 8.507059e+37  ;;  %v3230_v47 = vadd.f32 %v3229_v31, %v3101_v6 }
0x14b8   : > { %vm3287_vm3 = vcmp.eq.f32.partialorder %v3286_v11, 8.507059e+37  ;;  %v3289_v17 = vor.u32 1.1754944e-38, %v3288_v14  ;;  %v4497_v11 = vld [vmem:[%s5915_s19 + $0x8] sm:$0xff] }
0x14ba   : > { %v4641_v51 = vpop.eup %4640 }
0x14bb   : > { %v4643_v55 = vpop.eup %4642  ;;  %v3260_v56 = vadd.f32 1.0, %v4641_v51 }
0x14bc   : > { %v4645_v20 = vpop.eup %4644  ;;  %v3263_v10 = vmul.f32 %v4643_v55, %v3258_v46  ;;  %vm3268_vm7 = vweird.f32 %v4643_v55 }
0x14bd   : > { %v4647_v61 = vpop.eup %4646  ;;  %v3278_v7 = vmul.f32 %v4645_v20, %v3259_v50  ;;  %4648 = vrcp.f32 %v3260_v56  ;;  %vm5839_vm9 = vmor %vm3267_vm8, %vm3268_vm7  ;;  %vm3283_vm10 = vweird.f32 %v4645_v20  ;;  %v3303_v24 = vand.u32 2147483648, %v3260_v56 }
0x14be   : > { %v3264_v30 = vsub.f32 1.0, %v3263_v10  ;;  %v5836_v59 = vadd.f32 1.0, %v4647_v61  ;;  %vm5847_vm13 = vmor %vm3282_vm11, %vm3283_vm10  ;;  %v3301_v16 = vand.u32 2147483647, %v3260_v56  ;;  %vm3297_vm4 = vweird.f32 %v3260_v56 }
0x14bf   : > { %v3279_v60 = vsub.f32 1.0, %v3278_v7  ;;  %v3304_v23 = vor.u32 1.1754944e-38, %v3303_v24 }
0x14c0   : > { %v3265_v4 = vmul.f32 %v4643_v55, %v3264_v30  ;;  %4650 = vrcp.f32 %v5836_v59  ;;  %v3318_v22 = vand.u32 2147483648, %v5836_v59  ;;  %v3316_v29 = vand.u32 2147483647, %v5836_v59  ;;  %v4531_v30 = vld [vmem:[%s5913_s17 + $0x1] ss:$0 sm:$0xff] }
0x14c1   : > { %v3280_v19 = vmul.f32 %v4645_v20, %v3279_v60  ;;  %vm3302_vm15 = vcmp.eq.f32.partialorder %v3301_v16, 8.507059e+37  ;;  %vm3312_vm2 = vweird.f32 %v5836_v59 }
0x14c2   : > { %v3266_v0 = vadd.f32 %v4643_v55, %v3265_v4  ;;  %v3319_v46 = vor.u32 1.1754944e-38, %v3318_v22  ;;  %vm3317_vm8 = vcmp.eq.f32.partialorder %v3316_v29, 8.507059e+37 }
0x14c3   : > { %v4649_v1 = vpop.eup %4648  ;;  %v3281_v8 = vadd.f32 %v4645_v20, %v3280_v19 }
0x14c4   : > { %v3293_v39 = vmul.f32 %v4649_v1, %v3260_v56  ;;  %v3270_v13 = vsel %vm5839_vm9, %v4643_v55, %v3266_v0  ;;  %vm3298_vm14 = vweird.f32 %v4649_v1  ;;  %v3242_v56 = vadd.f32 %v3241_v3, %v3102_v58 }
0x14c5   : > { %v3275_v21 = vsel %vm3272_vm12, %v3274_v15, %v3270_v13  ;;  %v3285_v63 = vsel %vm5847_vm13, %v4645_v20, %v3281_v8  ;;  %vm3299_vm5 = vmor %vm3297_vm4, %vm3298_vm14  ;;  %v3244_v20 = vadd.f32 %v3243_v48, %v3102_v58  ;;  %v4499_v8 = vld [vmem:[%s5915_s19 + $0x18] sm:$0xff]  ;;  %v4496_v13 = vld [vmem:[%s5915_s19] sm:$0xff]  ;;  %vm3555_vm14 = vcmask 261120  }
0x14c6   : > { %v4651_v28 = vpop.eup %4650  ;;  %v3294_v12 = vsub.f32 1.0, %v3293_v39  ;;  %v3322_v25 = vmul.f32 %v3275_v21, %v5806_v9  ;;  %v3290_v33 = vsel %vm3287_vm3, %v3289_v17, %v3285_v63  ;;  %3545 = vmatpush.bf16.msrb.mxu2 %v4499_v8  ;;  %vm3557_vm3 = vcmask 253952  }
0x14c7   : > { %v3308_v52 = vmul.f32 %v4651_v28, %v5836_v59  ;;  %vm3313_vm6 = vweird.f32 %v4651_v28  ;;  %v3323_v49 = vmul.f32 %v3290_v33, %v5808_v26 }
0x14c8   : > { %v3295_v43 = vmul.f32 %v4649_v1, %v3294_v12  ;;  %vm3314_vm7 = vmor %vm3312_vm2, %vm3313_vm6  ;;  %v3326_v9 = vmul.f32 %v3322_v25, %v3228_v53 }
0x14c9   : > { %v3309_v38 = vsub.f32 1.0, %v3308_v52  ;;  %v3327_v61 = vmul.f32 %v3323_v49, %v3242_v56 }
0x14ca   : > { %v3296_v54 = vadd.f32 %v4649_v1, %v3295_v43 }
0x14cb   : > { %v3310_v18 = vmul.f32 %v4651_v28, %v3309_v38 }
0x14cc   : > { %v3300_v34 = vsel %vm3299_vm5, %v4649_v1, %v3296_v54 }
0x14cd   : > { %v3305_v35 = vsel %vm3302_vm15, %v3304_v23, %v3300_v34  ;;  %v3311_v44 = vadd.f32 %v4651_v28, %v3310_v18  ;;  %v4532_v18 = vld [vmem:[%s5914_s18] ss:$0 sm:$0xff] }
0x14ce   : > { %v3324_v45 = vmul.f32 %v3305_v35, %v5824_v37  ;;  %v4533_v35 = vld [vmem:[%s5916_s20] ss:$0 sm:$0xff] }
0x14cf   : > { %v3315_v50 = vsel %vm3314_vm7, %v4651_v28, %v3311_v44 }
0x14d0   : > { %v3320_v51 = vsel %vm3317_vm8, %v3319_v46, %v3315_v50  ;;  %v3328_v55 = vmul.f32 %v3324_v45, %v3230_v47 }
0x14d1   : > { %v3325_v40 = vmul.f32 %v3320_v51, %v5826_v36 }
0x14d2   : > { %v3330_v10 = vpack.c.bf16 %v3328_v55, %v3326_v9 }
0x14d3   : > { %v3329_v7 = vmul.f32 %v3325_v40, %v3244_v20 }
0x14d4   : > { %3439 = vmatmul.bf16.vlgmr.msra.gmra.mxu0 %v3330_v10 }
0x14d5   : > { %v3331_v37 = vpack.c.bf16 %v3329_v7, %v3327_v61 }
0x14d7   : > { %3453 = vmatmul.bf16.vlgmr.msrb.gmra.mxu1 %v3331_v37 }
0x1551   : > { %v3440_v26 = vpop.f32.mrf.mxu0 }
0x1552   : > { %v3441_v59 = vadd.f32 %v4531_v30, %v3440_v26 }
0x1554   : > { %v3454_v60 = vpop.f32.mrf.mxu1 }
0x1555   : > { %v3455_v4 = vadd.f32 %v3454_v60, %v3441_v59 }
0x1557   : > { %v3459_v19 = vadd.f32 %v3455_v4, %v5651_v57  ;;  %v4498_v57 = vld [vmem:[%s5915_s19 + $0x10] sm:$0xff] }
0x1558   : > { %3546 = vmatpush.bf16.msrb.mxu2 %v4498_v57 }
0x1559   : > { %v3442_v32 = vpop.f32.mrf.mxu0  ;;  %v3461_v0 = vmul.f32 %v3459_v19, %v3459_v19 }
0x155a   : > { %v3443_v36 = vadd.f32 %v4531_v30, %v3442_v32 }
0x155b   : > { %v3463_v1 = vsel %vm1234_vm0, %v3461_v0, 0.0 }
0x155c   : > { %v3456_v27 = vpop.f32.mrf.mxu1  ;;  %3464 = vadd.xlane.f32.xlu1 %v3463_v1  ;;  %3547 = vmatpush.bf16.msrb.mxu2 %v4497_v11 }
0x155d   : > { %v3457_v2 = vadd.f32 %v3456_v27, %v3443_v36 }
0x155f   : > { %v3460_v3 = vadd.f32 %v3457_v2, %v5657_v62 }
0x1560   : > { %3548 = vmatpush.bf16.msrb.mxu2 %v4496_v13 }
0x1561   : > { %v3462_v39 = vmul.f32 %v3460_v3, %v3460_v3 }
0x1563   : > { %v3466_v5 = vsel %vm1238_vm1, %v3462_v39, 0.0 }
0x1564   : > { %3467 = vadd.xlane.f32.xlu1 %v3466_v5 }
0x15cf   : > { %v3465_v28 = vpop.xlane.xlu1 %3464 }
0x15d0   : > { %v3469_v62 = vmul.f32 %v3465_v28, %v4977_v41 }
0x15d2   : > { %v3471_v14 = vadd.f32 1e-06, %v3469_v62 }
0x15d4   : > { %4652 = vrsqrt.f32 %v3471_v14  ;;  %vm3479_vm9 = vweird.f32 %v3471_v14 }
0x15d7   : > { %v3468_v6 = vpop.xlane.xlu1 %3467 }
0x15d8   : > { %v3470_v12 = vmul.f32 %v3468_v6, %v4977_v41 }
0x15da   : > { %v4653_v15 = vpop.eup %4652  ;;  %v3472_v24 = vadd.f32 1e-06, %v3470_v12 }
0x15db   : > { %v3474_v52 = vmul.f32 %v4653_v15, %v3471_v14  ;;  %vm3480_vm1 = vweird.f32 %v4653_v15 }
0x15dc   : > { %4654 = vrsqrt.f32 %v3472_v24  ;;  %vm3481_vm10 = vmor %vm3479_vm9, %vm3480_vm1  ;;  %vm3489_vm12 = vweird.f32 %v3472_v24 }
0x15dd   : > { %v3475_v42 = vmul.f32 %v4653_v15, %v3474_v52 }
0x15df   : > { %v3476_v43 = vmul.f32 0.5, %v3475_v42 }
0x15e1   : > { %v3477_v16 = vsub.f32 1.5, %v3476_v43 }
0x15e2   : > { %v4655_v21 = vpop.eup %4654 }
0x15e3   : > { %v3484_v63 = vmul.f32 %v4655_v21, %v3472_v24  ;;  %v3478_v38 = vmul.f32 %v4653_v15, %v3477_v16  ;;  %vm3490_vm11 = vweird.f32 %v4655_v21 }
0x15e4   : > { %vm3491_vm13 = vmor %vm3489_vm12, %vm3490_vm11 }
0x15e5   : > { %v3485_v17 = vmul.f32 %v4655_v21, %v3484_v63  ;;  %v3482_v22 = vsel %vm3481_vm10, %v4653_v15, %v3478_v38 }
0x15e6   : > { %v3493_v29 = vmul.f32 %v3482_v22, %v3459_v19 }
0x15e7   : > { %v3486_v54 = vmul.f32 0.5, %v3485_v17 }
0x15e8   : > { %v3499_v33 = vmul.f32 %v4532_v18, %v3493_v29 }
0x15e9   : > { %v3487_v23 = vsub.f32 1.5, %v3486_v54 }
0x15eb   : > { %v3488_v41 = vmul.f32 %v4655_v21, %v3487_v23 }
0x15ed   : > { %v3492_v31 = vsel %vm3491_vm13, %v4655_v21, %v3488_v41 }
0x15ee   : > { %v3494_v25 = vmul.f32 %v3492_v31, %v3460_v3 }
0x15f0   : > { %v3500_v34 = vmul.f32 %v4532_v18, %v3494_v25 }
0x15f2   : > { %v3501_v58 = vpack.c.bf16 %v3500_v34, %v3499_v33 }
0x15f4   : > { %4352 = vmatmul.msk.bf16.vlgmr.msrb.gmra.mxu2 %vm1234_vm0, %v3501_v58 }
0x1677   : > { %v3550_v44 = vpop.f32.mrf.mxu2 }
0x1678   : > { %v3551_v53 = vadd.f32 %v4533_v35, %v3550_v44 }
0x167a   : > { %3556 = vst.msk [vmem:[%s736_s5] sm:$0xff] %vm3555_vm14, %v3551_v53 }
0x167f   : > { %v3552_v45 = vpop.f32.mrf.mxu2 }
0x1680   : > { %v3553_v46 = vadd.f32 %v4533_v35, %v3552_v45 }
0x1682   : > { %3558 = vst.msk [vmem:[%s736_s5 + $0x8] sm:$0x1] %vm3557_vm3, %v3553_v46 }
0x1683 PF: > { %s5968_s0 = sld [smem:[#allocation2_spill]] }
0x1689   : > { %s31_s2 = sadd.s32 1, %s5968_s0  }
0x168a   : > { %p28_p4 = scmp.ge.s32.totalorder %s31_s2, 4  }
0x168c   :  { %30 = sbr.rel (!%p28_p4) target bundleno = 7 (0x7), region = 156 }

</bundles_post_ra>
